<compile_context>
chip_gen: v6e
topology: v6e:2x2x1
jax: 0.10.0
libtpu: 0.0.40
codegen_flags: <defaults>
</compile_context>

<pallas_src>
import functools

import jax
import jax.numpy as jnp
from jax.experimental import pallas as pl
from jax.experimental.pallas import tpu as pltpu

BN_EPS = 1e-5
BN_MOMENTUM = 0.1          # unused by the forward output (training-mode BN)
DIVIDE_VALUE = 1.0


def _fused_kernel(x_ref, w_ref, gb_ref, o_ref, acc_ref, *, eps, precision):
    # x_ref:   (B, tk)   activations: full batch, K tile
    # w_ref:   (tn, tk)  weight tile in native (out_features, in_features) layout
    # gb_ref:  (2, tn)   row 0: gamma' = bn_weight / divide
    #                    row 1: beta'  = (bn_bias + add_bias) / divide
    # o_ref:   (B, tn)   output tile
    # acc_ref: (B, tn)   f32 accumulator, resident across the K grid axis
    k = pl.program_id(1)

    @pl.when(k == 0)
    def _():
        acc_ref[...] = jnp.zeros_like(acc_ref)

    # Contract K on both operands -> (B, tn). The MXU consumes the transposed
    # RHS natively, so the weight needs no HBM-side or in-VMEM transpose.
    acc_ref[...] += jax.lax.dot_general(
        x_ref[...], w_ref[...], (((1,), (1,)), ((), ())),
        preferred_element_type=jnp.float32, precision=precision)

    @pl.when(k == pl.num_programs(1) - 1)
    def _():
        y = acc_ref[...]
        # BatchNorm1d, training mode: batch statistics, biased variance,
        # folded together with the BN affine (+add_bias, /divide already
        # baked in) into one per-column scale/shift.
        mean = jnp.mean(y, axis=0, keepdims=True)                  # (1, tn)
        var = jnp.mean(jnp.square(y - mean), axis=0, keepdims=True)
        scale = gb_ref[0:1, :] * jax.lax.rsqrt(var + eps)          # (1, tn)
        shift = gb_ref[1:2, :] - mean * scale                      # (1, tn)
        z = y * scale + shift
        o_ref[...] = (z * jax.nn.sigmoid(z)).astype(o_ref.dtype)   # Swish


def _tpu_limits():
    """(per-core VMEM capacity bytes, TensorCores per chip) with safe fallbacks."""
    vmem_cap = 64 << 20  # conservative default (v7x per-core VMEM)
    try:
        info = pltpu.get_tpu_info()
        vmem_cap = int(getattr(info, "vmem_capacity_bytes", vmem_cap))
    except Exception:
        pass
    kind = ""
    try:
        kind = jax.devices()[0].device_kind.lower()
    except Exception:
        pass
    # v4 / v5p (megacore) and v7x have 2 TensorCores per chip; v5e/v6e have 1.
    num_tc = 2 if any(tag in kind for tag in ("v7", "v4", "v5p")) else 1
    return vmem_cap, num_tc


def _pick_tiles(B, K, N, bpe_x, bpe_w, vmem_cap, num_tc):
    """Pick (tn, tk) maximizing tile size under a generation-aware VMEM budget."""
    budget = max(int(vmem_cap * 0.6), 8 << 20)

    def bytes_needed(tn, tk):
        nk = K // tk
        x_buf = (1 if nk == 1 else 2) * B * tk * bpe_x   # single-buffer if resident
        w_buf = 2 * tn * tk * bpe_w                      # double-buffered weight tile
        o_buf = 2 * B * tn * 4                           # double-buffered output tile
        acc = B * tn * 4                                 # f32 accumulator scratch
        params = 2 * 2 * N * 4                           # packed gamma'/beta'
        return x_buf + w_buf + o_buf + acc + params

    tn_cands = sorted({c for c in (N, 2048, 1024, 512, 256, 128)
                       if c <= N and N % c == 0}, reverse=True)
    tk_cands = sorted({c for c in (K, 4096, 2048, 1024, 512, 256)
                       if c <= K and K % c == 0}, reverse=True)

    def search(require_balanced_steps):
        for tn in tn_cands:
            if require_balanced_steps and (N // tn) % num_tc != 0:
                continue
            for tk in tk_cands:
                if bytes_needed(tn, tk) <= budget:
                    return tn, tk
        return None

    pick = None
    if num_tc > 1:
        # Multi-TC: prefer a step count divisible by the core count so the
        # "parallel" N axis shards evenly; single-TC: just take the biggest tile.
        pick = search(True)
    if pick is None:
        pick = search(False)
    if pick is None:
        pick = (tn_cands[-1], tk_cands[-1])
    return pick


def fused_forward(x, weight, bias, bn_weight, bn_bias, add_bias, *,
                  eps=BN_EPS, divide_value=DIVIDE_VALUE,
                  compute_dtype=jnp.bfloat16, tn=None, tk=None):
    """x: (B, K); weight: (N, K) in native nn.Linear layout; returns (B, N) f32."""
    B, K = x.shape
    N, K2 = weight.shape
    assert K == K2
    # The linear bias shifts every output column by a constant, which the
    # batch-mean subtraction of *training-mode* BN removes exactly, so it is
    # dropped. (Not valid for eval-mode BN with running statistics.)
    del bias

    if compute_dtype is not None:
        x = x.astype(compute_dtype)
        weight = weight.astype(compute_dtype)
    precision = (jax.lax.Precision.HIGHEST
                 if jnp.dtype(x.dtype) == jnp.dtype(jnp.float32)
                 else jax.lax.Precision.DEFAULT)

    bpe_x = jnp.dtype(x.dtype).itemsize
    bpe_w = jnp.dtype(weight.dtype).itemsize
    vmem_cap, num_tc = _tpu_limits()
    if tn is None or tk is None:
        ptn, ptk = _pick_tiles(B, K, N, bpe_x, bpe_w, vmem_cap, num_tc)
        tn = tn or ptn
        tk = tk or ptk
    assert N % tn == 0 and K % tk == 0
    nj, nk = N // tn, K // tk

    # Fold add_bias and the divide into the BN affine params, packed as (2, N).
    gamma = (bn_weight / divide_value).astype(jnp.float32).reshape(1, N)
    beta = ((bn_bias + add_bias) / divide_value).astype(jnp.float32).reshape(1, N)
    gb = jnp.concatenate([gamma, beta], axis=0)                    # (2, N)

    kernel = functools.partial(_fused_kernel, eps=float(eps), precision=precision)

    def vmem_bytes(single_x):
        return ((1 if single_x else 2) * B * tk * bpe_x
                + 2 * tn * tk * bpe_w
                + 2 * B * tn * 4 + B * tn * 4
                + 2 * 2 * N * 4)

    def build(single_x):
        x_kwargs = {"pipeline_mode": pl.Buffered(1)} if single_x else {}
        vmem_limit = int(min(vmem_cap, max(vmem_bytes(single_x) + (4 << 20),
                                           32 << 20)))
        return pl.pallas_call(
            kernel,
            out_shape=jax.ShapeDtypeStruct((B, N), jnp.float32),
            grid_spec=pltpu.PrefetchScalarGridSpec(
                num_scalar_prefetch=0,
                grid=(nj, nk),                        # N parallel, K reduction (inner)
                in_specs=[
                    pl.BlockSpec((B, tk), lambda j, k: (0, k), **x_kwargs),
                    pl.BlockSpec((tn, tk), lambda j, k: (j, k)),   # native-layout W tile
                    pl.BlockSpec((2, tn), lambda j, k: (0, j)),    # packed gamma'/beta'
                ],
                out_specs=pl.BlockSpec((B, tn), lambda j, k: (0, j)),
                scratch_shapes=[pltpu.VMEM((B, tn), jnp.float32)],
            ),
            compiler_params=pltpu.CompilerParams(
                dimension_semantics=("parallel", "arbitrary"),
                vmem_limit_bytes=vmem_limit,
            ),
        )

    single_x = (nk == 1)   # x block is grid-invariant -> no need to double-buffer
    try:
        return build(single_x)(x, weight, gb)
    except Exception:
        if not single_x:
            raise
        # pl.Buffered(1) unsupported on this jax/platform combo: fall back to
        # the default double-buffered pipeline for the grid-invariant x.
        return build(False)(x, weight, gb)


def reference_forward(x, weight, bias, bn_weight, bn_bias, add_bias,
                      eps=BN_EPS, divide_value=DIVIDE_VALUE):
    y = x @ weight.T + bias
    mean = jnp.mean(y, axis=0, keepdims=True)
    var = jnp.mean(jnp.square(y - mean), axis=0, keepdims=True)
    y = (y - mean) / jnp.sqrt(var + eps) * bn_weight + bn_bias
    y = (y + add_bias) / divide_value
    return y * jax.nn.sigmoid(y)


if __name__ == "__main__":
    # Shapes consistent with the module spec (batch kept small).
    batch, in_features, out_features = 16, 1024, 512

    key = jax.random.PRNGKey(0)
    kx, kw, kb, kab = jax.random.split(key, 4)

    x = jax.random.normal(kx, (batch, in_features), dtype=jnp.float32)

    # nn.Linear-style deterministic init.
    bound = 1.0 / (in_features ** 0.5)
    weight = jax.random.uniform(kw, (out_features, in_features),
                                minval=-bound, maxval=bound, dtype=jnp.float32)
    bias = jax.random.uniform(kb, (out_features,),
                              minval=-bound, maxval=bound, dtype=jnp.float32)

    # BatchNorm1d init: weight=1, bias=0 (running stats unused by this forward).
    bn_weight = jnp.ones((out_features,), dtype=jnp.float32)
    bn_bias = jnp.zeros((out_features,), dtype=jnp.float32)

    add_bias = jax.random.normal(kab, (1,), dtype=jnp.float32) * 0.02

    out = fused_forward(x, weight, bias, bn_weight, bn_bias, add_bias)
    out = jax.block_until_ready(out)
    assert out.shape == (batch, out_features)

    # Tight check: reference on the same bf16-rounded operands isolates the
    # kernel's fusion/math from the intentional bf16 streaming.
    xb = x.astype(jnp.bfloat16).astype(jnp.float32)
    wb = weight.astype(jnp.bfloat16).astype(jnp.float32)
    ref_bf16 = reference_forward(xb, wb, bias, bn_weight, bn_bias, add_bias)
    assert jnp.allclose(out, ref_bf16, atol=3e-3, rtol=3e-3), "mismatch (bf16 ref)"

    # Loose check vs. the full-f32 module semantics (covers bf16 input
    # rounding accumulated over K=1024).
    ref_f32 = reference_forward(x, weight, bias, bn_weight, bn_bias, add_bias)
    assert jnp.allclose(out, ref_f32, atol=5e-2, rtol=5e-2), "mismatch (f32 ref)"

    print("KERNEL_OK")
</pallas_src>

<mosaic_0001>
module attributes {stable_mosaic.version = 11 : i64} {
  func.func @_fused_kernel(%arg0: i32, %arg1: i32, %arg2: memref<16x1024xbf16, #tpu.memory_space<vmem>>, %arg3: memref<512x1024xbf16, #tpu.memory_space<vmem>>, %arg4: memref<2x512xf32, #tpu.memory_space<vmem>>, %arg5: memref<16x512xf32, #tpu.memory_space<vmem>>, %arg6: memref<16x512xf32, #tpu.memory_space<vmem>>) attributes {dimension_semantics = [#tpu.dimension_semantics<parallel>, #tpu.dimension_semantics<arbitrary>], iteration_bounds = array<i64: 1, 1>, scalar_prefetch = 0 : i64, scratch_operands = 1 : i64, tpu.core_type = #tpu.core_type<tc>, window_params = [{pipeline_mode = #tpu.pipeline_mode<synchronous>, transform_indices = @transform_0, window_bounds = array<i64: 16, 1024>}, {transform_indices = @transform_1, window_bounds = array<i64: 512, 1024>}, {transform_indices = @transform_2, window_bounds = array<i64: 2, 512>}, {transform_indices = @transform_3, window_bounds = array<i64: 16, 512>}]} {
    %c0_i32 = arith.constant 0 : i32
    %0 = arith.cmpi eq, %arg1, %c0_i32 : i32
    %1 = arith.extui %0 : i1 to i32
    %c0_i32_0 = arith.constant 0 : i32
    %2 = arith.cmpi ne, %1, %c0_i32_0 : i32
    scf.if %2 {
      %cst_10 = arith.constant 0.000000e+00 : f32
      %12 = vector.broadcast %cst_10 : f32 to vector<16x512xf32>
      %c0_11 = arith.constant 0 : index
      %c0_12 = arith.constant 0 : index
      %13 = vector.load %arg6[%c0_11, %c0_12] : memref<16x512xf32, #tpu.memory_space<vmem>>, vector<16x512xf32>
      tpu.vector_store %arg6[%c0_11, %c0_12], %12 {strides = array<i32>} : memref<16x512xf32, #tpu.memory_space<vmem>>, vector<16x512xf32>,
    } else {
    }
    %c0 = arith.constant 0 : index
    %c0_1 = arith.constant 0 : index
    %3 = vector.load %arg6[%c0, %c0_1] : memref<16x512xf32, #tpu.memory_space<vmem>>, vector<16x512xf32>
    %c0_2 = arith.constant 0 : index
    %c0_3 = arith.constant 0 : index
    %4 = vector.load %arg2[%c0_2, %c0_3] : memref<16x1024xbf16, #tpu.memory_space<vmem>>, vector<16x1024xbf16>
    %c0_4 = arith.constant 0 : index
    %c0_5 = arith.constant 0 : index
    %5 = vector.load %arg3[%c0_4, %c0_5] : memref<512x1024xbf16, #tpu.memory_space<vmem>>, vector<512x1024xbf16>
    %cst = arith.constant dense<0.000000e+00> : vector<16x512xf32>
    %6 = tpu.matmul %4, %5, %cst {dimension_numbers = #tpu.dot_dimension_numbers<[1], [1], [0], [0], [0, 0, 1, 0], [], []>} : vector<16x1024xbf16>, vector<512x1024xbf16>, vector<16x512xf32> -> vector<16x512xf32>
    %7 = arith.addf %3, %6 : vector<16x512xf32>
    %c0_6 = arith.constant 0 : index
    %c0_7 = arith.constant 0 : index
    %8 = vector.load %arg6[%c0_6, %c0_7] : memref<16x512xf32, #tpu.memory_space<vmem>>, vector<16x512xf32>
    tpu.vector_store %arg6[%c0_6, %c0_7], %7 {strides = array<i32>} : memref<16x512xf32, #tpu.memory_space<vmem>>, vector<16x512xf32>,
    %c0_i32_8 = arith.constant 0 : i32
    %9 = arith.cmpi eq, %arg1, %c0_i32_8 : i32
    %10 = arith.extui %9 : i1 to i32
    %c0_i32_9 = arith.constant 0 : i32
    %11 = arith.cmpi ne, %10, %c0_i32_9 : i32
    scf.if %11 {
      %c0_10 = arith.constant 0 : index
      %c0_11 = arith.constant 0 : index
      %12 = vector.load %arg6[%c0_10, %c0_11] : memref<16x512xf32, #tpu.memory_space<vmem>>, vector<16x512xf32>
      %cst_12 = arith.constant dense<0.000000e+00> : vector<512xf32>
      %13 = vector.multi_reduction <add>, %12, %cst_12 [0] : vector<16x512xf32> to vector<512xf32>
      %14 = vector.shape_cast %13 : vector<512xf32> to vector<1x512xf32>
      %cst_13 = arith.constant 1.600000e+01 : f32
      %15 = vector.broadcast %cst_13 : f32 to vector<1x512xf32>
      %16 = arith.divf %14, %15 : vector<1x512xf32>
      %17 = vector.broadcast %16 : vector<1x512xf32> to vector<16x512xf32>
      %18 = arith.subf %12, %17 : vector<16x512xf32>
      %19 = arith.mulf %18, %18 : vector<16x512xf32>
      %cst_14 = arith.constant dense<0.000000e+00> : vector<512xf32>
      %20 = vector.multi_reduction <add>, %19, %cst_14 [0] : vector<16x512xf32> to vector<512xf32>
      %21 = vector.shape_cast %20 : vector<512xf32> to vector<1x512xf32>
      %cst_15 = arith.constant 1.600000e+01 : f32
      %22 = vector.broadcast %cst_15 : f32 to vector<1x512xf32>
      %23 = arith.divf %21, %22 : vector<1x512xf32>
      %c0_16 = arith.constant 0 : index
      %c0_17 = arith.constant 0 : index
      %24 = vector.load %arg4[%c0_16, %c0_17] : memref<2x512xf32, #tpu.memory_space<vmem>>, vector<1x512xf32>
      %cst_18 = arith.constant 9.99999974E-6 : f32
      %25 = vector.broadcast %cst_18 : f32 to vector<1x512xf32>
      %26 = arith.addf %23, %25 : vector<1x512xf32>
      %27 = math.rsqrt %26 : vector<1x512xf32>
      %28 = arith.mulf %24, %27 : vector<1x512xf32>
      %c1 = arith.constant 1 : index
      %c0_19 = arith.constant 0 : index
      %29 = vector.load %arg4[%c1, %c0_19] : memref<2x512xf32, #tpu.memory_space<vmem>>, vector<1x512xf32>
      %30 = arith.mulf %16, %28 : vector<1x512xf32>
      %31 = arith.subf %29, %30 : vector<1x512xf32>
      %32 = vector.broadcast %28 : vector<1x512xf32> to vector<16x512xf32>
      %33 = arith.mulf %12, %32 : vector<16x512xf32>
      %34 = vector.broadcast %31 : vector<1x512xf32> to vector<16x512xf32>
      %35 = arith.addf %33, %34 : vector<16x512xf32>
      %36 = arith.negf %35 : vector<16x512xf32>
      %37 = math.exp %36 : vector<16x512xf32>
      %cst_20 = arith.constant 1.000000e+00 : f32
      %38 = vector.broadcast %cst_20 : f32 to vector<16x512xf32>
      %39 = arith.addf %38, %37 : vector<16x512xf32>
      %40 = arith.divf %38, %39 : vector<16x512xf32>
      %41 = arith.mulf %35, %40 : vector<16x512xf32>
      %c0_21 = arith.constant 0 : index
      %c0_22 = arith.constant 0 : index
      %42 = vector.load %arg5[%c0_21, %c0_22] : memref<16x512xf32, #tpu.memory_space<vmem>>, vector<16x512xf32>
      tpu.vector_store %arg5[%c0_21, %c0_22], %41 {strides = array<i32>} : memref<16x512xf32, #tpu.memory_space<vmem>>, vector<16x512xf32>,
    } else {
    }
    return
  }
  func.func @transform_0(%arg0: i32, %arg1: i32) -> (i32, i32) {
    %c0_i32 = arith.constant 0 : i32
    %c0_i32_0 = arith.constant 0 : i32
    return %c0_i32, %arg1 : i32, i32
  }
  func.func @transform_1(%arg0: i32, %arg1: i32) -> (i32, i32) {
    %c0_i32 = arith.constant 0 : i32
    return %arg0, %arg1 : i32, i32
  }
  func.func @transform_2(%arg0: i32, %arg1: i32) -> (i32, i32) {
    %c0_i32 = arith.constant 0 : i32
    %c0_i32_0 = arith.constant 0 : i32
    return %c0_i32, %arg0 : i32, i32
  }
  func.func @transform_3(%arg0: i32, %arg1: i32) -> (i32, i32) {
    %c0_i32 = arith.constant 0 : i32
    %c0_i32_0 = arith.constant 0 : i32
    return %c0_i32, %arg0 : i32, i32
  }
}

module attributes {stable_mosaic.version = 11 : i64} {
  func.func @_fused_kernel(%arg0: i32, %arg1: i32, %arg2: memref<16x1024xbf16, #tpu.memory_space<vmem>>, %arg3: memref<512x1024xbf16, #tpu.memory_space<vmem>>, %arg4: memref<2x512xf32, #tpu.memory_space<vmem>>, %arg5: memref<16x512xf32, #tpu.memory_space<vmem>>, %arg6: memref<16x512xf32, #tpu.memory_space<vmem>>) attributes {dimension_semantics = [#tpu.dimension_semantics<parallel>, #tpu.dimension_semantics<arbitrary>], iteration_bounds = array<i64: 1, 1>, scalar_prefetch = 0 : i64, scratch_operands = 1 : i64, tpu.core_type = #tpu.core_type<tc>, window_params = [{transform_indices = @transform_0, window_bounds = array<i64: 16, 1024>}, {transform_indices = @transform_1, window_bounds = array<i64: 512, 1024>}, {transform_indices = @transform_2, window_bounds = array<i64: 2, 512>}, {transform_indices = @transform_3, window_bounds = array<i64: 16, 512>}]} {
    %c0_i32 = arith.constant 0 : i32
    %0 = arith.cmpi eq, %arg1, %c0_i32 : i32
    %1 = arith.extui %0 : i1 to i32
    %c0_i32_0 = arith.constant 0 : i32
    %2 = arith.cmpi ne, %1, %c0_i32_0 : i32
    scf.if %2 {
      %cst_10 = arith.constant 0.000000e+00 : f32
      %12 = vector.broadcast %cst_10 : f32 to vector<16x512xf32>
      %c0_11 = arith.constant 0 : index
      %c0_12 = arith.constant 0 : index
      %13 = vector.load %arg6[%c0_11, %c0_12] : memref<16x512xf32, #tpu.memory_space<vmem>>, vector<16x512xf32>
      tpu.vector_store %arg6[%c0_11, %c0_12], %12 {strides = array<i32>} : memref<16x512xf32, #tpu.memory_space<vmem>>, vector<16x512xf32>,
    } else {
    }
    %c0 = arith.constant 0 : index
    %c0_1 = arith.constant 0 : index
    %3 = vector.load %arg6[%c0, %c0_1] : memref<16x512xf32, #tpu.memory_space<vmem>>, vector<16x512xf32>
    %c0_2 = arith.constant 0 : index
    %c0_3 = arith.constant 0 : index
    %4 = vector.load %arg2[%c0_2, %c0_3] : memref<16x1024xbf16, #tpu.memory_space<vmem>>, vector<16x1024xbf16>
    %c0_4 = arith.constant 0 : index
    %c0_5 = arith.constant 0 : index
    %5 = vector.load %arg3[%c0_4, %c0_5] : memref<512x1024xbf16, #tpu.memory_space<vmem>>, vector<512x1024xbf16>
    %cst = arith.constant dense<0.000000e+00> : vector<16x512xf32>
    %6 = tpu.matmul %4, %5, %cst {dimension_numbers = #tpu.dot_dimension_numbers<[1], [1], [0], [0], [0, 0, 1, 0], [], []>} : vector<16x1024xbf16>, vector<512x1024xbf16>, vector<16x512xf32> -> vector<16x512xf32>
    %7 = arith.addf %3, %6 : vector<16x512xf32>
    %c0_6 = arith.constant 0 : index
    %c0_7 = arith.constant 0 : index
    %8 = vector.load %arg6[%c0_6, %c0_7] : memref<16x512xf32, #tpu.memory_space<vmem>>, vector<16x512xf32>
    tpu.vector_store %arg6[%c0_6, %c0_7], %7 {strides = array<i32>} : memref<16x512xf32, #tpu.memory_space<vmem>>, vector<16x512xf32>,
    %c0_i32_8 = arith.constant 0 : i32
    %9 = arith.cmpi eq, %arg1, %c0_i32_8 : i32
    %10 = arith.extui %9 : i1 to i32
    %c0_i32_9 = arith.constant 0 : i32
    %11 = arith.cmpi ne, %10, %c0_i32_9 : i32
    scf.if %11 {
      %c0_10 = arith.constant 0 : index
      %c0_11 = arith.constant 0 : index
      %12 = vector.load %arg6[%c0_10, %c0_11] : memref<16x512xf32, #tpu.memory_space<vmem>>, vector<16x512xf32>
      %cst_12 = arith.constant dense<0.000000e+00> : vector<512xf32>
      %13 = vector.multi_reduction <add>, %12, %cst_12 [0] : vector<16x512xf32> to vector<512xf32>
      %14 = vector.shape_cast %13 : vector<512xf32> to vector<1x512xf32>
      %cst_13 = arith.constant 1.600000e+01 : f32
      %15 = vector.broadcast %cst_13 : f32 to vector<1x512xf32>
      %16 = arith.divf %14, %15 : vector<1x512xf32>
      %17 = vector.broadcast %16 : vector<1x512xf32> to vector<16x512xf32>
      %18 = arith.subf %12, %17 : vector<16x512xf32>
      %19 = arith.mulf %18, %18 : vector<16x512xf32>
      %cst_14 = arith.constant dense<0.000000e+00> : vector<512xf32>
      %20 = vector.multi_reduction <add>, %19, %cst_14 [0] : vector<16x512xf32> to vector<512xf32>
      %21 = vector.shape_cast %20 : vector<512xf32> to vector<1x512xf32>
      %cst_15 = arith.constant 1.600000e+01 : f32
      %22 = vector.broadcast %cst_15 : f32 to vector<1x512xf32>
      %23 = arith.divf %21, %22 : vector<1x512xf32>
      %c0_16 = arith.constant 0 : index
      %c0_17 = arith.constant 0 : index
      %24 = vector.load %arg4[%c0_16, %c0_17] : memref<2x512xf32, #tpu.memory_space<vmem>>, vector<1x512xf32>
      %cst_18 = arith.constant 9.99999974E-6 : f32
      %25 = vector.broadcast %cst_18 : f32 to vector<1x512xf32>
      %26 = arith.addf %23, %25 : vector<1x512xf32>
      %27 = math.rsqrt %26 : vector<1x512xf32>
      %28 = arith.mulf %24, %27 : vector<1x512xf32>
      %c1 = arith.constant 1 : index
      %c0_19 = arith.constant 0 : index
      %29 = vector.load %arg4[%c1, %c0_19] : memref<2x512xf32, #tpu.memory_space<vmem>>, vector<1x512xf32>
      %30 = arith.mulf %16, %28 : vector<1x512xf32>
      %31 = arith.subf %29, %30 : vector<1x512xf32>
      %32 = vector.broadcast %28 : vector<1x512xf32> to vector<16x512xf32>
      %33 = arith.mulf %12, %32 : vector<16x512xf32>
      %34 = vector.broadcast %31 : vector<1x512xf32> to vector<16x512xf32>
      %35 = arith.addf %33, %34 : vector<16x512xf32>
      %36 = arith.negf %35 : vector<16x512xf32>
      %37 = math.exp %36 : vector<16x512xf32>
      %cst_20 = arith.constant 1.000000e+00 : f32
      %38 = vector.broadcast %cst_20 : f32 to vector<16x512xf32>
      %39 = arith.addf %38, %37 : vector<16x512xf32>
      %40 = arith.divf %38, %39 : vector<16x512xf32>
      %41 = arith.mulf %35, %40 : vector<16x512xf32>
      %c0_21 = arith.constant 0 : index
      %c0_22 = arith.constant 0 : index
      %42 = vector.load %arg5[%c0_21, %c0_22] : memref<16x512xf32, #tpu.memory_space<vmem>>, vector<16x512xf32>
      tpu.vector_store %arg5[%c0_21, %c0_22], %41 {strides = array<i32>} : memref<16x512xf32, #tpu.memory_space<vmem>>, vector<16x512xf32>,
    } else {
    }
    return
  }
  func.func @transform_0(%arg0: i32, %arg1: i32) -> (i32, i32) {
    %c0_i32 = arith.constant 0 : i32
    %c0_i32_0 = arith.constant 0 : i32
    return %c0_i32, %arg1 : i32, i32
  }
  func.func @transform_1(%arg0: i32, %arg1: i32) -> (i32, i32) {
    %c0_i32 = arith.constant 0 : i32
    return %arg0, %arg1 : i32, i32
  }
  func.func @transform_2(%arg0: i32, %arg1: i32) -> (i32, i32) {
    %c0_i32 = arith.constant 0 : i32
    %c0_i32_0 = arith.constant 0 : i32
    return %c0_i32, %arg0 : i32, i32
  }
  func.func @transform_3(%arg0: i32, %arg1: i32) -> (i32, i32) {
    %c0_i32 = arith.constant 0 : i32
    %c0_i32_0 = arith.constant 0 : i32
    return %c0_i32, %arg0 : i32, i32
  }
}

</mosaic_0001>

<bundles_post_ra>
// kernel: tpu_custom_call.1
= control target key start
LH: loop header
LB: loop body
LE: loop exit
PB: predicated region body
PF: predicated region fallthrough
CT: control target
= control target key end

     0   :  { %8 = vsyncpa [#allocation4], 0  ;;  %s2870_s0 = inlined_call_operand.hbm [shape: bf16[16,1024], index: 0, kind: input, shape index: {}]   ;;  %s2871_s1 = inlined_call_operand.hbm [shape: bf16[512,1024], index: 1, kind: input, shape index: {}]   ;;  %s2872_s2 = inlined_call_operand.hbm [shape: f32[2,512], index: 2, kind: input, shape index: {}]   ;;  %s2873_s3 = inlined_call_operand.hbm [shape: f32[16,512], index: 3, kind: output, shape index: {}]  }
   0x1   :  { %9 = vsyncpa [#allocation7], 0 }
   0x2   :  { %10 = vsyncpa [#allocation5], 0  ;;  %s2730_s12 = smov [#allocation6]   ;;  %s2731_s14 = smov [#allocation3]  }
   0x3   :  { %s28_s13 = sshll.u32 %s2730_s12, 4  ;;  %s16_s15 = sshll.u32 %s2731_s14, 4  ;;  %s29_s13 = int_to_ptr.vmem [resolvable:$true] %s28_s13  ;;  %s17_s15 = int_to_ptr.vmem [resolvable:$true] %s16_s15 }
   0x4   :  { %s2652_s16 = scalar_lea.vmem %s29_s13, 32768  ;;  %p2657_p1 = scmp.lt.s32.totalorder %s29_s13, %s29_s13 }
   0x5   :  { %p2653_p0 = scmp.ne.s32.totalorder %s29_s13, %s2652_s16  ;;  %p2658_p2 = scmp.lt.s32.totalorder %s2652_s16, %s2652_s16 }
   0x7   :  { %p2659_p3 = por %p2658_p2, %p2657_p1 }
   0x9   :  { %p2660_p4 = pnand %p2659_p3, %p2653_p0 }
   0xb   :  { %2663 = shalt.err (!%p2660_p4)
}
   0xc   :  { %s2732_s17 = smov 512   ;;  %s2733_s18 = smov 32  }
   0xd   :  { %34 = dma.hbm_to_vmem [thread:$0]  %s2871_s1, 32768, %s29_s13, [#allocation7], %s2732_s17, %s2732_s17, %s2733_s18  }
   0xe   :  { %s2672_s21 = scalar_lea.vmem %s17_s15, 1024  ;;  %p2677_p6 = scmp.lt.s32.totalorder %s17_s15, %s17_s15 }
   0xf   :  { %p2673_p5 = scmp.ne.s32.totalorder %s17_s15, %s2672_s21  ;;  %p2678_p7 = scmp.lt.s32.totalorder %s2672_s21, %s2672_s21 }
  0x11   :  { %p2679_p8 = por %p2678_p7, %p2677_p6 }
  0x13   :  { %p2680_p9 = pnand %p2679_p8, %p2673_p5 }
  0x15   :  { %2683 = shalt.err (!%p2680_p9)
}
  0x16   :  { %22 = dma.hbm_to_vmem [thread:$0]  %s2870_s0, 1024, %s17_s15, [#allocation4], %s2732_s17, %s2732_s17, %s2733_s18  }
  0x17   :  { %s2734_s24 = smov [#allocation8]  }
  0x18   :  { %s41_s25 = sshll.u32 %s2734_s24, 4  ;;  %s42_s25 = int_to_ptr.vmem [resolvable:$true] %s41_s25 }
  0x19   :  { %s2692_s26 = scalar_lea.vmem %s42_s25, 128  ;;  %p2697_p11 = scmp.lt.s32.totalorder %s42_s25, %s42_s25 }
  0x1a   :  { %p2693_p10 = scmp.ne.s32.totalorder %s42_s25, %s2692_s26  ;;  %p2698_p12 = scmp.lt.s32.totalorder %s2692_s26, %s2692_s26 }
  0x1c   :  { %p2699_p13 = por %p2698_p12, %p2697_p11 }
  0x1e   :  { %p2700_p0 = pnand %p2699_p13, %p2693_p10 }
  0x20   :  { %2703 = shalt.err (!%p2700_p0)
}
  0x21   :  { %44 = dma.hbm_to_vmem [thread:$0]  %s2872_s2, 128, %s42_s25, [#allocation7]  }
  0x22   :  { %2724 = dma.done.wait [#allocation4], 1024  }
  0x23   :  { %2725 = vsyncadd [#allocation4], 4294966272 }
  0x24   :  { %2726 = dma.done.wait [#allocation7], 32896  }
  0x25   :  { %2727 = vsyncadd [#allocation7], 4294934400  ;;  %v138_v0 = vld [vmem:[#allocation6 + $0x1c0] sm:$0xff]  ;;  %v139_v2 = vld [vmem:[#allocation6 + $0x1c8] sm:$0xff]  ;;  %s2736_s0 = smov [#allocation9]  }
  0x26   :  { %v142_v1 = vld [vmem:[#allocation6 + $0x1e0] sm:$0xff]  ;;  %v143_v4 = vld [vmem:[#allocation6 + $0x1e8] sm:$0xff]  ;;  %s2312_s2 = sshll.u32 %s2736_s0, 4  ;;  %s2313_s2 = int_to_ptr.vmem [resolvable:$true] %s2312_s2 }
  0x27   :  { %v2390_v3 = vcombine.high %v138_v0, %v142_v1  ;;  %v2389_v5 = vcombine.low %v138_v0, %v142_v1  ;;  %v130_v6 = vld [vmem:[#allocation6 + $0x180] sm:$0xff]  ;;  %v2392_v8 = vcombine.high %v139_v2, %v143_v4  ;;  %v2391_v9 = vcombine.low %v139_v2, %v143_v4  ;;  %v131_v11 = vld [vmem:[#allocation6 + $0x188] sm:$0xff]  ;;  %s2704_s28 = scalar_lea.vmem %s2313_s2, 1024  ;;  %p2709_p2 = scmp.lt.s32.totalorder %s2313_s2, %s2313_s2 }
  0x28   :  { %v134_v7 = vld [vmem:[#allocation6 + $0x1a0] sm:$0xff]  ;;  %v135_v12 = vld [vmem:[#allocation6 + $0x1a8] sm:$0xff]  ;;  %p2705_p1 = scmp.ne.s32.totalorder %s2313_s2, %s2704_s28  ;;  %p2710_p3 = scmp.lt.s32.totalorder %s2704_s28, %s2704_s28 }
  0x29   :  { %v2382_v10 = vcombine.high %v130_v6, %v134_v7  ;;  %1658 = vmatprep.subr.bf16.mxu0 %v2390_v3  ;;  %v2384_v13 = vcombine.high %v131_v11, %v135_v12  ;;  %1701 = vmatprep.subr.bf16.mxu1 %v2392_v8  ;;  %v122_v14 = vld [vmem:[#allocation6 + $0x140] sm:$0xff]  ;;  %v123_v16 = vld [vmem:[#allocation6 + $0x148] sm:$0xff]  ;;  %v2381_v18 = vcombine.low %v130_v6, %v134_v7 }
  0x2a   :  { %1659 = vmatpush1.bf16.xpose.msra.mxu0 %v2389_v5  ;;  %1702 = vmatpush1.bf16.xpose.msra.mxu1 %v2391_v9  ;;  %v126_v15 = vld [vmem:[#allocation6 + $0x160] sm:$0xff]  ;;  %v127_v17 = vld [vmem:[#allocation6 + $0x168] sm:$0xff]  ;;  %v2383_v19 = vcombine.low %v131_v11, %v135_v12  ;;  %p2711_p4 = por %p2710_p3, %p2709_p2 }
  0x2b   :  { %1660 = vmatprep.subr.bf16.mxu0 %v2382_v10  ;;  %1703 = vmatprep.subr.bf16.mxu1 %v2384_v13  ;;  %v2374_v20 = vcombine.high %v122_v14, %v126_v15  ;;  %v2376_v21 = vcombine.high %v123_v16, %v127_v17  ;;  %v114_v22 = vld [vmem:[#allocation6 + $0x100] sm:$0xff]  ;;  %v115_v24 = vld [vmem:[#allocation6 + $0x108] sm:$0xff]  ;;  %v2373_v26 = vcombine.low %v122_v14, %v126_v15 }
  0x2c   :  { %v118_v23 = vld [vmem:[#allocation6 + $0x120] sm:$0xff]  ;;  %v119_v25 = vld [vmem:[#allocation6 + $0x128] sm:$0xff]  ;;  %v2375_v27 = vcombine.low %v123_v16, %v127_v17  ;;  %p2712_p5 = pnand %p2711_p4, %p2705_p1 }
  0x2d   :  { %v2366_v28 = vcombine.high %v114_v22, %v118_v23  ;;  %v2368_v29 = vcombine.high %v115_v24, %v119_v25  ;;  %v106_v30 = vld [vmem:[#allocation6 + $0xc0] sm:$0xff]  ;;  %v75_v36 = vld [vmem:[#allocation3 + $0x8] sm:$0xff]  ;;  %v2365_v42 = vcombine.low %v114_v22, %v118_v23  ;;  %v2367_v43 = vcombine.low %v115_v24, %v119_v25 }
  0x2e   :  { %v74_v31 = vld [vmem:[#allocation3] sm:$0xff]  ;;  %v79_v37 = vld [vmem:[#allocation3 + $0x28] sm:$0xff] }
  0x2f   :  { %v78_v32 = vld [vmem:[#allocation3 + $0x20] sm:$0xff]  ;;  %v107_v38 = vld [vmem:[#allocation6 + $0xc8] sm:$0xff]  ;;  %v2776_v40 = vcombine.low %v75_v36, %v79_v37  ;;  %v2778_v41 = vcombine.high %v75_v36, %v79_v37 }
  0x30   :  { %v110_v33 = vld [vmem:[#allocation6 + $0xe0] sm:$0xff]  ;;  %v2772_v34 = vcombine.low %v74_v31, %v78_v32  ;;  %v2774_v35 = vcombine.high %v74_v31, %v78_v32  ;;  %v111_v39 = vld [vmem:[#allocation6 + $0xe8] sm:$0xff] }
  0x31   :  { %v2358_v44 = vcombine.high %v106_v30, %v110_v33  ;;  %1733 = vmatprep.mubr.bf16.mxu1 %v2778_v41  ;;  %v2360_v45 = vcombine.high %v107_v38, %v111_v39  ;;  %v98_v46 = vld [vmem:[#allocation6 + $0x80] sm:$0xff]  ;;  %v99_v48 = vld [vmem:[#allocation6 + $0x88] sm:$0xff]  ;;  %v2357_v50 = vcombine.low %v106_v30, %v110_v33  ;;  %v2359_v51 = vcombine.low %v107_v38, %v111_v39 }
  0x32   :  { %1661 = vmatpush1.bf16.xpose.msra.mxu0 %v2381_v18  ;;  %1704 = vmatpush1.bf16.xpose.msra.mxu1 %v2383_v19  ;;  %v102_v47 = vld [vmem:[#allocation6 + $0xa0] sm:$0xff]  ;;  %v103_v49 = vld [vmem:[#allocation6 + $0xa8] sm:$0xff] }
  0x33   :  { %1662 = vmatprep.subr.bf16.mxu0 %v2374_v20  ;;  %1705 = vmatprep.subr.bf16.mxu1 %v2376_v21  ;;  %v2350_v52 = vcombine.high %v98_v46, %v102_v47  ;;  %v2352_v53 = vcombine.high %v99_v48, %v103_v49  ;;  %v90_v54 = vld [vmem:[#allocation6 + $0x40] sm:$0xff]  ;;  %v91_v56 = vld [vmem:[#allocation6 + $0x48] sm:$0xff]  ;;  %v2349_v58 = vcombine.low %v98_v46, %v102_v47 }
  0x34   :  { %1690 = vmatprep.mubr.bf16.mxu0 %v2774_v35  ;;  %v94_v55 = vld [vmem:[#allocation6 + $0x60] sm:$0xff]  ;;  %v95_v57 = vld [vmem:[#allocation6 + $0x68] sm:$0xff]  ;;  %v2351_v59 = vcombine.low %v99_v48, %v103_v49 }
  0x35   :  { %v2342_v60 = vcombine.high %v90_v54, %v94_v55  ;;  %v2344_v61 = vcombine.high %v91_v56, %v95_v57  ;;  %v82_v62 = vld [vmem:[#allocation6] sm:$0xff]  ;;  %v83_v0 = vld [vmem:[#allocation6 + $0x8] sm:$0xff]  ;;  %v2341_v2 = vcombine.low %v90_v54, %v94_v55  ;;  %v2343_v3 = vcombine.low %v91_v56, %v95_v57 }
  0x36   :  { %v86_v63 = vld [vmem:[#allocation6 + $0x20] sm:$0xff]  ;;  %v87_v1 = vld [vmem:[#allocation6 + $0x28] sm:$0xff] }
  0x37   :  { %v2334_v4 = vcombine.high %v82_v62, %v86_v63  ;;  %v2336_v5 = vcombine.high %v83_v0, %v87_v1  ;;  %v202_v6 = vld [vmem:[#allocation6 + $0x3c0] sm:$0xff]  ;;  %v203_v8 = vld [vmem:[#allocation6 + $0x3c8] sm:$0xff]  ;;  %v2333_v10 = vcombine.low %v82_v62, %v86_v63  ;;  %v2335_v11 = vcombine.low %v83_v0, %v87_v1 }
  0x38   :  { %v206_v7 = vld [vmem:[#allocation6 + $0x3e0] sm:$0xff]  ;;  %v207_v9 = vld [vmem:[#allocation6 + $0x3e8] sm:$0xff] }
  0x39   :  { %v2454_v12 = vcombine.high %v202_v6, %v206_v7  ;;  %v2456_v13 = vcombine.high %v203_v8, %v207_v9  ;;  %v194_v14 = vld [vmem:[#allocation6 + $0x380] sm:$0xff]  ;;  %v195_v16 = vld [vmem:[#allocation6 + $0x388] sm:$0xff]  ;;  %v2453_v18 = vcombine.low %v202_v6, %v206_v7  ;;  %v2455_v19 = vcombine.low %v203_v8, %v207_v9 }
  0x3a   :  { %1663 = vmatpush1.bf16.xpose.msra.mxu0 %v2373_v26  ;;  %1706 = vmatpush1.bf16.xpose.msra.mxu1 %v2375_v27  ;;  %v198_v15 = vld [vmem:[#allocation6 + $0x3a0] sm:$0xff]  ;;  %v199_v17 = vld [vmem:[#allocation6 + $0x3a8] sm:$0xff] }
  0x3b   :  { %1664 = vmatprep.subr.bf16.mxu0 %v2366_v28  ;;  %1707 = vmatprep.subr.bf16.mxu1 %v2368_v29  ;;  %v2446_v20 = vcombine.high %v194_v14, %v198_v15  ;;  %v2448_v21 = vcombine.high %v195_v16, %v199_v17  ;;  %v186_v22 = vld [vmem:[#allocation6 + $0x340] sm:$0xff]  ;;  %v187_v24 = vld [vmem:[#allocation6 + $0x348] sm:$0xff]  ;;  %v2445_v26 = vcombine.low %v194_v14, %v198_v15 }
  0x3c   :  { %v190_v23 = vld [vmem:[#allocation6 + $0x360] sm:$0xff]  ;;  %v191_v25 = vld [vmem:[#allocation6 + $0x368] sm:$0xff]  ;;  %v2447_v27 = vcombine.low %v195_v16, %v199_v17 }
  0x3d   :  { %v2438_v28 = vcombine.high %v186_v22, %v190_v23  ;;  %v2440_v29 = vcombine.high %v187_v24, %v191_v25  ;;  %v178_v30 = vld [vmem:[#allocation6 + $0x300] sm:$0xff]  ;;  %v179_v32 = vld [vmem:[#allocation6 + $0x308] sm:$0xff]  ;;  %v2437_v36 = vcombine.low %v186_v22, %v190_v23  ;;  %v2439_v37 = vcombine.low %v187_v24, %v191_v25  ;;  %v136_v22 = vld [vmem:[#allocation6 + $0x1b0] sm:$0xff] }
  0x3e   :  { %v182_v31 = vld [vmem:[#allocation6 + $0x320] sm:$0xff]  ;;  %v183_v33 = vld [vmem:[#allocation6 + $0x328] sm:$0xff]  ;;  %v81_v24 = vld [vmem:[#allocation3 + $0x38] sm:$0xff] }
  0x3f   :  { %v2430_v38 = vcombine.high %v178_v30, %v182_v31  ;;  %v2432_v39 = vcombine.high %v179_v32, %v183_v33  ;;  %v2429_v46 = vcombine.low %v178_v30, %v182_v31  ;;  %v2431_v47 = vcombine.low %v179_v32, %v183_v33  ;;  %v133_v25 = vld [vmem:[#allocation6 + $0x198] sm:$0xff] }
  0x42   :  { %1665 = vmatpush1.bf16.xpose.msra.mxu0 %v2365_v42  ;;  %1708 = vmatpush1.bf16.xpose.msra.mxu1 %v2367_v43  ;;  %v170_v42 = vld [vmem:[#allocation6 + $0x2c0] sm:$0xff] }
  0x43   :  { %1666 = vmatprep.subr.bf16.mxu0 %v2358_v44  ;;  %1709 = vmatprep.subr.bf16.mxu1 %v2360_v45  ;;  %v174_v43 = vld [vmem:[#allocation6 + $0x2e0] sm:$0xff]  ;;  %v171_v44 = vld [vmem:[#allocation6 + $0x2c8] sm:$0xff] }
  0x44   :  { %v175_v45 = vld [vmem:[#allocation6 + $0x2e8] sm:$0xff]  ;;  %v2422_v48 = vcombine.high %v170_v42, %v174_v43  ;;  %v2421_v54 = vcombine.low %v170_v42, %v174_v43 }
  0x45   :  { %v2424_v49 = vcombine.high %v171_v44, %v175_v45  ;;  %v2423_v55 = vcombine.low %v171_v44, %v175_v45 }
  0x4a   :  { %1667 = vmatpush1.bf16.xpose.msra.mxu0 %v2357_v50  ;;  %1710 = vmatpush1.bf16.xpose.msra.mxu1 %v2359_v51  ;;  %v162_v50 = vld [vmem:[#allocation6 + $0x280] sm:$0xff] }
  0x4b   :  { %1668 = vmatprep.subr.bf16.mxu0 %v2350_v52  ;;  %1711 = vmatprep.subr.bf16.mxu1 %v2352_v53  ;;  %v166_v51 = vld [vmem:[#allocation6 + $0x2a0] sm:$0xff]  ;;  %v163_v52 = vld [vmem:[#allocation6 + $0x288] sm:$0xff] }
  0x4c   :  { %v167_v53 = vld [vmem:[#allocation6 + $0x2a8] sm:$0xff]  ;;  %v2414_v56 = vcombine.high %v162_v50, %v166_v51  ;;  %v2413_v62 = vcombine.low %v162_v50, %v166_v51 }
  0x4d   :  { %v2416_v57 = vcombine.high %v163_v52, %v167_v53  ;;  %v2415_v63 = vcombine.low %v163_v52, %v167_v53 }
  0x52   :  { %1669 = vmatpush1.bf16.xpose.msra.mxu0 %v2349_v58  ;;  %1712 = vmatpush1.bf16.xpose.msra.mxu1 %v2351_v59  ;;  %v154_v58 = vld [vmem:[#allocation6 + $0x240] sm:$0xff] }
  0x53   :  { %1670 = vmatprep.subr.bf16.mxu0 %v2342_v60  ;;  %1713 = vmatprep.subr.bf16.mxu1 %v2344_v61  ;;  %v158_v59 = vld [vmem:[#allocation6 + $0x260] sm:$0xff]  ;;  %v155_v60 = vld [vmem:[#allocation6 + $0x248] sm:$0xff] }
  0x54   :  { %v159_v61 = vld [vmem:[#allocation6 + $0x268] sm:$0xff]  ;;  %v2406_v0 = vcombine.high %v154_v58, %v158_v59  ;;  %v2405_v6 = vcombine.low %v154_v58, %v158_v59 }
  0x55   :  { %v2408_v1 = vcombine.high %v155_v60, %v159_v61  ;;  %v2407_v7 = vcombine.low %v155_v60, %v159_v61 }
  0x5a   :  { %1671 = vmatpush1.bf16.xpose.msra.mxu0 %v2341_v2  ;;  %1714 = vmatpush1.bf16.xpose.msra.mxu1 %v2343_v3  ;;  %v146_v2 = vld [vmem:[#allocation6 + $0x200] sm:$0xff] }
  0x5b   :  { %1672 = vmatprep.subr.bf16.mxu0 %v2334_v4  ;;  %1715 = vmatprep.subr.bf16.mxu1 %v2336_v5  ;;  %v150_v3 = vld [vmem:[#allocation6 + $0x220] sm:$0xff]  ;;  %v147_v4 = vld [vmem:[#allocation6 + $0x208] sm:$0xff] }
  0x5c   :  { %v151_v5 = vld [vmem:[#allocation6 + $0x228] sm:$0xff]  ;;  %v2398_v8 = vcombine.high %v146_v2, %v150_v3  ;;  %v2397_v14 = vcombine.low %v146_v2, %v150_v3 }
  0x5d   :  { %v2400_v9 = vcombine.high %v147_v4, %v151_v5  ;;  %v2399_v15 = vcombine.low %v147_v4, %v151_v5 }
  0x62   :  { %1673 = vmatpush1.bf16.xpose.msra.mxu0 %v2333_v10  ;;  %1716 = vmatpush1.bf16.xpose.msra.mxu1 %v2335_v11  ;;  %v140_v10 = vld [vmem:[#allocation6 + $0x1d0] sm:$0xff] }
  0x63   :  { %1674 = vmatprep.subr.bf16.mxu0 %v2454_v12  ;;  %1717 = vmatprep.subr.bf16.mxu1 %v2456_v13  ;;  %v144_v11 = vld [vmem:[#allocation6 + $0x1f0] sm:$0xff]  ;;  %v141_v12 = vld [vmem:[#allocation6 + $0x1d8] sm:$0xff] }
  0x64   :  { %v145_v13 = vld [vmem:[#allocation6 + $0x1f8] sm:$0xff]  ;;  %v2394_v16 = vcombine.high %v140_v10, %v144_v11 }
  0x65   :  { %v2396_v17 = vcombine.high %v141_v12, %v145_v13 }
  0x6a   :  { %1675 = vmatpush2.bf16.xpose.msra.mxu0 %v2453_v18  ;;  %1718 = vmatpush2.bf16.xpose.msra.mxu1 %v2455_v19  ;;  %v76_v18 = vld [vmem:[#allocation3 + $0x10] sm:$0xff] }
  0x6b   :  { %1676 = vmatprep.subr.bf16.mxu0 %v2446_v20  ;;  %1719 = vmatprep.subr.bf16.mxu1 %v2448_v21  ;;  %v80_v19 = vld [vmem:[#allocation3 + $0x30] sm:$0xff]  ;;  %v77_v20 = vld [vmem:[#allocation3 + $0x18] sm:$0xff] }
  0x6c   :  { %v132_v21 = vld [vmem:[#allocation6 + $0x190] sm:$0xff]  ;;  %v2782_v23 = vcombine.low %v76_v18, %v80_v19  ;;  %v2786_v32 = vcombine.high %v76_v18, %v80_v19  ;;  %v2789_v33 = vcombine.high %v77_v20, %v81_v24 }
  0x6d   :  { %v2386_v30 = vcombine.high %v132_v21, %v136_v22  ;;  %v2385_v42 = vcombine.low %v132_v21, %v136_v22  ;;  %v204_v22 = vld [vmem:[#allocation6 + $0x3d0] sm:$0xff] }
  0x72   :  { %1677 = vmatpush2.bf16.xpose.msra.mxu0 %v2445_v26  ;;  %1720 = vmatpush2.bf16.xpose.msra.mxu1 %v2447_v27  ;;  %v137_v26 = vld [vmem:[#allocation6 + $0x1b8] sm:$0xff]  ;;  %v2784_v27 = vcombine.low %v77_v20, %v81_v24  ;;  %v208_v24 = vld [vmem:[#allocation6 + $0x3f0] sm:$0xff] }
  0x73   :  { %1678 = vmatprep.subr.bf16.mxu0 %v2438_v28  ;;  %1721 = vmatprep.subr.bf16.mxu1 %v2440_v29  ;;  %v2393_v28 = vcombine.low %v140_v10, %v144_v11  ;;  %v2395_v29 = vcombine.low %v141_v12, %v145_v13  ;;  %v2388_v31 = vcombine.high %v133_v25, %v137_v26 }
  0x74   :  { %v2387_v43 = vcombine.low %v133_v25, %v137_v26  ;;  %v205_v25 = vld [vmem:[#allocation6 + $0x3d8] sm:$0xff] }
  0x75   :  { %v209_v26 = vld [vmem:[#allocation6 + $0x3f8] sm:$0xff] }
  0x7a   :  { %1679 = vmatpush2.bf16.xpose.msra.mxu0 %v2437_v36  ;;  %1722 = vmatpush2.bf16.xpose.msra.mxu1 %v2439_v37  ;;  %v124_v36 = vld [vmem:[#allocation6 + $0x150] sm:$0xff] }
  0x7b   :  { %1680 = vmatprep.subr.bf16.mxu0 %v2430_v38  ;;  %1723 = vmatprep.subr.bf16.mxu1 %v2432_v39  ;;  %v128_v37 = vld [vmem:[#allocation6 + $0x170] sm:$0xff]  ;;  %v125_v38 = vld [vmem:[#allocation6 + $0x158] sm:$0xff] }
  0x7c   :  { %v129_v39 = vld [vmem:[#allocation6 + $0x178] sm:$0xff]  ;;  %v2378_v44 = vcombine.high %v124_v36, %v128_v37  ;;  %v2377_v50 = vcombine.low %v124_v36, %v128_v37  ;;  %v196_v36 = vld [vmem:[#allocation6 + $0x390] sm:$0xff] }
  0x7d   :  { %v2380_v45 = vcombine.high %v125_v38, %v129_v39  ;;  %v2379_v51 = vcombine.low %v125_v38, %v129_v39  ;;  %v200_v37 = vld [vmem:[#allocation6 + $0x3b0] sm:$0xff]  ;;  %v197_v38 = vld [vmem:[#allocation6 + $0x398] sm:$0xff] }
  0x7e   :  { %v201_v39 = vld [vmem:[#allocation6 + $0x3b8] sm:$0xff] }
  0x82   :  { %1681 = vmatpush2.bf16.xpose.msra.mxu0 %v2429_v46  ;;  %1724 = vmatpush2.bf16.xpose.msra.mxu1 %v2431_v47  ;;  %v116_v46 = vld [vmem:[#allocation6 + $0x110] sm:$0xff] }
  0x83   :  { %1682 = vmatprep.subr.bf16.mxu0 %v2422_v48  ;;  %1725 = vmatprep.subr.bf16.mxu1 %v2424_v49  ;;  %v120_v47 = vld [vmem:[#allocation6 + $0x130] sm:$0xff]  ;;  %v117_v48 = vld [vmem:[#allocation6 + $0x118] sm:$0xff] }
  0x84   :  { %v121_v49 = vld [vmem:[#allocation6 + $0x138] sm:$0xff]  ;;  %v2370_v52 = vcombine.high %v116_v46, %v120_v47  ;;  %v2369_v58 = vcombine.low %v116_v46, %v120_v47  ;;  %v188_v46 = vld [vmem:[#allocation6 + $0x350] sm:$0xff] }
  0x85   :  { %v2372_v53 = vcombine.high %v117_v48, %v121_v49  ;;  %v2371_v59 = vcombine.low %v117_v48, %v121_v49  ;;  %v192_v47 = vld [vmem:[#allocation6 + $0x370] sm:$0xff]  ;;  %v189_v48 = vld [vmem:[#allocation6 + $0x358] sm:$0xff] }
  0x86   :  { %v193_v49 = vld [vmem:[#allocation6 + $0x378] sm:$0xff] }
  0x8a   :  { %1683 = vmatpush2.bf16.xpose.msra.mxu0 %v2421_v54  ;;  %1726 = vmatpush2.bf16.xpose.msra.mxu1 %v2423_v55  ;;  %v108_v54 = vld [vmem:[#allocation6 + $0xd0] sm:$0xff] }
  0x8b   :  { %1684 = vmatprep.subr.bf16.mxu0 %v2414_v56  ;;  %1727 = vmatprep.subr.bf16.mxu1 %v2416_v57  ;;  %v112_v55 = vld [vmem:[#allocation6 + $0xf0] sm:$0xff]  ;;  %v109_v56 = vld [vmem:[#allocation6 + $0xd8] sm:$0xff] }
  0x8c   :  { %v113_v57 = vld [vmem:[#allocation6 + $0xf8] sm:$0xff]  ;;  %v2362_v60 = vcombine.high %v108_v54, %v112_v55  ;;  %v2361_v2 = vcombine.low %v108_v54, %v112_v55  ;;  %v180_v54 = vld [vmem:[#allocation6 + $0x310] sm:$0xff] }
  0x8d   :  { %v2364_v61 = vcombine.high %v109_v56, %v113_v57  ;;  %v2363_v3 = vcombine.low %v109_v56, %v113_v57  ;;  %v184_v55 = vld [vmem:[#allocation6 + $0x330] sm:$0xff]  ;;  %v181_v56 = vld [vmem:[#allocation6 + $0x318] sm:$0xff] }
  0x8e   :  { %v185_v57 = vld [vmem:[#allocation6 + $0x338] sm:$0xff] }
  0x92   :  { %1685 = vmatpush2.bf16.xpose.msra.mxu0 %v2413_v62  ;;  %1728 = vmatpush2.bf16.xpose.msra.mxu1 %v2415_v63  ;;  %v100_v62 = vld [vmem:[#allocation6 + $0x90] sm:$0xff] }
  0x93   :  { %1686 = vmatprep.subr.bf16.mxu0 %v2406_v0  ;;  %1729 = vmatprep.subr.bf16.mxu1 %v2408_v1  ;;  %v104_v63 = vld [vmem:[#allocation6 + $0xb0] sm:$0xff]  ;;  %v101_v0 = vld [vmem:[#allocation6 + $0x98] sm:$0xff] }
  0x94   :  { %v105_v1 = vld [vmem:[#allocation6 + $0xb8] sm:$0xff]  ;;  %v2354_v4 = vcombine.high %v100_v62, %v104_v63  ;;  %v2353_v10 = vcombine.low %v100_v62, %v104_v63  ;;  %v172_v62 = vld [vmem:[#allocation6 + $0x2d0] sm:$0xff] }
  0x95   :  { %v2356_v5 = vcombine.high %v101_v0, %v105_v1  ;;  %v2355_v11 = vcombine.low %v101_v0, %v105_v1  ;;  %v176_v63 = vld [vmem:[#allocation6 + $0x2f0] sm:$0xff]  ;;  %v173_v0 = vld [vmem:[#allocation6 + $0x2d8] sm:$0xff] }
  0x96   :  { %v177_v1 = vld [vmem:[#allocation6 + $0x2f8] sm:$0xff] }
  0x9a   :  { %1687 = vmatpush2.bf16.xpose.msra.mxu0 %v2405_v6  ;;  %1730 = vmatpush2.bf16.xpose.msra.mxu1 %v2407_v7  ;;  %v92_v6 = vld [vmem:[#allocation6 + $0x50] sm:$0xff] }
  0x9b   :  { %1688 = vmatprep.subr.bf16.mxu0 %v2398_v8  ;;  %1731 = vmatprep.subr.bf16.mxu1 %v2400_v9  ;;  %v96_v7 = vld [vmem:[#allocation6 + $0x70] sm:$0xff]  ;;  %v93_v8 = vld [vmem:[#allocation6 + $0x58] sm:$0xff] }
  0x9c   :  { %v97_v9 = vld [vmem:[#allocation6 + $0x78] sm:$0xff]  ;;  %v2346_v12 = vcombine.high %v92_v6, %v96_v7  ;;  %v2345_v18 = vcombine.low %v92_v6, %v96_v7  ;;  %v164_v6 = vld [vmem:[#allocation6 + $0x290] sm:$0xff] }
  0x9d   :  { %v2348_v13 = vcombine.high %v93_v8, %v97_v9  ;;  %v2347_v19 = vcombine.low %v93_v8, %v97_v9  ;;  %v168_v7 = vld [vmem:[#allocation6 + $0x2b0] sm:$0xff]  ;;  %v165_v8 = vld [vmem:[#allocation6 + $0x298] sm:$0xff] }
  0x9e   :  { %v169_v9 = vld [vmem:[#allocation6 + $0x2b8] sm:$0xff] }
  0xa2   :  { %1689 = vmatpush2.bf16.xpose.msra.mxu0 %v2397_v14  ;;  %1732 = vmatpush2.bf16.xpose.msra.mxu1 %v2399_v15  ;;  %v84_v14 = vld [vmem:[#allocation6 + $0x10] sm:$0xff] }
  0xa3   :  { %1744 = vmatprep.subr.bf16.mxu0 %v2394_v16  ;;  %1787 = vmatprep.subr.bf16.mxu1 %v2396_v17  ;;  %v88_v15 = vld [vmem:[#allocation6 + $0x30] sm:$0xff]  ;;  %v85_v16 = vld [vmem:[#allocation6 + $0x18] sm:$0xff] }
  0xa4   :  { %v89_v17 = vld [vmem:[#allocation6 + $0x38] sm:$0xff]  ;;  %v2338_v20 = vcombine.high %v84_v14, %v88_v15 }
  0xa5   :  { %v2340_v21 = vcombine.high %v85_v16, %v89_v17 }
  0xa9   :  { %1691 = vmatmul.mubr.bf16.vlgmr.msra.gmra.mxu0 %v2772_v34  ;;  %1734 = vmatmul.mubr.bf16.vlgmr.msra.gmra.mxu1 %v2776_v40 }
  0xaa   :  { %1745 = vmatpush1.bf16.xpose.msra.mxu0 %v2393_v28  ;;  %1788 = vmatpush1.bf16.xpose.msra.mxu1 %v2395_v29  ;;  %v2337_v28 = vcombine.low %v84_v14, %v88_v15  ;;  %v2339_v29 = vcombine.low %v85_v16, %v89_v17  ;;  %v156_v14 = vld [vmem:[#allocation6 + $0x250] sm:$0xff]  ;;  %v157_v16 = vld [vmem:[#allocation6 + $0x258] sm:$0xff] }
  0xab   :  { %1746 = vmatprep.subr.bf16.mxu0 %v2386_v30  ;;  %1789 = vmatprep.subr.bf16.mxu1 %v2388_v31  ;;  %v2458_v30 = vcombine.high %v204_v22, %v208_v24  ;;  %v2460_v31 = vcombine.high %v205_v25, %v209_v26  ;;  %v160_v15 = vld [vmem:[#allocation6 + $0x270] sm:$0xff]  ;;  %v161_v17 = vld [vmem:[#allocation6 + $0x278] sm:$0xff] }
  0xac   :  { %1776 = vmatprep.mubr.bf16.mxu0 %v2786_v32  ;;  %1819 = vmatprep.mubr.bf16.mxu1 %v2789_v33 }
  0xb2   :  { %1747 = vmatpush1.bf16.xpose.msra.mxu0 %v2385_v42  ;;  %1790 = vmatpush1.bf16.xpose.msra.mxu1 %v2387_v43  ;;  %v2457_v42 = vcombine.low %v204_v22, %v208_v24  ;;  %v2459_v43 = vcombine.low %v205_v25, %v209_v26  ;;  %v148_v22 = vld [vmem:[#allocation6 + $0x210] sm:$0xff]  ;;  %v149_v25 = vld [vmem:[#allocation6 + $0x218] sm:$0xff] }
  0xb3   :  { %1748 = vmatprep.subr.bf16.mxu0 %v2378_v44  ;;  %1791 = vmatprep.subr.bf16.mxu1 %v2380_v45  ;;  %v2450_v44 = vcombine.high %v196_v36, %v200_v37  ;;  %v2452_v45 = vcombine.high %v197_v38, %v201_v39  ;;  %v152_v24 = vld [vmem:[#allocation6 + $0x230] sm:$0xff]  ;;  %v153_v26 = vld [vmem:[#allocation6 + $0x238] sm:$0xff] }
  0xba   :  { %1749 = vmatpush1.bf16.xpose.msra.mxu0 %v2377_v50  ;;  %1792 = vmatpush1.bf16.xpose.msra.mxu1 %v2379_v51  ;;  %v2449_v50 = vcombine.low %v196_v36, %v200_v37  ;;  %v2451_v51 = vcombine.low %v197_v38, %v201_v39  ;;  %v266_v36 = vld [vmem:[#allocation6 + $0x5c0] sm:$0xff]  ;;  %v267_v38 = vld [vmem:[#allocation6 + $0x5c8] sm:$0xff] }
  0xbb   :  { %1750 = vmatprep.subr.bf16.mxu0 %v2370_v52  ;;  %1793 = vmatprep.subr.bf16.mxu1 %v2372_v53  ;;  %v2442_v52 = vcombine.high %v188_v46, %v192_v47  ;;  %v2444_v53 = vcombine.high %v189_v48, %v193_v49  ;;  %v270_v37 = vld [vmem:[#allocation6 + $0x5e0] sm:$0xff]  ;;  %v271_v39 = vld [vmem:[#allocation6 + $0x5e8] sm:$0xff] }
  0xc2   :  { %1751 = vmatpush1.bf16.xpose.msra.mxu0 %v2369_v58  ;;  %1794 = vmatpush1.bf16.xpose.msra.mxu1 %v2371_v59  ;;  %v2441_v58 = vcombine.low %v188_v46, %v192_v47  ;;  %v2443_v59 = vcombine.low %v189_v48, %v193_v49  ;;  %v258_v46 = vld [vmem:[#allocation6 + $0x580] sm:$0xff]  ;;  %v259_v48 = vld [vmem:[#allocation6 + $0x588] sm:$0xff] }
  0xc3   :  { %1752 = vmatprep.subr.bf16.mxu0 %v2362_v60  ;;  %1795 = vmatprep.subr.bf16.mxu1 %v2364_v61  ;;  %v2434_v60 = vcombine.high %v180_v54, %v184_v55  ;;  %v2436_v61 = vcombine.high %v181_v56, %v185_v57  ;;  %v262_v47 = vld [vmem:[#allocation6 + $0x5a0] sm:$0xff]  ;;  %v263_v49 = vld [vmem:[#allocation6 + $0x5a8] sm:$0xff] }
  0xca   :  { %1753 = vmatpush1.bf16.xpose.msra.mxu0 %v2361_v2  ;;  %1796 = vmatpush1.bf16.xpose.msra.mxu1 %v2363_v3  ;;  %v2433_v2 = vcombine.low %v180_v54, %v184_v55  ;;  %v2435_v3 = vcombine.low %v181_v56, %v185_v57  ;;  %v250_v54 = vld [vmem:[#allocation6 + $0x540] sm:$0xff]  ;;  %v251_v56 = vld [vmem:[#allocation6 + $0x548] sm:$0xff] }
  0xcb   :  { %1754 = vmatprep.subr.bf16.mxu0 %v2354_v4  ;;  %1797 = vmatprep.subr.bf16.mxu1 %v2356_v5  ;;  %v2426_v4 = vcombine.high %v172_v62, %v176_v63  ;;  %v2428_v5 = vcombine.high %v173_v0, %v177_v1  ;;  %v254_v55 = vld [vmem:[#allocation6 + $0x560] sm:$0xff]  ;;  %v255_v57 = vld [vmem:[#allocation6 + $0x568] sm:$0xff] }
  0xd2   :  { %1755 = vmatpush1.bf16.xpose.msra.mxu0 %v2353_v10  ;;  %1798 = vmatpush1.bf16.xpose.msra.mxu1 %v2355_v11  ;;  %v2425_v10 = vcombine.low %v172_v62, %v176_v63  ;;  %v2427_v11 = vcombine.low %v173_v0, %v177_v1  ;;  %v242_v62 = vld [vmem:[#allocation6 + $0x500] sm:$0xff]  ;;  %v243_v0 = vld [vmem:[#allocation6 + $0x508] sm:$0xff] }
  0xd3   :  { %1756 = vmatprep.subr.bf16.mxu0 %v2346_v12  ;;  %1799 = vmatprep.subr.bf16.mxu1 %v2348_v13  ;;  %v2418_v12 = vcombine.high %v164_v6, %v168_v7  ;;  %v2420_v13 = vcombine.high %v165_v8, %v169_v9  ;;  %v246_v63 = vld [vmem:[#allocation6 + $0x520] sm:$0xff]  ;;  %v247_v1 = vld [vmem:[#allocation6 + $0x528] sm:$0xff] }
  0xda   :  { %1757 = vmatpush1.bf16.xpose.msra.mxu0 %v2345_v18  ;;  %1800 = vmatpush1.bf16.xpose.msra.mxu1 %v2347_v19  ;;  %v2417_v18 = vcombine.low %v164_v6, %v168_v7  ;;  %v2419_v19 = vcombine.low %v165_v8, %v169_v9  ;;  %v235_v6 = vld [vmem:[#allocation6 + $0x4c8] sm:$0xff]  ;;  %v2493_v8 = vcombine.low %v242_v62, %v246_v63 }
  0xdb   :  { %1758 = vmatprep.subr.bf16.mxu0 %v2338_v20  ;;  %1801 = vmatprep.subr.bf16.mxu1 %v2340_v21  ;;  %v2410_v20 = vcombine.high %v156_v14, %v160_v15  ;;  %v2412_v21 = vcombine.high %v157_v16, %v161_v17  ;;  %v239_v7 = vld [vmem:[#allocation6 + $0x4e8] sm:$0xff]  ;;  %v2495_v9 = vcombine.low %v243_v0, %v247_v1 }
  0xe2   :  { %1759 = vmatpush1.bf16.xpose.msra.mxu0 %v2337_v28  ;;  %1802 = vmatpush1.bf16.xpose.msra.mxu1 %v2339_v29  ;;  %v2409_v28 = vcombine.low %v156_v14, %v160_v15  ;;  %v2411_v29 = vcombine.low %v157_v16, %v161_v17  ;;  %v227_v14 = vld [vmem:[#allocation6 + $0x488] sm:$0xff]  ;;  %v2487_v17 = vcombine.low %v235_v6, %v239_v7 }
  0xe3   :  { %1760 = vmatprep.subr.bf16.mxu0 %v2458_v30  ;;  %1803 = vmatprep.subr.bf16.mxu1 %v2460_v31  ;;  %v2402_v30 = vcombine.high %v148_v22, %v152_v24  ;;  %v2404_v31 = vcombine.high %v149_v25, %v153_v26  ;;  %v231_v15 = vld [vmem:[#allocation6 + $0x4a8] sm:$0xff] }
  0xea   :  { %1761 = vmatpush2.bf16.xpose.msra.mxu0 %v2457_v42  ;;  %1804 = vmatpush2.bf16.xpose.msra.mxu1 %v2459_v43  ;;  %v2401_v42 = vcombine.low %v148_v22, %v152_v24  ;;  %v2403_v43 = vcombine.low %v149_v25, %v153_v26  ;;  %v219_v22 = vld [vmem:[#allocation6 + $0x448] sm:$0xff]  ;;  %v2479_v26 = vcombine.low %v227_v14, %v231_v15 }
  0xeb   :  { %1762 = vmatprep.subr.bf16.mxu0 %v2450_v44  ;;  %1805 = vmatprep.subr.bf16.mxu1 %v2452_v45  ;;  %v2518_v44 = vcombine.high %v266_v36, %v270_v37  ;;  %v2520_v45 = vcombine.high %v267_v38, %v271_v39  ;;  %v223_v24 = vld [vmem:[#allocation6 + $0x468] sm:$0xff] }
  0xf2   :  { %1763 = vmatpush2.bf16.xpose.msra.mxu0 %v2449_v50  ;;  %1806 = vmatpush2.bf16.xpose.msra.mxu1 %v2451_v51  ;;  %v2517_v50 = vcombine.low %v266_v36, %v270_v37  ;;  %v2519_v51 = vcombine.low %v267_v38, %v271_v39  ;;  %v211_v36 = vld [vmem:[#allocation6 + $0x408] sm:$0xff]  ;;  %v2471_v39 = vcombine.low %v219_v22, %v223_v24 }
  0xf3   :  { %1764 = vmatprep.subr.bf16.mxu0 %v2442_v52  ;;  %1807 = vmatprep.subr.bf16.mxu1 %v2444_v53  ;;  %v2510_v52 = vcombine.high %v258_v46, %v262_v47  ;;  %v2512_v53 = vcombine.high %v259_v48, %v263_v49  ;;  %v215_v37 = vld [vmem:[#allocation6 + $0x428] sm:$0xff] }
  0xfa   :  { %1765 = vmatpush2.bf16.xpose.msra.mxu0 %v2441_v58  ;;  %1808 = vmatpush2.bf16.xpose.msra.mxu1 %v2443_v59  ;;  %v2509_v58 = vcombine.low %v258_v46, %v262_v47  ;;  %v2511_v59 = vcombine.low %v259_v48, %v263_v49  ;;  %v331_v46 = vld [vmem:[#allocation6 + $0x7c8] sm:$0xff]  ;;  %v2463_v49 = vcombine.low %v211_v36, %v215_v37 }
  0xfb   :  { %1766 = vmatprep.subr.bf16.mxu0 %v2434_v60  ;;  %1809 = vmatprep.subr.bf16.mxu1 %v2436_v61  ;;  %v2502_v60 = vcombine.high %v250_v54, %v254_v55  ;;  %v2504_v61 = vcombine.high %v251_v56, %v255_v57  ;;  %v335_v47 = vld [vmem:[#allocation6 + $0x7e8] sm:$0xff] }
 0x102   :  { %1767 = vmatpush2.bf16.xpose.msra.mxu0 %v2433_v2  ;;  %1810 = vmatpush2.bf16.xpose.msra.mxu1 %v2435_v3  ;;  %v2501_v2 = vcombine.low %v250_v54, %v254_v55  ;;  %v2503_v3 = vcombine.low %v251_v56, %v255_v57  ;;  %v323_v54 = vld [vmem:[#allocation6 + $0x788] sm:$0xff]  ;;  %v2583_v57 = vcombine.low %v331_v46, %v335_v47 }
 0x103   :  { %1768 = vmatprep.subr.bf16.mxu0 %v2426_v4  ;;  %1811 = vmatprep.subr.bf16.mxu1 %v2428_v5  ;;  %v2494_v4 = vcombine.high %v242_v62, %v246_v63  ;;  %v238_v5 = vld [vmem:[#allocation6 + $0x4e0] sm:$0xff]  ;;  %v327_v55 = vld [vmem:[#allocation6 + $0x7a8] sm:$0xff] }
 0x104   :  { %v315_v62 = vld [vmem:[#allocation6 + $0x748] sm:$0xff] }
 0x105   :  { %v319_v63 = vld [vmem:[#allocation6 + $0x768] sm:$0xff] }
 0x10a   :  { %1769 = vmatpush2.bf16.xpose.msra.mxu0 %v2425_v10  ;;  %1812 = vmatpush2.bf16.xpose.msra.mxu1 %v2427_v11  ;;  %v2488_v11 = vcombine.high %v235_v6, %v239_v7  ;;  %v2567_v7 = vcombine.low %v315_v62, %v319_v63 }
 0x10b   :  { %1770 = vmatprep.subr.bf16.mxu0 %v2418_v12  ;;  %1813 = vmatprep.subr.bf16.mxu1 %v2420_v13  ;;  %v226_v12 = vld [vmem:[#allocation6 + $0x480] sm:$0xff] }
 0x10c   :  { %v230_v13 = vld [vmem:[#allocation6 + $0x4a0] sm:$0xff] }
 0x10d   :  { %v2477_v25 = vcombine.low %v226_v12, %v230_v13 }
 0x112   :  { %1771 = vmatpush2.bf16.xpose.msra.mxu0 %v2417_v18  ;;  %1814 = vmatpush2.bf16.xpose.msra.mxu1 %v2419_v19  ;;  %v2478_v18 = vcombine.high %v226_v12, %v230_v13  ;;  %v2480_v19 = vcombine.high %v227_v14, %v231_v15  ;;  %v299_v12 = vld [vmem:[#allocation6 + $0x6c8] sm:$0xff] }
 0x113   :  { %1772 = vmatprep.subr.bf16.mxu0 %v2410_v20  ;;  %1815 = vmatprep.subr.bf16.mxu1 %v2412_v21  ;;  %v218_v20 = vld [vmem:[#allocation6 + $0x440] sm:$0xff]  ;;  %v303_v13 = vld [vmem:[#allocation6 + $0x6e8] sm:$0xff] }
 0x114   :  { %v222_v21 = vld [vmem:[#allocation6 + $0x460] sm:$0xff] }
 0x115   :  { %v2469_v38 = vcombine.low %v218_v20, %v222_v21 }
 0x11a   :  { %1773 = vmatpush2.bf16.xpose.msra.mxu0 %v2409_v28  ;;  %1816 = vmatpush2.bf16.xpose.msra.mxu1 %v2411_v29  ;;  %v2470_v28 = vcombine.high %v218_v20, %v222_v21  ;;  %v2472_v29 = vcombine.high %v219_v22, %v223_v24  ;;  %v291_v20 = vld [vmem:[#allocation6 + $0x688] sm:$0xff]  ;;  %v2551_v24 = vcombine.low %v299_v12, %v303_v13 }
 0x11b   :  { %1774 = vmatprep.subr.bf16.mxu0 %v2402_v30  ;;  %1817 = vmatprep.subr.bf16.mxu1 %v2404_v31  ;;  %v210_v30 = vld [vmem:[#allocation6 + $0x400] sm:$0xff]  ;;  %v295_v21 = vld [vmem:[#allocation6 + $0x6a8] sm:$0xff] }
 0x11c   :  { %v214_v31 = vld [vmem:[#allocation6 + $0x420] sm:$0xff] }
 0x11d   :  { %v2461_v48 = vcombine.low %v210_v30, %v214_v31 }
 0x122   :  { %1775 = vmatpush2.bf16.xpose.msra.mxu0 %v2401_v42  ;;  %1818 = vmatpush2.bf16.xpose.msra.mxu1 %v2403_v43  ;;  %v2462_v42 = vcombine.high %v210_v30, %v214_v31  ;;  %v2464_v43 = vcombine.high %v211_v36, %v215_v37  ;;  %v283_v30 = vld [vmem:[#allocation6 + $0x648] sm:$0xff]  ;;  %v2543_v37 = vcombine.low %v291_v20, %v295_v21 }
 0x123   :  { %1830 = vmatprep.subr.bf16.mxu0 %v2518_v44  ;;  %1873 = vmatprep.subr.bf16.mxu1 %v2520_v45  ;;  %v330_v44 = vld [vmem:[#allocation6 + $0x7c0] sm:$0xff]  ;;  %v287_v31 = vld [vmem:[#allocation6 + $0x668] sm:$0xff] }
 0x124   :  { %v334_v45 = vld [vmem:[#allocation6 + $0x7e0] sm:$0xff] }
 0x125   :  { %v2581_v56 = vcombine.low %v330_v44, %v334_v45 }
 0x129   :  { %1777 = vmatmul.mubr.bf16.vlgmr.msra.gmra.mxu0 %v2782_v23  ;;  %1820 = vmatmul.mubr.bf16.vlgmr.msra.gmra.mxu1 %v2784_v27 }
 0x12a   :  { %1831 = vmatpush1.bf16.xpose.msra.mxu0 %v2517_v50  ;;  %1874 = vmatpush1.bf16.xpose.msra.mxu1 %v2519_v51  ;;  %v2582_v50 = vcombine.high %v330_v44, %v334_v45  ;;  %v2584_v51 = vcombine.high %v331_v46, %v335_v47  ;;  %v275_v44 = vld [vmem:[#allocation6 + $0x608] sm:$0xff]  ;;  %v2535_v47 = vcombine.low %v283_v30, %v287_v31 }
 0x12b   :  { %1832 = vmatprep.subr.bf16.mxu0 %v2510_v52  ;;  %1875 = vmatprep.subr.bf16.mxu1 %v2512_v53  ;;  %v322_v52 = vld [vmem:[#allocation6 + $0x780] sm:$0xff]  ;;  %v279_v45 = vld [vmem:[#allocation6 + $0x628] sm:$0xff] }
 0x12c   :  { %1862 = vmatprep.mubr.bf16.mxu0 %v2774_v35  ;;  %1905 = vmatprep.mubr.bf16.mxu1 %v2778_v41  ;;  %v2496_v35 = vcombine.high %v243_v0, %v247_v1  ;;  %v234_v41 = vld [vmem:[#allocation6 + $0x4c0] sm:$0xff]  ;;  %v2575_v1 = vcombine.low %v323_v54, %v327_v55 }
 0x12d   :  { %v2486_v10 = vcombine.high %v234_v41, %v238_v5  ;;  %v2485_v16 = vcombine.low %v234_v41, %v238_v5  ;;  %v326_v53 = vld [vmem:[#allocation6 + $0x7a0] sm:$0xff]  ;;  %v307_v41 = vld [vmem:[#allocation6 + $0x708] sm:$0xff] }
 0x12e   :  { %v2573_v0 = vcombine.low %v322_v52, %v326_v53  ;;  %v311_v5 = vld [vmem:[#allocation6 + $0x728] sm:$0xff] }
 0x12f   :  { %v2559_v15 = vcombine.low %v307_v41, %v311_v5 }
 0x132   :  { %1833 = vmatpush1.bf16.xpose.msra.mxu0 %v2509_v58  ;;  %1876 = vmatpush1.bf16.xpose.msra.mxu1 %v2511_v59  ;;  %v2574_v58 = vcombine.high %v322_v52, %v326_v53  ;;  %v2576_v59 = vcombine.high %v323_v54, %v327_v55  ;;  %v269_v52 = vld [vmem:[#allocation6 + $0x5d8] sm:$0xff]  ;;  %v2527_v55 = vcombine.low %v275_v44, %v279_v45 }
 0x133   :  { %1834 = vmatprep.subr.bf16.mxu0 %v2502_v60  ;;  %1877 = vmatprep.subr.bf16.mxu1 %v2504_v61  ;;  %v314_v60 = vld [vmem:[#allocation6 + $0x740] sm:$0xff]  ;;  %v273_v53 = vld [vmem:[#allocation6 + $0x5f8] sm:$0xff] }
 0x134   :  { %v318_v61 = vld [vmem:[#allocation6 + $0x760] sm:$0xff] }
 0x135   :  { %v2565_v6 = vcombine.low %v314_v60, %v318_v61 }
 0x13a   :  { %1835 = vmatpush1.bf16.xpose.msra.mxu0 %v2501_v2  ;;  %1878 = vmatpush1.bf16.xpose.msra.mxu1 %v2503_v3  ;;  %v2566_v2 = vcombine.high %v314_v60, %v318_v61  ;;  %v2568_v3 = vcombine.high %v315_v62, %v319_v63  ;;  %v261_v60 = vld [vmem:[#allocation6 + $0x598] sm:$0xff]  ;;  %v2523_v63 = vcombine.low %v269_v52, %v273_v53 }
 0x13b   :  { %1836 = vmatprep.subr.bf16.mxu0 %v2494_v4  ;;  %1879 = vmatprep.subr.bf16.mxu1 %v2496_v35  ;;  %v306_v4 = vld [vmem:[#allocation6 + $0x700] sm:$0xff]  ;;  %v265_v61 = vld [vmem:[#allocation6 + $0x5b8] sm:$0xff] }
 0x13c   :  { %v310_v35 = vld [vmem:[#allocation6 + $0x720] sm:$0xff] }
 0x13d   :  { %v2557_v14 = vcombine.low %v306_v4, %v310_v35 }
 0x142   :  { %1837 = vmatpush1.bf16.xpose.msra.mxu0 %v2493_v8  ;;  %1880 = vmatpush1.bf16.xpose.msra.mxu1 %v2495_v9  ;;  %v2558_v8 = vcombine.high %v306_v4, %v310_v35  ;;  %v2560_v9 = vcombine.high %v307_v41, %v311_v5  ;;  %v253_v4 = vld [vmem:[#allocation6 + $0x558] sm:$0xff]  ;;  %v2515_v5 = vcombine.low %v261_v60, %v265_v61 }
 0x143   :  { %1838 = vmatprep.subr.bf16.mxu0 %v2486_v10  ;;  %1881 = vmatprep.subr.bf16.mxu1 %v2488_v11  ;;  %v298_v10 = vld [vmem:[#allocation6 + $0x6c0] sm:$0xff]  ;;  %v257_v35 = vld [vmem:[#allocation6 + $0x578] sm:$0xff] }
 0x144   :  { %v302_v11 = vld [vmem:[#allocation6 + $0x6e0] sm:$0xff] }
 0x145   :  { %v2549_v22 = vcombine.low %v298_v10, %v302_v11 }
 0x14a   :  { %1839 = vmatpush1.bf16.xpose.msra.mxu0 %v2485_v16  ;;  %1882 = vmatpush1.bf16.xpose.msra.mxu1 %v2487_v17  ;;  %v2550_v16 = vcombine.high %v298_v10, %v302_v11  ;;  %v2552_v17 = vcombine.high %v299_v12, %v303_v13  ;;  %v2507_v11 = vcombine.low %v253_v4, %v257_v35  ;;  %v240_v13 = vld [vmem:[#allocation6 + $0x4f0] sm:$0xff] }
 0x14b   :  { %1840 = vmatprep.subr.bf16.mxu0 %v2478_v18  ;;  %1883 = vmatprep.subr.bf16.mxu1 %v2480_v19  ;;  %v290_v18 = vld [vmem:[#allocation6 + $0x680] sm:$0xff] }
 0x14c   :  { %v294_v19 = vld [vmem:[#allocation6 + $0x6a0] sm:$0xff] }
 0x14d   :  { %v2541_v36 = vcombine.low %v290_v18, %v294_v19 }
 0x152   :  { %1841 = vmatpush1.bf16.xpose.msra.mxu0 %v2477_v25  ;;  %1884 = vmatpush1.bf16.xpose.msra.mxu1 %v2479_v26  ;;  %v2542_v25 = vcombine.high %v290_v18, %v294_v19  ;;  %v2544_v26 = vcombine.high %v291_v20, %v295_v21  ;;  %v228_v20 = vld [vmem:[#allocation6 + $0x490] sm:$0xff] }
 0x153   :  { %1842 = vmatprep.subr.bf16.mxu0 %v2470_v28  ;;  %1885 = vmatprep.subr.bf16.mxu1 %v2472_v29  ;;  %v282_v28 = vld [vmem:[#allocation6 + $0x640] sm:$0xff]  ;;  %v232_v21 = vld [vmem:[#allocation6 + $0x4b0] sm:$0xff] }
 0x154   :  { %v286_v29 = vld [vmem:[#allocation6 + $0x660] sm:$0xff] }
 0x155   :  { %v2533_v46 = vcombine.low %v282_v28, %v286_v29 }
 0x15a   :  { %1843 = vmatpush1.bf16.xpose.msra.mxu0 %v2469_v38  ;;  %1886 = vmatpush1.bf16.xpose.msra.mxu1 %v2471_v39  ;;  %v2534_v38 = vcombine.high %v282_v28, %v286_v29  ;;  %v2536_v39 = vcombine.high %v283_v30, %v287_v31  ;;  %v2482_v28 = vcombine.high %v228_v20, %v232_v21  ;;  %v220_v30 = vld [vmem:[#allocation6 + $0x450] sm:$0xff] }
 0x15b   :  { %1844 = vmatprep.subr.bf16.mxu0 %v2462_v42  ;;  %1887 = vmatprep.subr.bf16.mxu1 %v2464_v43  ;;  %v274_v42 = vld [vmem:[#allocation6 + $0x600] sm:$0xff]  ;;  %v224_v31 = vld [vmem:[#allocation6 + $0x470] sm:$0xff] }
 0x15c   :  { %v278_v43 = vld [vmem:[#allocation6 + $0x620] sm:$0xff] }
 0x15d   :  { %v2525_v54 = vcombine.low %v274_v42, %v278_v43 }
 0x162   :  { %1845 = vmatpush1.bf16.xpose.msra.mxu0 %v2461_v48  ;;  %1888 = vmatpush1.bf16.xpose.msra.mxu1 %v2463_v49  ;;  %v2526_v48 = vcombine.high %v274_v42, %v278_v43  ;;  %v2528_v49 = vcombine.high %v275_v44, %v279_v45  ;;  %v2474_v42 = vcombine.high %v220_v30, %v224_v31  ;;  %v212_v44 = vld [vmem:[#allocation6 + $0x410] sm:$0xff] }
 0x163   :  { %1846 = vmatprep.subr.bf16.mxu0 %v2582_v50  ;;  %1889 = vmatprep.subr.bf16.mxu1 %v2584_v51  ;;  %v268_v50 = vld [vmem:[#allocation6 + $0x5d0] sm:$0xff] }
 0x164   :  { %v272_v51 = vld [vmem:[#allocation6 + $0x5f0] sm:$0xff] }
 0x165   :  { %v2521_v62 = vcombine.low %v268_v50, %v272_v51  ;;  %v216_v45 = vld [vmem:[#allocation6 + $0x430] sm:$0xff] }
 0x16a   :  { %1847 = vmatpush2.bf16.xpose.msra.mxu0 %v2581_v56  ;;  %1890 = vmatpush2.bf16.xpose.msra.mxu1 %v2583_v57  ;;  %v2522_v56 = vcombine.high %v268_v50, %v272_v51  ;;  %v2524_v57 = vcombine.high %v269_v52, %v273_v53  ;;  %v2466_v50 = vcombine.high %v212_v44, %v216_v45  ;;  %v332_v52 = vld [vmem:[#allocation6 + $0x7d0] sm:$0xff] }
 0x16b   :  { %1848 = vmatprep.subr.bf16.mxu0 %v2574_v58  ;;  %1891 = vmatprep.subr.bf16.mxu1 %v2576_v59  ;;  %v260_v58 = vld [vmem:[#allocation6 + $0x590] sm:$0xff] }
 0x16c   :  { %v264_v59 = vld [vmem:[#allocation6 + $0x5b0] sm:$0xff] }
 0x16d   :  { %v2513_v41 = vcombine.low %v260_v58, %v264_v59  ;;  %v336_v53 = vld [vmem:[#allocation6 + $0x7f0] sm:$0xff] }
 0x172   :  { %1849 = vmatpush2.bf16.xpose.msra.mxu0 %v2573_v0  ;;  %1892 = vmatpush2.bf16.xpose.msra.mxu1 %v2575_v1  ;;  %v2514_v0 = vcombine.high %v260_v58, %v264_v59  ;;  %v2516_v1 = vcombine.high %v261_v60, %v265_v61  ;;  %v2586_v58 = vcombine.high %v332_v52, %v336_v53  ;;  %v324_v60 = vld [vmem:[#allocation6 + $0x790] sm:$0xff] }
 0x173   :  { %1850 = vmatprep.subr.bf16.mxu0 %v2566_v2  ;;  %1893 = vmatprep.subr.bf16.mxu1 %v2568_v3  ;;  %v252_v2 = vld [vmem:[#allocation6 + $0x550] sm:$0xff] }
 0x174   :  { %v256_v3 = vld [vmem:[#allocation6 + $0x570] sm:$0xff] }
 0x175   :  { %v2505_v10 = vcombine.low %v252_v2, %v256_v3  ;;  %v328_v61 = vld [vmem:[#allocation6 + $0x7b0] sm:$0xff] }
 0x17a   :  { %1851 = vmatpush2.bf16.xpose.msra.mxu0 %v2565_v6  ;;  %1894 = vmatpush2.bf16.xpose.msra.mxu1 %v2567_v7  ;;  %v2506_v6 = vcombine.high %v252_v2, %v256_v3  ;;  %v2508_v7 = vcombine.high %v253_v4, %v257_v35  ;;  %v2578_v2 = vcombine.high %v324_v60, %v328_v61  ;;  %v316_v4 = vld [vmem:[#allocation6 + $0x750] sm:$0xff] }
 0x17b   :  { %1852 = vmatprep.subr.bf16.mxu0 %v2558_v8  ;;  %1895 = vmatprep.subr.bf16.mxu1 %v2560_v9  ;;  %v245_v8 = vld [vmem:[#allocation6 + $0x518] sm:$0xff]  ;;  %v320_v35 = vld [vmem:[#allocation6 + $0x770] sm:$0xff] }
 0x17c   :  { %v249_v9 = vld [vmem:[#allocation6 + $0x538] sm:$0xff] }
 0x182   :  { %1853 = vmatpush2.bf16.xpose.msra.mxu0 %v2557_v14  ;;  %1896 = vmatpush2.bf16.xpose.msra.mxu1 %v2559_v15  ;;  %v237_v14 = vld [vmem:[#allocation6 + $0x4d8] sm:$0xff] }
 0x183   :  { %1854 = vmatprep.subr.bf16.mxu0 %v2550_v16  ;;  %1897 = vmatprep.subr.bf16.mxu1 %v2552_v17  ;;  %v241_v15 = vld [vmem:[#allocation6 + $0x4f8] sm:$0xff]  ;;  %v2499_v17 = vcombine.low %v245_v8, %v249_v9 }
 0x184   :  { %v2492_v19 = vcombine.high %v237_v14, %v241_v15 }
 0x18a   :  { %1855 = vmatpush2.bf16.xpose.msra.mxu0 %v2549_v22  ;;  %1898 = vmatpush2.bf16.xpose.msra.mxu1 %v2551_v24  ;;  %v229_v22 = vld [vmem:[#allocation6 + $0x498] sm:$0xff] }
 0x18b   :  { %1856 = vmatprep.subr.bf16.mxu0 %v2542_v25  ;;  %1899 = vmatprep.subr.bf16.mxu1 %v2544_v26  ;;  %v233_v24 = vld [vmem:[#allocation6 + $0x4b8] sm:$0xff]  ;;  %v2491_v26 = vcombine.low %v237_v14, %v241_v15  ;;  %v300_v14 = vld [vmem:[#allocation6 + $0x6d0] sm:$0xff] }
 0x18c   :  { %v2484_v29 = vcombine.high %v229_v22, %v233_v24  ;;  %v304_v15 = vld [vmem:[#allocation6 + $0x6f0] sm:$0xff] }
 0x192   :  { %1857 = vmatpush2.bf16.xpose.msra.mxu0 %v2541_v36  ;;  %1900 = vmatpush2.bf16.xpose.msra.mxu1 %v2543_v37  ;;  %v221_v36 = vld [vmem:[#allocation6 + $0x458] sm:$0xff] }
 0x193   :  { %1858 = vmatprep.subr.bf16.mxu0 %v2534_v38  ;;  %1901 = vmatprep.subr.bf16.mxu1 %v2536_v39  ;;  %v225_v37 = vld [vmem:[#allocation6 + $0x478] sm:$0xff]  ;;  %v2481_v38 = vcombine.low %v228_v20, %v232_v21  ;;  %v2483_v39 = vcombine.low %v229_v22, %v233_v24  ;;  %v2554_v20 = vcombine.high %v300_v14, %v304_v15  ;;  %v292_v22 = vld [vmem:[#allocation6 + $0x690] sm:$0xff] }
 0x194   :  { %v2476_v43 = vcombine.high %v221_v36, %v225_v37  ;;  %v296_v24 = vld [vmem:[#allocation6 + $0x6b0] sm:$0xff] }
 0x19a   :  { %1859 = vmatpush2.bf16.xpose.msra.mxu0 %v2533_v46  ;;  %1902 = vmatpush2.bf16.xpose.msra.mxu1 %v2535_v47  ;;  %v213_v46 = vld [vmem:[#allocation6 + $0x418] sm:$0xff] }
 0x19b   :  { %1860 = vmatprep.subr.bf16.mxu0 %v2526_v48  ;;  %1903 = vmatprep.subr.bf16.mxu1 %v2528_v49  ;;  %v217_v47 = vld [vmem:[#allocation6 + $0x438] sm:$0xff]  ;;  %v2473_v48 = vcombine.low %v220_v30, %v224_v31  ;;  %v2475_v49 = vcombine.low %v221_v36, %v225_v37  ;;  %v2546_v30 = vcombine.high %v292_v22, %v296_v24  ;;  %v284_v36 = vld [vmem:[#allocation6 + $0x650] sm:$0xff] }
 0x19c   :  { %v2468_v51 = vcombine.high %v213_v46, %v217_v47  ;;  %v288_v37 = vld [vmem:[#allocation6 + $0x670] sm:$0xff] }
 0x1a2   :  { %1861 = vmatpush2.bf16.xpose.msra.mxu0 %v2525_v54  ;;  %1904 = vmatpush2.bf16.xpose.msra.mxu1 %v2527_v55  ;;  %v333_v54 = vld [vmem:[#allocation6 + $0x7d8] sm:$0xff] }
 0x1a3   :  { %1916 = vmatprep.subr.bf16.mxu0 %v2522_v56  ;;  %1959 = vmatprep.subr.bf16.mxu1 %v2524_v57  ;;  %v337_v55 = vld [vmem:[#allocation6 + $0x7f8] sm:$0xff]  ;;  %v2465_v56 = vcombine.low %v212_v44, %v216_v45  ;;  %v2467_v57 = vcombine.low %v213_v46, %v217_v47  ;;  %v2538_v44 = vcombine.high %v284_v36, %v288_v37  ;;  %v276_v46 = vld [vmem:[#allocation6 + $0x610] sm:$0xff] }
 0x1a4   :  { %v2588_v59 = vcombine.high %v333_v54, %v337_v55  ;;  %v280_v47 = vld [vmem:[#allocation6 + $0x630] sm:$0xff] }
 0x1a9   :  { %1863 = vmatmul.mubr.bf16.vlgmr.msra.gmra.mxu0 %v2772_v34  ;;  %1906 = vmatmul.mubr.bf16.vlgmr.msra.gmra.mxu1 %v2776_v40  ;;  %v244_v34 = vld [vmem:[#allocation6 + $0x510] sm:$0xff] }
 0x1aa   :  { %1917 = vmatpush1.bf16.xpose.msra.mxu0 %v2521_v62  ;;  %1960 = vmatpush1.bf16.xpose.msra.mxu1 %v2523_v63  ;;  %v248_v40 = vld [vmem:[#allocation6 + $0x530] sm:$0xff]  ;;  %v325_v62 = vld [vmem:[#allocation6 + $0x798] sm:$0xff] }
 0x1ab   :  { %1918 = vmatprep.subr.bf16.mxu0 %v2514_v0  ;;  %1961 = vmatprep.subr.bf16.mxu1 %v2516_v1  ;;  %v2498_v12 = vcombine.high %v244_v34, %v248_v40  ;;  %v2497_v16 = vcombine.low %v244_v34, %v248_v40  ;;  %v329_v63 = vld [vmem:[#allocation6 + $0x7b8] sm:$0xff]  ;;  %v2585_v0 = vcombine.low %v332_v52, %v336_v53 }
 0x1ac   :  { %1948 = vmatprep.mubr.bf16.mxu0 %v2786_v32  ;;  %1991 = vmatprep.mubr.bf16.mxu1 %v2789_v33  ;;  %v2500_v32 = vcombine.high %v245_v8, %v249_v9  ;;  %v236_v33 = vld [vmem:[#allocation6 + $0x4d0] sm:$0xff]  ;;  %v2587_v1 = vcombine.low %v333_v54, %v337_v55  ;;  %v2580_v3 = vcombine.high %v325_v62, %v329_v63 }
 0x1ad   :  { %v2490_v18 = vcombine.high %v236_v33, %v240_v13  ;;  %v2489_v25 = vcombine.low %v236_v33, %v240_v13  ;;  %v2570_v34 = vcombine.high %v316_v4, %v320_v35  ;;  %v308_v8 = vld [vmem:[#allocation6 + $0x710] sm:$0xff]  ;;  %v2530_v52 = vcombine.high %v276_v46, %v280_v47 }
 0x1ae   :  { %v312_v9 = vld [vmem:[#allocation6 + $0x730] sm:$0xff]  ;;  %v2529_v54 = vcombine.low %v276_v46, %v280_v47 }
 0x1af   :  { %v2562_v33 = vcombine.high %v308_v8, %v312_v9 }
 0x1b2   :  { %1919 = vmatpush1.bf16.xpose.msra.mxu0 %v2513_v41  ;;  %1962 = vmatpush1.bf16.xpose.msra.mxu1 %v2515_v5  ;;  %v317_v41 = vld [vmem:[#allocation6 + $0x758] sm:$0xff] }
 0x1b3   :  { %1920 = vmatprep.subr.bf16.mxu0 %v2506_v6  ;;  %1963 = vmatprep.subr.bf16.mxu1 %v2508_v7  ;;  %v321_v5 = vld [vmem:[#allocation6 + $0x778] sm:$0xff]  ;;  %v2577_v6 = vcombine.low %v324_v60, %v328_v61  ;;  %v2579_v7 = vcombine.low %v325_v62, %v329_v63 }
 0x1b4   :  { %v2572_v40 = vcombine.high %v317_v41, %v321_v5 }
 0x1ba   :  { %1921 = vmatpush1.bf16.xpose.msra.mxu0 %v2505_v10  ;;  %1964 = vmatpush1.bf16.xpose.msra.mxu1 %v2507_v11  ;;  %v309_v10 = vld [vmem:[#allocation6 + $0x718] sm:$0xff] }
 0x1bb   :  { %1922 = vmatprep.subr.bf16.mxu0 %v2498_v12  ;;  %1965 = vmatprep.subr.bf16.mxu1 %v2500_v32  ;;  %v313_v11 = vld [vmem:[#allocation6 + $0x738] sm:$0xff]  ;;  %v2569_v12 = vcombine.low %v316_v4, %v320_v35  ;;  %v2571_v32 = vcombine.low %v317_v41, %v321_v5 }
 0x1bc   :  { %v2564_v13 = vcombine.high %v309_v10, %v313_v11 }
 0x1c2   :  { %1923 = vmatpush1.bf16.xpose.msra.mxu0 %v2497_v16  ;;  %1966 = vmatpush1.bf16.xpose.msra.mxu1 %v2499_v17  ;;  %v301_v16 = vld [vmem:[#allocation6 + $0x6d8] sm:$0xff] }
 0x1c3   :  { %1924 = vmatprep.subr.bf16.mxu0 %v2490_v18  ;;  %1967 = vmatprep.subr.bf16.mxu1 %v2492_v19  ;;  %v305_v17 = vld [vmem:[#allocation6 + $0x6f8] sm:$0xff]  ;;  %v2561_v18 = vcombine.low %v308_v8, %v312_v9  ;;  %v2563_v19 = vcombine.low %v309_v10, %v313_v11 }
 0x1c4   :  { %v2556_v21 = vcombine.high %v301_v16, %v305_v17 }
 0x1ca   :  { %1925 = vmatpush1.bf16.xpose.msra.mxu0 %v2489_v25  ;;  %1968 = vmatpush1.bf16.xpose.msra.mxu1 %v2491_v26  ;;  %v293_v25 = vld [vmem:[#allocation6 + $0x698] sm:$0xff] }
 0x1cb   :  { %1926 = vmatprep.subr.bf16.mxu0 %v2482_v28  ;;  %1969 = vmatprep.subr.bf16.mxu1 %v2484_v29  ;;  %v297_v26 = vld [vmem:[#allocation6 + $0x6b8] sm:$0xff]  ;;  %v2553_v28 = vcombine.low %v300_v14, %v304_v15  ;;  %v2555_v29 = vcombine.low %v301_v16, %v305_v17 }
 0x1cc   :  { %v2548_v31 = vcombine.high %v293_v25, %v297_v26 }
 0x1d2   :  { %1927 = vmatpush1.bf16.xpose.msra.mxu0 %v2481_v38  ;;  %1970 = vmatpush1.bf16.xpose.msra.mxu1 %v2483_v39  ;;  %v285_v38 = vld [vmem:[#allocation6 + $0x658] sm:$0xff] }
 0x1d3   :  { %1928 = vmatprep.subr.bf16.mxu0 %v2474_v42  ;;  %1971 = vmatprep.subr.bf16.mxu1 %v2476_v43  ;;  %v289_v39 = vld [vmem:[#allocation6 + $0x678] sm:$0xff]  ;;  %v2545_v42 = vcombine.low %v292_v22, %v296_v24  ;;  %v2547_v43 = vcombine.low %v293_v25, %v297_v26 }
 0x1d4   :  { %v2540_v45 = vcombine.high %v285_v38, %v289_v39 }
 0x1da   :  { %1929 = vmatpush1.bf16.xpose.msra.mxu0 %v2473_v48  ;;  %1972 = vmatpush1.bf16.xpose.msra.mxu1 %v2475_v49  ;;  %v277_v48 = vld [vmem:[#allocation6 + $0x618] sm:$0xff] }
 0x1db   :  { %1930 = vmatprep.subr.bf16.mxu0 %v2466_v50  ;;  %1973 = vmatprep.subr.bf16.mxu1 %v2468_v51  ;;  %v281_v49 = vld [vmem:[#allocation6 + $0x638] sm:$0xff]  ;;  %v2537_v50 = vcombine.low %v284_v36, %v288_v37  ;;  %v2539_v51 = vcombine.low %v285_v38, %v289_v39 }
 0x1dc   :  { %v2532_v53 = vcombine.high %v277_v48, %v281_v49  ;;  %v2531_v55 = vcombine.low %v277_v48, %v281_v49 }
 0x1e2   :  { %1931 = vmatpush1.bf16.xpose.msra.mxu0 %v2465_v56  ;;  %1974 = vmatpush1.bf16.xpose.msra.mxu1 %v2467_v57  ;;  %v1692_v56 = vpop.f32.mrf.mxu0 }
 0x1e3   :  { %1932 = vmatprep.subr.bf16.mxu0 %v2586_v58  ;;  %1975 = vmatprep.subr.bf16.mxu1 %v2588_v59  ;;  %v1735_v58 = vpop.f32.mrf.mxu1 }
 0x1e4   :  { %v1694_v57 = vpop.f32.mrf.mxu0 }
 0x1e5   :  { %v1737_v60 = vpop.f32.mrf.mxu1 }
 0x1e6   :  { %v1696_v59 = vpop.f32.mrf.mxu0 }
 0x1e7   :  { %v1739_v62 = vpop.f32.mrf.mxu1 }
 0x1e8   :  { %v1698_v61 = vpop.f32.mrf.mxu0 }
 0x1ea   :  { %1933 = vmatpush2.bf16.xpose.msra.mxu0 %v2585_v0  ;;  %1976 = vmatpush2.bf16.xpose.msra.mxu1 %v2587_v1  ;;  %v1778_v63 = vpop.f32.mrf.mxu0  ;;  %v1741_v0 = vpop.f32.mrf.mxu1 }
 0x1eb   :  { %1934 = vmatprep.subr.bf16.mxu0 %v2578_v2  ;;  %1977 = vmatprep.subr.bf16.mxu1 %v2580_v3  ;;  %v1742_v41 = vadd.f32 %v1741_v0, %v1698_v61 }
 0x1ec   :  { %v1780_v1 = vpop.f32.mrf.mxu0  ;;  %v1821_v2 = vpop.f32.mrf.mxu1 }
 0x1ee   :  { %v1782_v3 = vpop.f32.mrf.mxu0  ;;  %v1823_v4 = vpop.f32.mrf.mxu1 }
 0x1f0   :  { %v1784_v35 = vpop.f32.mrf.mxu0  ;;  %v1825_v5 = vpop.f32.mrf.mxu1 }
 0x1f2   :  { %1935 = vmatpush2.bf16.xpose.msra.mxu0 %v2577_v6  ;;  %1978 = vmatpush2.bf16.xpose.msra.mxu1 %v2579_v7  ;;  %v1738_v6 = vadd.f32 %v1737_v60, %v1694_v57  ;;  %v1785_v7 = vadd.f32 %v1784_v35, %v1742_v41  ;;  %v1827_v8 = vpop.f32.mrf.mxu1 }
 0x1f3   :  { %1936 = vmatprep.subr.bf16.mxu0 %v2570_v34  ;;  %1979 = vmatprep.subr.bf16.mxu1 %v2572_v40 }
 0x1f4   :  { %v1781_v34 = vadd.f32 %v1780_v1, %v1738_v6  ;;  %v2804_v10 = vadd.f32 %v1827_v8, %v1785_v7 }
 0x1f6   :  { %v2806_v11 = vadd.f32 %v1823_v4, %v1781_v34 }
 0x1fa   :  { %1937 = vmatpush2.bf16.xpose.msra.mxu0 %v2569_v12  ;;  %1980 = vmatpush2.bf16.xpose.msra.mxu1 %v2571_v32 }
 0x1fb   :  { %1938 = vmatprep.subr.bf16.mxu0 %v2562_v33  ;;  %1981 = vmatprep.subr.bf16.mxu1 %v2564_v13  ;;  %v2036_v33 = vadd.f32 %v2804_v10, %v2806_v11 }
 0x1fd   :  { %v2037_v14 = vrot.slane %v2036_v33, 4 }
 0x1ff   :  { %v2038_v16 = vadd.f32 %v2037_v14, %v2036_v33 }
 0x202   :  { %1939 = vmatpush2.bf16.xpose.msra.mxu0 %v2561_v18  ;;  %1982 = vmatpush2.bf16.xpose.msra.mxu1 %v2563_v19  ;;  %v2039_v18 = vrot.slane %v2038_v16, 2 }
 0x203   :  { %1940 = vmatprep.subr.bf16.mxu0 %v2554_v20  ;;  %1983 = vmatprep.subr.bf16.mxu1 %v2556_v21 }
 0x204   :  { %v2040_v20 = vadd.f32 %v2039_v18, %v2038_v16 }
 0x206   :  { %v2041_v25 = vrot.slane %v2040_v20, 1 }
 0x20a   :  { %1941 = vmatpush2.bf16.xpose.msra.mxu0 %v2553_v28  ;;  %1984 = vmatpush2.bf16.xpose.msra.mxu1 %v2555_v29 }
 0x20b   :  { %1942 = vmatprep.subr.bf16.mxu0 %v2546_v30  ;;  %1985 = vmatprep.subr.bf16.mxu1 %v2548_v31  ;;  %v2042_v30 = vadd.f32 %v2041_v25, %v2040_v20 }
 0x20d   :  { %v2816_v38 = vmul.f32 0.0625, %v2042_v30 }
 0x20f   :  { %v2067_v46 = vsub.f32 %v2804_v10, %v2816_v38 }
 0x212   :  { %1943 = vmatpush2.bf16.xpose.msra.mxu0 %v2545_v42  ;;  %1986 = vmatpush2.bf16.xpose.msra.mxu1 %v2547_v43 }
 0x213   :  { %1944 = vmatprep.subr.bf16.mxu0 %v2538_v44  ;;  %1987 = vmatprep.subr.bf16.mxu1 %v2540_v45  ;;  %v2063_v44 = vsub.f32 %v2806_v11, %v2816_v38 }
 0x21a   :  { %1945 = vmatpush2.bf16.xpose.msra.mxu0 %v2537_v50  ;;  %1988 = vmatpush2.bf16.xpose.msra.mxu1 %v2539_v51 }
 0x21b   :  { %1946 = vmatprep.subr.bf16.mxu0 %v2530_v52  ;;  %1989 = vmatprep.subr.bf16.mxu1 %v2532_v53 }
 0x222   :  { %1947 = vmatpush2.bf16.xpose.msra.mxu0 %v2529_v54  ;;  %1990 = vmatpush2.bf16.xpose.msra.mxu1 %v2531_v55 }
 0x229   :  { %1949 = vmatmul.mubr.bf16.vlgmr.msra.gmra.mxu0 %v2782_v23  ;;  %1992 = vmatmul.mubr.bf16.vlgmr.msra.gmra.mxu1 %v2784_v27  ;;  %v1740_v23 = vadd.f32 %v1739_v62, %v1696_v59  ;;  %v1736_v27 = vadd.f32 %v1735_v58, %v1692_v56  ;;  %v2071_v56 = vmul.f32 %v2063_v44, %v2063_v44 }
 0x22a   :  { %v2075_v58 = vmul.f32 %v2067_v46, %v2067_v46 }
 0x22b   :  { %v1783_v40 = vadd.f32 %v1782_v3, %v1740_v23  ;;  %v1779_v9 = vadd.f32 %v1778_v63, %v1736_v27 }
 0x22c   :  { %v2085_v41 = vadd.f32 %v2075_v58, %v2071_v56 }
 0x22d   :  { %v2808_v12 = vadd.f32 %v1825_v5, %v1783_v40  ;;  %v2810_v32 = vadd.f32 %v1821_v2, %v1779_v9 }
 0x22e   :  { %v2086_v40 = vrot.slane %v2085_v41, 4 }
 0x22f   :  { %v2029_v13 = vadd.f32 %v2808_v12, %v2810_v32 }
 0x231   :  { %v2030_v15 = vrot.slane %v2029_v13, 4 }
 0x233   :  { %v2031_v17 = vadd.f32 %v2030_v15, %v2029_v13  ;;  %v2087_v15 = vadd.f32 %v2086_v40, %v2085_v41 }
 0x235   :  { %v2032_v19 = vrot.slane %v2031_v17, 2 }
 0x237   :  { %v2033_v21 = vadd.f32 %v2032_v19, %v2031_v17 }
 0x239   :  { %v2034_v26 = vrot.slane %v2033_v21, 1 }
 0x23b   :  { %v2035_v31 = vadd.f32 %v2034_v26, %v2033_v21  ;;  %v2088_v21 = vrot.slane %v2087_v15, 2 }
 0x23d   :  { %v2818_v39 = vmul.f32 0.0625, %v2035_v31 }
 0x23f   :  { %v2062_v49 = vsub.f32 %v2810_v32, %v2818_v39  ;;  %v2066_v50 = vsub.f32 %v2808_v12, %v2818_v39 }
 0x241   :  { %v2070_v63 = vmul.f32 %v2062_v49, %v2062_v49  ;;  %v2074_v0 = vmul.f32 %v2066_v50, %v2066_v50 }
 0x243   :  { %v2078_v7 = vadd.f32 %v2074_v0, %v2070_v63 }
 0x245   :  { %v2079_v33 = vrot.slane %v2078_v7, 4 }
 0x247   :  { %v2080_v18 = vadd.f32 %v2079_v33, %v2078_v7  ;;  %v2128_v33 = vlaneseq }
 0x249   :  { %v2081_v25 = vrot.slane %v2080_v18, 2 }
 0x269   :  { %v1864_v22 = vpop.f32.mrf.mxu0  ;;  %v1907_v24 = vpop.f32.mrf.mxu1 }
 0x26a   :  { %v1908_v47 = vadd.f32 %v1907_v24, %v1864_v22 }
 0x26b   :  { %v1866_v28 = vpop.f32.mrf.mxu0  ;;  %v1909_v29 = vpop.f32.mrf.mxu1 }
 0x26c   :  { %v1910_v52 = vadd.f32 %v1909_v29, %v1866_v28  ;;  %v2089_v29 = vadd.f32 %v2088_v21, %v2087_v15 }
 0x26d   :  { %v1868_v36 = vpop.f32.mrf.mxu0  ;;  %v1911_v37 = vpop.f32.mrf.mxu1 }
 0x26e   :  { %v1912_v53 = vadd.f32 %v1911_v37, %v1868_v36  ;;  %v2082_v37 = vadd.f32 %v2081_v25, %v2080_v18  ;;  %v2090_v46 = vrot.slane %v2089_v29, 1 }
 0x26f   :  { %v1870_v42 = vpop.f32.mrf.mxu0  ;;  %v1913_v43 = vpop.f32.mrf.mxu1 }
 0x270   :  { %v1914_v59 = vadd.f32 %v1913_v43, %v1870_v42  ;;  %v2083_v50 = vrot.slane %v2082_v37, 1 }
 0x272   :  { %v2084_v56 = vadd.f32 %v2083_v50, %v2082_v37 }
 0x2e9   :  { %v1950_v45 = vpop.f32.mrf.mxu0  ;;  %v1993_v48 = vpop.f32.mrf.mxu1 }
 0x2ea   :  { %v1951_v54 = vadd.f32 %v1950_v45, %v1908_v47 }
 0x2eb   :  { %v1952_v51 = vpop.f32.mrf.mxu0  ;;  %v1995_v55 = vpop.f32.mrf.mxu1 }
 0x2ec   :  { %v1953_v60 = vadd.f32 %v1952_v51, %v1910_v52  ;;  %v2828_v2 = vadd.f32 %v1993_v48, %v1951_v54 }
 0x2ed   :  { %v1954_v57 = vpop.f32.mrf.mxu0  ;;  %v1997_v62 = vpop.f32.mrf.mxu1 }
 0x2ee   :  { %v1955_v61 = vadd.f32 %v1954_v57, %v1912_v53  ;;  %v2832_v5 = vadd.f32 %v1995_v55, %v1953_v60  ;;  %v2091_v53 = vadd.f32 %v2090_v46, %v2089_v29 }
 0x2ef   :  { %v1956_v1 = vpop.f32.mrf.mxu0  ;;  %v1999_v35 = vpop.f32.mrf.mxu1 }
 0x2f0   :  { %v2830_v3 = vadd.f32 %v1997_v62, %v1955_v61  ;;  %v1957_v4 = vadd.f32 %v1956_v1, %v1914_v59  ;;  %v2107_v59 = vmul.f32 0.0625, %v2091_v53  ;;  %v2106_v62 = vmul.f32 0.0625, %v2084_v56 }
 0x2f2   :  { %v2043_v6 = vadd.f32 %v2830_v3, %v2828_v2  ;;  %v2836_v23 = vadd.f32 %v1999_v35, %v1957_v4  ;;  %v2112_v1 = vadd.f32 1e-05, %v2107_v59  ;;  %v2111_v41 = vadd.f32 1e-05, %v2106_v62 }
 0x2f4   :  { %v2044_v27 = vrot.slane %v2043_v6, 4  ;;  %v2050_v34 = vadd.f32 %v2836_v23, %v2832_v5  ;;  %2604 = vrsqrt.f32 %v2112_v1 }
 0x2f5   :  { %2606 = vrsqrt.f32 %v2111_v41 }
 0x2f6   :  { %v2045_v8 = vadd.f32 %v2044_v27, %v2043_v6  ;;  %v2051_v9 = vrot.slane %v2050_v34, 4 }
 0x2f8   :  { %v2046_v13 = vrot.slane %v2045_v8, 2  ;;  %v2052_v14 = vadd.f32 %v2051_v9, %v2050_v34 }
 0x2fa   :  { %v2047_v16 = vadd.f32 %v2046_v13, %v2045_v8  ;;  %v2053_v17 = vrot.slane %v2052_v14, 2  ;;  %v2735_v8 = vmov 1966171168  }
 0x2fb   :  { %v2126_v9 = vunpack.c.l.s4 %v2735_v8 }
 0x2fc   :  { %v2048_v19 = vrot.slane %v2047_v16, 1  ;;  %v2054_v20 = vadd.f32 %v2053_v17, %v2052_v14  ;;  %v2129_v14 = vshrl.u32 %v2128_v33, 7 }
 0x2fd   :  { %v2127_v13 = vunpack.c.0.s8 %v2126_v9 }
 0x2fe   :  { %v2049_v22 = vadd.f32 %v2048_v19, %v2047_v16  ;;  %v2055_v24 = vrot.slane %v2054_v20, 1  ;;  %v2154_v29 = vsub.s32 0, %v2129_v14  ;;  %v2162_v37 = vsub.s32 2, %v2129_v14 }
 0x2ff   :  { %v2130_v19 = vsub.s32 %v2127_v13, %v2129_v14 }
 0x300   :  { %v2840_v26 = vmul.f32 0.0625, %v2049_v22  ;;  %v2056_v28 = vadd.f32 %v2055_v24, %v2054_v20 }
 0x301   :  { %v2605_v15 = vpop.eup %2604 }
 0x302   :  { %v2064_v30 = vsub.f32 %v2828_v2, %v2840_v26  ;;  %v2068_v31 = vsub.f32 %v2830_v3, %v2840_v26  ;;  %v2846_v36 = vmul.f32 0.0625, %v2056_v28  ;;  %v2607_v16 = vpop.eup %2606  ;;  %v2110_v28 = vld [vmem:[#allocation8] ss:$2 sm:$0xf] }
 0x303   :  { %v2123_v18 = vcombine.low %v2607_v16, %v2605_v15 }
 0x304   :  { %v2072_v42 = vmul.f32 %v2064_v30, %v2064_v30  ;;  %v2076_v43 = vmul.f32 %v2068_v31, %v2068_v31  ;;  %v2065_v44 = vsub.f32 %v2832_v5, %v2846_v36  ;;  %v2069_v45 = vsub.f32 %v2836_v23, %v2846_v36 }
 0x305   :  { %v2131_v22 = vrot.slane %v2123_v18, %v2130_v19  ;;  %v2158_v31 = vsub.s32 1, %v2129_v14 }
 0x306   :  { %v2092_v47 = vadd.f32 %v2076_v43, %v2072_v42  ;;  %v2073_v48 = vmul.f32 %v2065_v44, %v2065_v44  ;;  %v2077_v49 = vmul.f32 %v2069_v45, %v2069_v45  ;;  %v2166_v42 = vsub.s32 3, %v2129_v14 }
 0x308   :  { %v2093_v51 = vrot.slane %v2092_v47, 4  ;;  %v2099_v52 = vadd.f32 %v2077_v49, %v2073_v48 }
 0x30a   :  { %v2094_v54 = vadd.f32 %v2093_v51, %v2092_v47  ;;  %v2100_v55 = vrot.slane %v2099_v52, 4 }
 0x30c   :  { %v2095_v57 = vrot.slane %v2094_v54, 2  ;;  %v2101_v58 = vadd.f32 %v2100_v55, %v2099_v52 }
 0x30e   :  { %v2096_v60 = vadd.f32 %v2095_v57, %v2094_v54  ;;  %v2102_v61 = vrot.slane %v2101_v58, 2  ;;  %v2150_v57 = vld [vmem:[#allocation8 + $0x1] ss:$2 sm:$0xf] }
 0x310   :  { %v2097_v63 = vrot.slane %v2096_v60, 1  ;;  %v2103_v0 = vadd.f32 %v2102_v61, %v2101_v58 }
 0x312   :  { %v2098_v4 = vadd.f32 %v2097_v63, %v2096_v60  ;;  %v2104_v35 = vrot.slane %v2103_v0, 1 }
 0x314   :  { %v2108_v6 = vmul.f32 0.0625, %v2098_v4  ;;  %v2105_v7 = vadd.f32 %v2104_v35, %v2103_v0 }
 0x316   :  { %v2113_v27 = vadd.f32 1e-05, %v2108_v6  ;;  %v2109_v34 = vmul.f32 0.0625, %v2105_v7 }
 0x318   :  { %v2114_v40 = vadd.f32 1e-05, %v2109_v34  ;;  %2608 = vrsqrt.f32 %v2113_v27 }
 0x31a   :  { %2610 = vrsqrt.f32 %v2114_v40 }
 0x325   :  { %v2609_v17 = vpop.eup %2608 }
 0x327   :  { %v2611_v20 = vpop.eup %2610 }
 0x328   :  { %v2124_v21 = vcombine.low %v2609_v17, %v2611_v20 }
 0x32a   :  { %v2138_v24 = vrot.slane %v2124_v21, %v2130_v19 }
 0x32c   :  { %v2139_v25 = vcombine.low %v2131_v22, %v2138_v24 }
 0x32e   :  { %v2146_v30 = vrot.slane %v2139_v25, %v2130_v19 }
 0x330   :  { %v2148_v43 = vmul.f32 %v2146_v30, %v2110_v28 }
 0x332   :  { %v2155_v44 = vrot.slane %v2148_v43, %v2154_v29  ;;  %v2159_v45 = vrot.slane %v2148_v43, %v2158_v31  ;;  %v2163_v46 = vrot.slane %v2148_v43, %v2162_v37  ;;  %v2167_v47 = vrot.slane %v2148_v43, %v2166_v42 }
 0x334   :  { %v2172_v48 = vmul.f32 %v2155_v44, %v2818_v39  ;;  %v2173_v49 = vmul.f32 %v2159_v45, %v2816_v38  ;;  %v2174_v50 = vmul.f32 %v2163_v46, %v2840_v26  ;;  %v2175_v51 = vmul.f32 %v2167_v47, %v2846_v36 }
 0x335   :  { %v2206_v60 = vmul.f32 %v2155_v44, %v2810_v32  ;;  %v2207_v61 = vmul.f32 %v2159_v45, %v2806_v11  ;;  %v2208_v39 = vmul.f32 %v2163_v46, %v2828_v2  ;;  %v2209_v38 = vmul.f32 %v2167_v47, %v2832_v5 }
 0x336   :  { %v2180_v52 = vcombine.low %v2172_v48, %v2173_v49  ;;  %v2181_v53 = vcombine.low %v2174_v50, %v2175_v51  ;;  %v2210_v0 = vmul.f32 %v2155_v44, %v2808_v12  ;;  %v2211_v1 = vmul.f32 %v2159_v45, %v2804_v10 }
 0x337   :  { %v2212_v4 = vmul.f32 %v2163_v46, %v2830_v3  ;;  %v2213_v11 = vmul.f32 %v2167_v47, %v2836_v23 }
 0x338   :  { %v2188_v54 = vrot.slane %v2180_v52, %v2130_v19  ;;  %v2195_v55 = vrot.slane %v2181_v53, %v2130_v19 }
 0x33a   :  { %v2196_v56 = vcombine.low %v2188_v54, %v2195_v55 }
 0x33c   :  { %v2203_v58 = vrot.slane %v2196_v56, %v2130_v19 }
 0x33e   :  { %v2205_v59 = vsub.f32 %v2150_v57, %v2203_v58 }
 0x340   :  { %v2218_v62 = vrot.slane %v2205_v59, %v2154_v29  ;;  %v2222_v26 = vrot.slane %v2205_v59, %v2158_v31  ;;  %v2226_v63 = vrot.slane %v2205_v59, %v2162_v37  ;;  %v2230_v36 = vrot.slane %v2205_v59, %v2166_v42 }
 0x342   :  { %v2235_v35 = vadd.f32 %v2218_v62, %v2206_v60  ;;  %v2236_v41 = vadd.f32 %v2222_v26, %v2207_v61  ;;  %v2237_v6 = vadd.f32 %v2226_v63, %v2208_v39  ;;  %v2238_v32 = vadd.f32 %v2230_v36, %v2209_v38 }
 0x343   :  { %v2239_v7 = vadd.f32 %v2218_v62, %v2210_v0  ;;  %v2240_v2 = vadd.f32 %v2222_v26, %v2211_v1  ;;  %v2241_v27 = vadd.f32 %v2226_v63, %v2212_v4  ;;  %v2242_v8 = vadd.f32 %v2230_v36, %v2213_v11 }
 0x344   :  { %v2589_v5 = vmul.f32 -1.442695, %v2235_v35  ;;  %v2590_v34 = vmul.f32 -1.442695, %v2236_v41  ;;  %v2591_v40 = vmul.f32 -1.442695, %v2237_v6 }
 0x345   :  { %v2592_v9 = vmul.f32 -1.442695, %v2238_v32  ;;  %v2593_v12 = vmul.f32 -1.442695, %v2239_v7  ;;  %v2594_v10 = vmul.f32 -1.442695, %v2240_v2 }
 0x346   :  { %2612 = vpow2.f32 %v2589_v5  ;;  %v2595_v3 = vmul.f32 -1.442695, %v2241_v27  ;;  %v2596_v33 = vmul.f32 -1.442695, %v2242_v8 }
 0x347   :  { %2614 = vpow2.f32 %v2590_v34 }
 0x348   :  { %2616 = vpow2.f32 %v2591_v40 }
 0x349   :  { %2618 = vpow2.f32 %v2592_v9 }
 0x34a   :  { %2620 = vpow2.f32 %v2593_v12 }
 0x34b   :  { %2622 = vpow2.f32 %v2594_v10 }
 0x34c   :  { %2624 = vpow2.f32 %v2595_v3 }
 0x34d   :  { %2626 = vpow2.f32 %v2596_v33 }
 0x353   :  { %v2613_v23 = vpop.eup %2612 }
 0x354   :  { %v2615_v13 = vpop.eup %2614  ;;  %v2267_v14 = vadd.f32 1.0, %v2613_v23 }
 0x355   :  { %v2617_v15 = vpop.eup %2616  ;;  %v2268_v16 = vadd.f32 1.0, %v2615_v13 }
 0x356   :  { %v2619_v17 = vpop.eup %2618  ;;  %v2269_v18 = vadd.f32 1.0, %v2617_v15  ;;  %2628 = vrcp.f32 %v2267_v14 }
 0x357   :  { %v2621_v19 = vpop.eup %2620  ;;  %v2270_v20 = vadd.f32 1.0, %v2619_v17  ;;  %2630 = vrcp.f32 %v2268_v16 }
 0x358   :  { %v2623_v21 = vpop.eup %2622  ;;  %v2271_v22 = vadd.f32 1.0, %v2621_v19  ;;  %2632 = vrcp.f32 %v2269_v18 }
 0x359   :  { %v2625_v24 = vpop.eup %2624  ;;  %v2272_v25 = vadd.f32 1.0, %v2623_v21  ;;  %2634 = vrcp.f32 %v2270_v20 }
 0x35a   :  { %v2627_v28 = vpop.eup %2626  ;;  %v2273_v29 = vadd.f32 1.0, %v2625_v24  ;;  %2636 = vrcp.f32 %v2271_v22 }
 0x35b   :  { %v2274_v30 = vadd.f32 1.0, %v2627_v28  ;;  %2638 = vrcp.f32 %v2272_v25 }
 0x35c   :  { %2640 = vrcp.f32 %v2273_v29 }
 0x35d   :  { %2642 = vrcp.f32 %v2274_v30 }
 0x363   :  { %v2629_v31 = vpop.eup %2628 }
 0x364   :  { %v2631_v37 = vpop.eup %2630  ;;  %v2291_v42 = vmul.f32 %v2629_v31, %v2235_v35 }
 0x365   :  { %v2633_v43 = vpop.eup %2632  ;;  %v2292_v44 = vmul.f32 %v2631_v37, %v2236_v41 }
 0x366   :  { %v2635_v45 = vpop.eup %2634  ;;  %v2293_v46 = vmul.f32 %v2633_v43, %v2237_v6  ;;  %2299 = vst [vmem:[#allocation9] sm:$0xff] %v2291_v42 }
 0x367   :  { %v2637_v47 = vpop.eup %2636  ;;  %v2294_v48 = vmul.f32 %v2635_v45, %v2238_v32  ;;  %2300 = vst [vmem:[#allocation9 + $0x8] sm:$0xff] %v2292_v44 }
 0x368   :  { %v2639_v49 = vpop.eup %2638  ;;  %v2295_v50 = vmul.f32 %v2637_v47, %v2239_v7  ;;  %2301 = vst [vmem:[#allocation9 + $0x10] sm:$0xff] %v2293_v46 }
 0x369   :  { %v2641_v51 = vpop.eup %2640  ;;  %2302 = vst [vmem:[#allocation9 + $0x18] sm:$0xff] %v2294_v48  ;;  %v2296_v52 = vmul.f32 %v2639_v49, %v2240_v2 }
 0x36a   :  { %v2643_v53 = vpop.eup %2642  ;;  %v2297_v54 = vmul.f32 %v2641_v51, %v2241_v27  ;;  %2303 = vst [vmem:[#allocation9 + $0x20] sm:$0xff] %v2295_v50 }
 0x36b   :  { %v2298_v55 = vmul.f32 %v2643_v53, %v2242_v8  ;;  %2304 = vst [vmem:[#allocation9 + $0x28] sm:$0xff] %v2296_v52 }
 0x36c   :  { %2305 = vst [vmem:[#allocation9 + $0x30] sm:$0xff] %v2297_v54 }
 0x36d   :  { %2306 = vst [vmem:[#allocation9 + $0x38] sm:$0xff] %v2298_v55 }
 0x36e   :  { %2715 = shalt.err (!%p2712_p5)
}
 0x36f   :  { %2318 = dma.vmem_to_hbm [thread:$0]  %s2313_s2, 1024, %s2873_s3, [#allocation5], %s2732_s17, %s2732_s17, %s2733_s18  }
 0x370   :  { %2728 = dma.done.wait [#allocation5], 1024  }
 0x371   :  { %2729 = vsyncadd [#allocation5], 4294966272 }
 0x372   :  { %2322 = vsyncpa [#allocation4], 1 }
 0x373   :  { %2323 = vsyncpa [#allocation7], 1 }
 0x374   :  { %2324 = vsyncpa [#allocation5], 1 }

// kernel: tpu_custom_call.1
= control target key start
LH: loop header
LB: loop body
LE: loop exit
PB: predicated region body
PF: predicated region fallthrough
CT: control target
= control target key end

     0   :  { %8 = vsyncpa [#allocation4], 0  ;;  %s2870_s0 = inlined_call_operand.hbm [shape: bf16[16,1024], index: 0, kind: input, shape index: {}]   ;;  %s2871_s1 = inlined_call_operand.hbm [shape: bf16[512,1024], index: 1, kind: input, shape index: {}]   ;;  %s2872_s2 = inlined_call_operand.hbm [shape: f32[2,512], index: 2, kind: input, shape index: {}]   ;;  %s2873_s3 = inlined_call_operand.hbm [shape: f32[16,512], index: 3, kind: output, shape index: {}]  }
   0x1   :  { %9 = vsyncpa [#allocation7], 0 }
   0x2   :  { %10 = vsyncpa [#allocation5], 0  ;;  %s2730_s12 = smov [#allocation6]   ;;  %s2731_s14 = smov [#allocation3]  }
   0x3   :  { %s28_s13 = sshll.u32 %s2730_s12, 4  ;;  %s16_s15 = sshll.u32 %s2731_s14, 4  ;;  %s29_s13 = int_to_ptr.vmem [resolvable:$true] %s28_s13  ;;  %s17_s15 = int_to_ptr.vmem [resolvable:$true] %s16_s15 }
   0x4   :  { %s2652_s16 = scalar_lea.vmem %s29_s13, 32768  ;;  %p2657_p1 = scmp.lt.s32.totalorder %s29_s13, %s29_s13 }
   0x5   :  { %p2653_p0 = scmp.ne.s32.totalorder %s29_s13, %s2652_s16  ;;  %p2658_p2 = scmp.lt.s32.totalorder %s2652_s16, %s2652_s16 }
   0x7   :  { %p2659_p3 = por %p2658_p2, %p2657_p1 }
   0x9   :  { %p2660_p4 = pnand %p2659_p3, %p2653_p0 }
   0xb   :  { %2663 = shalt.err (!%p2660_p4)
}
   0xc   :  { %s2732_s17 = smov 512   ;;  %s2733_s18 = smov 32  }
   0xd   :  { %34 = dma.hbm_to_vmem [thread:$0]  %s2871_s1, 32768, %s29_s13, [#allocation7], %s2732_s17, %s2732_s17, %s2733_s18  }
   0xe   :  { %s2672_s21 = scalar_lea.vmem %s17_s15, 1024  ;;  %p2677_p6 = scmp.lt.s32.totalorder %s17_s15, %s17_s15 }
   0xf   :  { %p2673_p5 = scmp.ne.s32.totalorder %s17_s15, %s2672_s21  ;;  %p2678_p7 = scmp.lt.s32.totalorder %s2672_s21, %s2672_s21 }
  0x11   :  { %p2679_p8 = por %p2678_p7, %p2677_p6 }
  0x13   :  { %p2680_p9 = pnand %p2679_p8, %p2673_p5 }
  0x15   :  { %2683 = shalt.err (!%p2680_p9)
}
  0x16   :  { %22 = dma.hbm_to_vmem [thread:$0]  %s2870_s0, 1024, %s17_s15, [#allocation4], %s2732_s17, %s2732_s17, %s2733_s18  }
  0x17   :  { %s2734_s24 = smov [#allocation8]  }
  0x18   :  { %s41_s25 = sshll.u32 %s2734_s24, 4  ;;  %s42_s25 = int_to_ptr.vmem [resolvable:$true] %s41_s25 }
  0x19   :  { %s2692_s26 = scalar_lea.vmem %s42_s25, 128  ;;  %p2697_p11 = scmp.lt.s32.totalorder %s42_s25, %s42_s25 }
  0x1a   :  { %p2693_p10 = scmp.ne.s32.totalorder %s42_s25, %s2692_s26  ;;  %p2698_p12 = scmp.lt.s32.totalorder %s2692_s26, %s2692_s26 }
  0x1c   :  { %p2699_p13 = por %p2698_p12, %p2697_p11 }
  0x1e   :  { %p2700_p0 = pnand %p2699_p13, %p2693_p10 }
  0x20   :  { %2703 = shalt.err (!%p2700_p0)
}
  0x21   :  { %44 = dma.hbm_to_vmem [thread:$0]  %s2872_s2, 128, %s42_s25, [#allocation7]  }
  0x22   :  { %2724 = dma.done.wait [#allocation4], 1024  }
  0x23   :  { %2725 = vsyncadd [#allocation4], 4294966272 }
  0x24   :  { %2726 = dma.done.wait [#allocation7], 32896  }
  0x25   :  { %2727 = vsyncadd [#allocation7], 4294934400  ;;  %v138_v0 = vld [vmem:[#allocation6 + $0x1c0] sm:$0xff]  ;;  %v139_v2 = vld [vmem:[#allocation6 + $0x1c8] sm:$0xff]  ;;  %s2736_s0 = smov [#allocation9]  }
  0x26   :  { %v142_v1 = vld [vmem:[#allocation6 + $0x1e0] sm:$0xff]  ;;  %v143_v4 = vld [vmem:[#allocation6 + $0x1e8] sm:$0xff]  ;;  %s2312_s2 = sshll.u32 %s2736_s0, 4  ;;  %s2313_s2 = int_to_ptr.vmem [resolvable:$true] %s2312_s2 }
  0x27   :  { %v2390_v3 = vcombine.high %v138_v0, %v142_v1  ;;  %v2389_v5 = vcombine.low %v138_v0, %v142_v1  ;;  %v130_v6 = vld [vmem:[#allocation6 + $0x180] sm:$0xff]  ;;  %v2392_v8 = vcombine.high %v139_v2, %v143_v4  ;;  %v2391_v9 = vcombine.low %v139_v2, %v143_v4  ;;  %v131_v11 = vld [vmem:[#allocation6 + $0x188] sm:$0xff]  ;;  %s2704_s28 = scalar_lea.vmem %s2313_s2, 1024  ;;  %p2709_p2 = scmp.lt.s32.totalorder %s2313_s2, %s2313_s2 }
  0x28   :  { %v134_v7 = vld [vmem:[#allocation6 + $0x1a0] sm:$0xff]  ;;  %v135_v12 = vld [vmem:[#allocation6 + $0x1a8] sm:$0xff]  ;;  %p2705_p1 = scmp.ne.s32.totalorder %s2313_s2, %s2704_s28  ;;  %p2710_p3 = scmp.lt.s32.totalorder %s2704_s28, %s2704_s28 }
  0x29   :  { %v2382_v10 = vcombine.high %v130_v6, %v134_v7  ;;  %1658 = vmatprep.subr.bf16.mxu0 %v2390_v3  ;;  %v2384_v13 = vcombine.high %v131_v11, %v135_v12  ;;  %1701 = vmatprep.subr.bf16.mxu1 %v2392_v8  ;;  %v122_v14 = vld [vmem:[#allocation6 + $0x140] sm:$0xff]  ;;  %v123_v16 = vld [vmem:[#allocation6 + $0x148] sm:$0xff]  ;;  %v2381_v18 = vcombine.low %v130_v6, %v134_v7 }
  0x2a   :  { %1659 = vmatpush1.bf16.xpose.msra.mxu0 %v2389_v5  ;;  %1702 = vmatpush1.bf16.xpose.msra.mxu1 %v2391_v9  ;;  %v126_v15 = vld [vmem:[#allocation6 + $0x160] sm:$0xff]  ;;  %v127_v17 = vld [vmem:[#allocation6 + $0x168] sm:$0xff]  ;;  %v2383_v19 = vcombine.low %v131_v11, %v135_v12  ;;  %p2711_p4 = por %p2710_p3, %p2709_p2 }
  0x2b   :  { %1660 = vmatprep.subr.bf16.mxu0 %v2382_v10  ;;  %1703 = vmatprep.subr.bf16.mxu1 %v2384_v13  ;;  %v2374_v20 = vcombine.high %v122_v14, %v126_v15  ;;  %v2376_v21 = vcombine.high %v123_v16, %v127_v17  ;;  %v114_v22 = vld [vmem:[#allocation6 + $0x100] sm:$0xff]  ;;  %v115_v24 = vld [vmem:[#allocation6 + $0x108] sm:$0xff]  ;;  %v2373_v26 = vcombine.low %v122_v14, %v126_v15 }
  0x2c   :  { %v118_v23 = vld [vmem:[#allocation6 + $0x120] sm:$0xff]  ;;  %v119_v25 = vld [vmem:[#allocation6 + $0x128] sm:$0xff]  ;;  %v2375_v27 = vcombine.low %v123_v16, %v127_v17  ;;  %p2712_p5 = pnand %p2711_p4, %p2705_p1 }
  0x2d   :  { %v2366_v28 = vcombine.high %v114_v22, %v118_v23  ;;  %v2368_v29 = vcombine.high %v115_v24, %v119_v25  ;;  %v106_v30 = vld [vmem:[#allocation6 + $0xc0] sm:$0xff]  ;;  %v75_v36 = vld [vmem:[#allocation3 + $0x8] sm:$0xff]  ;;  %v2365_v42 = vcombine.low %v114_v22, %v118_v23  ;;  %v2367_v43 = vcombine.low %v115_v24, %v119_v25 }
  0x2e   :  { %v74_v31 = vld [vmem:[#allocation3] sm:$0xff]  ;;  %v79_v37 = vld [vmem:[#allocation3 + $0x28] sm:$0xff] }
  0x2f   :  { %v78_v32 = vld [vmem:[#allocation3 + $0x20] sm:$0xff]  ;;  %v107_v38 = vld [vmem:[#allocation6 + $0xc8] sm:$0xff]  ;;  %v2776_v40 = vcombine.low %v75_v36, %v79_v37  ;;  %v2778_v41 = vcombine.high %v75_v36, %v79_v37 }
  0x30   :  { %v110_v33 = vld [vmem:[#allocation6 + $0xe0] sm:$0xff]  ;;  %v2772_v34 = vcombine.low %v74_v31, %v78_v32  ;;  %v2774_v35 = vcombine.high %v74_v31, %v78_v32  ;;  %v111_v39 = vld [vmem:[#allocation6 + $0xe8] sm:$0xff] }
  0x31   :  { %v2358_v44 = vcombine.high %v106_v30, %v110_v33  ;;  %1733 = vmatprep.mubr.bf16.mxu1 %v2778_v41  ;;  %v2360_v45 = vcombine.high %v107_v38, %v111_v39  ;;  %v98_v46 = vld [vmem:[#allocation6 + $0x80] sm:$0xff]  ;;  %v99_v48 = vld [vmem:[#allocation6 + $0x88] sm:$0xff]  ;;  %v2357_v50 = vcombine.low %v106_v30, %v110_v33  ;;  %v2359_v51 = vcombine.low %v107_v38, %v111_v39 }
  0x32   :  { %1661 = vmatpush1.bf16.xpose.msra.mxu0 %v2381_v18  ;;  %1704 = vmatpush1.bf16.xpose.msra.mxu1 %v2383_v19  ;;  %v102_v47 = vld [vmem:[#allocation6 + $0xa0] sm:$0xff]  ;;  %v103_v49 = vld [vmem:[#allocation6 + $0xa8] sm:$0xff] }
  0x33   :  { %1662 = vmatprep.subr.bf16.mxu0 %v2374_v20  ;;  %1705 = vmatprep.subr.bf16.mxu1 %v2376_v21  ;;  %v2350_v52 = vcombine.high %v98_v46, %v102_v47  ;;  %v2352_v53 = vcombine.high %v99_v48, %v103_v49  ;;  %v90_v54 = vld [vmem:[#allocation6 + $0x40] sm:$0xff]  ;;  %v91_v56 = vld [vmem:[#allocation6 + $0x48] sm:$0xff]  ;;  %v2349_v58 = vcombine.low %v98_v46, %v102_v47 }
  0x34   :  { %1690 = vmatprep.mubr.bf16.mxu0 %v2774_v35  ;;  %v94_v55 = vld [vmem:[#allocation6 + $0x60] sm:$0xff]  ;;  %v95_v57 = vld [vmem:[#allocation6 + $0x68] sm:$0xff]  ;;  %v2351_v59 = vcombine.low %v99_v48, %v103_v49 }
  0x35   :  { %v2342_v60 = vcombine.high %v90_v54, %v94_v55  ;;  %v2344_v61 = vcombine.high %v91_v56, %v95_v57  ;;  %v82_v62 = vld [vmem:[#allocation6] sm:$0xff]  ;;  %v83_v0 = vld [vmem:[#allocation6 + $0x8] sm:$0xff]  ;;  %v2341_v2 = vcombine.low %v90_v54, %v94_v55  ;;  %v2343_v3 = vcombine.low %v91_v56, %v95_v57 }
  0x36   :  { %v86_v63 = vld [vmem:[#allocation6 + $0x20] sm:$0xff]  ;;  %v87_v1 = vld [vmem:[#allocation6 + $0x28] sm:$0xff] }
  0x37   :  { %v2334_v4 = vcombine.high %v82_v62, %v86_v63  ;;  %v2336_v5 = vcombine.high %v83_v0, %v87_v1  ;;  %v202_v6 = vld [vmem:[#allocation6 + $0x3c0] sm:$0xff]  ;;  %v203_v8 = vld [vmem:[#allocation6 + $0x3c8] sm:$0xff]  ;;  %v2333_v10 = vcombine.low %v82_v62, %v86_v63  ;;  %v2335_v11 = vcombine.low %v83_v0, %v87_v1 }
  0x38   :  { %v206_v7 = vld [vmem:[#allocation6 + $0x3e0] sm:$0xff]  ;;  %v207_v9 = vld [vmem:[#allocation6 + $0x3e8] sm:$0xff] }
  0x39   :  { %v2454_v12 = vcombine.high %v202_v6, %v206_v7  ;;  %v2456_v13 = vcombine.high %v203_v8, %v207_v9  ;;  %v194_v14 = vld [vmem:[#allocation6 + $0x380] sm:$0xff]  ;;  %v195_v16 = vld [vmem:[#allocation6 + $0x388] sm:$0xff]  ;;  %v2453_v18 = vcombine.low %v202_v6, %v206_v7  ;;  %v2455_v19 = vcombine.low %v203_v8, %v207_v9 }
  0x3a   :  { %1663 = vmatpush1.bf16.xpose.msra.mxu0 %v2373_v26  ;;  %1706 = vmatpush1.bf16.xpose.msra.mxu1 %v2375_v27  ;;  %v198_v15 = vld [vmem:[#allocation6 + $0x3a0] sm:$0xff]  ;;  %v199_v17 = vld [vmem:[#allocation6 + $0x3a8] sm:$0xff] }
  0x3b   :  { %1664 = vmatprep.subr.bf16.mxu0 %v2366_v28  ;;  %1707 = vmatprep.subr.bf16.mxu1 %v2368_v29  ;;  %v2446_v20 = vcombine.high %v194_v14, %v198_v15  ;;  %v2448_v21 = vcombine.high %v195_v16, %v199_v17  ;;  %v186_v22 = vld [vmem:[#allocation6 + $0x340] sm:$0xff]  ;;  %v187_v24 = vld [vmem:[#allocation6 + $0x348] sm:$0xff]  ;;  %v2445_v26 = vcombine.low %v194_v14, %v198_v15 }
  0x3c   :  { %v190_v23 = vld [vmem:[#allocation6 + $0x360] sm:$0xff]  ;;  %v191_v25 = vld [vmem:[#allocation6 + $0x368] sm:$0xff]  ;;  %v2447_v27 = vcombine.low %v195_v16, %v199_v17 }
  0x3d   :  { %v2438_v28 = vcombine.high %v186_v22, %v190_v23  ;;  %v2440_v29 = vcombine.high %v187_v24, %v191_v25  ;;  %v178_v30 = vld [vmem:[#allocation6 + $0x300] sm:$0xff]  ;;  %v179_v32 = vld [vmem:[#allocation6 + $0x308] sm:$0xff]  ;;  %v2437_v36 = vcombine.low %v186_v22, %v190_v23  ;;  %v2439_v37 = vcombine.low %v187_v24, %v191_v25  ;;  %v136_v22 = vld [vmem:[#allocation6 + $0x1b0] sm:$0xff] }
  0x3e   :  { %v182_v31 = vld [vmem:[#allocation6 + $0x320] sm:$0xff]  ;;  %v183_v33 = vld [vmem:[#allocation6 + $0x328] sm:$0xff]  ;;  %v81_v24 = vld [vmem:[#allocation3 + $0x38] sm:$0xff] }
  0x3f   :  { %v2430_v38 = vcombine.high %v178_v30, %v182_v31  ;;  %v2432_v39 = vcombine.high %v179_v32, %v183_v33  ;;  %v2429_v46 = vcombine.low %v178_v30, %v182_v31  ;;  %v2431_v47 = vcombine.low %v179_v32, %v183_v33  ;;  %v133_v25 = vld [vmem:[#allocation6 + $0x198] sm:$0xff] }
  0x42   :  { %1665 = vmatpush1.bf16.xpose.msra.mxu0 %v2365_v42  ;;  %1708 = vmatpush1.bf16.xpose.msra.mxu1 %v2367_v43  ;;  %v170_v42 = vld [vmem:[#allocation6 + $0x2c0] sm:$0xff] }
  0x43   :  { %1666 = vmatprep.subr.bf16.mxu0 %v2358_v44  ;;  %1709 = vmatprep.subr.bf16.mxu1 %v2360_v45  ;;  %v174_v43 = vld [vmem:[#allocation6 + $0x2e0] sm:$0xff]  ;;  %v171_v44 = vld [vmem:[#allocation6 + $0x2c8] sm:$0xff] }
  0x44   :  { %v175_v45 = vld [vmem:[#allocation6 + $0x2e8] sm:$0xff]  ;;  %v2422_v48 = vcombine.high %v170_v42, %v174_v43  ;;  %v2421_v54 = vcombine.low %v170_v42, %v174_v43 }
  0x45   :  { %v2424_v49 = vcombine.high %v171_v44, %v175_v45  ;;  %v2423_v55 = vcombine.low %v171_v44, %v175_v45 }
  0x4a   :  { %1667 = vmatpush1.bf16.xpose.msra.mxu0 %v2357_v50  ;;  %1710 = vmatpush1.bf16.xpose.msra.mxu1 %v2359_v51  ;;  %v162_v50 = vld [vmem:[#allocation6 + $0x280] sm:$0xff] }
  0x4b   :  { %1668 = vmatprep.subr.bf16.mxu0 %v2350_v52  ;;  %1711 = vmatprep.subr.bf16.mxu1 %v2352_v53  ;;  %v166_v51 = vld [vmem:[#allocation6 + $0x2a0] sm:$0xff]  ;;  %v163_v52 = vld [vmem:[#allocation6 + $0x288] sm:$0xff] }
  0x4c   :  { %v167_v53 = vld [vmem:[#allocation6 + $0x2a8] sm:$0xff]  ;;  %v2414_v56 = vcombine.high %v162_v50, %v166_v51  ;;  %v2413_v62 = vcombine.low %v162_v50, %v166_v51 }
  0x4d   :  { %v2416_v57 = vcombine.high %v163_v52, %v167_v53  ;;  %v2415_v63 = vcombine.low %v163_v52, %v167_v53 }
  0x52   :  { %1669 = vmatpush1.bf16.xpose.msra.mxu0 %v2349_v58  ;;  %1712 = vmatpush1.bf16.xpose.msra.mxu1 %v2351_v59  ;;  %v154_v58 = vld [vmem:[#allocation6 + $0x240] sm:$0xff] }
  0x53   :  { %1670 = vmatprep.subr.bf16.mxu0 %v2342_v60  ;;  %1713 = vmatprep.subr.bf16.mxu1 %v2344_v61  ;;  %v158_v59 = vld [vmem:[#allocation6 + $0x260] sm:$0xff]  ;;  %v155_v60 = vld [vmem:[#allocation6 + $0x248] sm:$0xff] }
  0x54   :  { %v159_v61 = vld [vmem:[#allocation6 + $0x268] sm:$0xff]  ;;  %v2406_v0 = vcombine.high %v154_v58, %v158_v59  ;;  %v2405_v6 = vcombine.low %v154_v58, %v158_v59 }
  0x55   :  { %v2408_v1 = vcombine.high %v155_v60, %v159_v61  ;;  %v2407_v7 = vcombine.low %v155_v60, %v159_v61 }
  0x5a   :  { %1671 = vmatpush1.bf16.xpose.msra.mxu0 %v2341_v2  ;;  %1714 = vmatpush1.bf16.xpose.msra.mxu1 %v2343_v3  ;;  %v146_v2 = vld [vmem:[#allocation6 + $0x200] sm:$0xff] }
  0x5b   :  { %1672 = vmatprep.subr.bf16.mxu0 %v2334_v4  ;;  %1715 = vmatprep.subr.bf16.mxu1 %v2336_v5  ;;  %v150_v3 = vld [vmem:[#allocation6 + $0x220] sm:$0xff]  ;;  %v147_v4 = vld [vmem:[#allocation6 + $0x208] sm:$0xff] }
  0x5c   :  { %v151_v5 = vld [vmem:[#allocation6 + $0x228] sm:$0xff]  ;;  %v2398_v8 = vcombine.high %v146_v2, %v150_v3  ;;  %v2397_v14 = vcombine.low %v146_v2, %v150_v3 }
  0x5d   :  { %v2400_v9 = vcombine.high %v147_v4, %v151_v5  ;;  %v2399_v15 = vcombine.low %v147_v4, %v151_v5 }
  0x62   :  { %1673 = vmatpush1.bf16.xpose.msra.mxu0 %v2333_v10  ;;  %1716 = vmatpush1.bf16.xpose.msra.mxu1 %v2335_v11  ;;  %v140_v10 = vld [vmem:[#allocation6 + $0x1d0] sm:$0xff] }
  0x63   :  { %1674 = vmatprep.subr.bf16.mxu0 %v2454_v12  ;;  %1717 = vmatprep.subr.bf16.mxu1 %v2456_v13  ;;  %v144_v11 = vld [vmem:[#allocation6 + $0x1f0] sm:$0xff]  ;;  %v141_v12 = vld [vmem:[#allocation6 + $0x1d8] sm:$0xff] }
  0x64   :  { %v145_v13 = vld [vmem:[#allocation6 + $0x1f8] sm:$0xff]  ;;  %v2394_v16 = vcombine.high %v140_v10, %v144_v11 }
  0x65   :  { %v2396_v17 = vcombine.high %v141_v12, %v145_v13 }
  0x6a   :  { %1675 = vmatpush2.bf16.xpose.msra.mxu0 %v2453_v18  ;;  %1718 = vmatpush2.bf16.xpose.msra.mxu1 %v2455_v19  ;;  %v76_v18 = vld [vmem:[#allocation3 + $0x10] sm:$0xff] }
  0x6b   :  { %1676 = vmatprep.subr.bf16.mxu0 %v2446_v20  ;;  %1719 = vmatprep.subr.bf16.mxu1 %v2448_v21  ;;  %v80_v19 = vld [vmem:[#allocation3 + $0x30] sm:$0xff]  ;;  %v77_v20 = vld [vmem:[#allocation3 + $0x18] sm:$0xff] }
  0x6c   :  { %v132_v21 = vld [vmem:[#allocation6 + $0x190] sm:$0xff]  ;;  %v2782_v23 = vcombine.low %v76_v18, %v80_v19  ;;  %v2786_v32 = vcombine.high %v76_v18, %v80_v19  ;;  %v2789_v33 = vcombine.high %v77_v20, %v81_v24 }
  0x6d   :  { %v2386_v30 = vcombine.high %v132_v21, %v136_v22  ;;  %v2385_v42 = vcombine.low %v132_v21, %v136_v22  ;;  %v204_v22 = vld [vmem:[#allocation6 + $0x3d0] sm:$0xff] }
  0x72   :  { %1677 = vmatpush2.bf16.xpose.msra.mxu0 %v2445_v26  ;;  %1720 = vmatpush2.bf16.xpose.msra.mxu1 %v2447_v27  ;;  %v137_v26 = vld [vmem:[#allocation6 + $0x1b8] sm:$0xff]  ;;  %v2784_v27 = vcombine.low %v77_v20, %v81_v24  ;;  %v208_v24 = vld [vmem:[#allocation6 + $0x3f0] sm:$0xff] }
  0x73   :  { %1678 = vmatprep.subr.bf16.mxu0 %v2438_v28  ;;  %1721 = vmatprep.subr.bf16.mxu1 %v2440_v29  ;;  %v2393_v28 = vcombine.low %v140_v10, %v144_v11  ;;  %v2395_v29 = vcombine.low %v141_v12, %v145_v13  ;;  %v2388_v31 = vcombine.high %v133_v25, %v137_v26 }
  0x74   :  { %v2387_v43 = vcombine.low %v133_v25, %v137_v26  ;;  %v205_v25 = vld [vmem:[#allocation6 + $0x3d8] sm:$0xff] }
  0x75   :  { %v209_v26 = vld [vmem:[#allocation6 + $0x3f8] sm:$0xff] }
  0x7a   :  { %1679 = vmatpush2.bf16.xpose.msra.mxu0 %v2437_v36  ;;  %1722 = vmatpush2.bf16.xpose.msra.mxu1 %v2439_v37  ;;  %v124_v36 = vld [vmem:[#allocation6 + $0x150] sm:$0xff] }
  0x7b   :  { %1680 = vmatprep.subr.bf16.mxu0 %v2430_v38  ;;  %1723 = vmatprep.subr.bf16.mxu1 %v2432_v39  ;;  %v128_v37 = vld [vmem:[#allocation6 + $0x170] sm:$0xff]  ;;  %v125_v38 = vld [vmem:[#allocation6 + $0x158] sm:$0xff] }
  0x7c   :  { %v129_v39 = vld [vmem:[#allocation6 + $0x178] sm:$0xff]  ;;  %v2378_v44 = vcombine.high %v124_v36, %v128_v37  ;;  %v2377_v50 = vcombine.low %v124_v36, %v128_v37  ;;  %v196_v36 = vld [vmem:[#allocation6 + $0x390] sm:$0xff] }
  0x7d   :  { %v2380_v45 = vcombine.high %v125_v38, %v129_v39  ;;  %v2379_v51 = vcombine.low %v125_v38, %v129_v39  ;;  %v200_v37 = vld [vmem:[#allocation6 + $0x3b0] sm:$0xff]  ;;  %v197_v38 = vld [vmem:[#allocation6 + $0x398] sm:$0xff] }
  0x7e   :  { %v201_v39 = vld [vmem:[#allocation6 + $0x3b8] sm:$0xff] }
  0x82   :  { %1681 = vmatpush2.bf16.xpose.msra.mxu0 %v2429_v46  ;;  %1724 = vmatpush2.bf16.xpose.msra.mxu1 %v2431_v47  ;;  %v116_v46 = vld [vmem:[#allocation6 + $0x110] sm:$0xff] }
  0x83   :  { %1682 = vmatprep.subr.bf16.mxu0 %v2422_v48  ;;  %1725 = vmatprep.subr.bf16.mxu1 %v2424_v49  ;;  %v120_v47 = vld [vmem:[#allocation6 + $0x130] sm:$0xff]  ;;  %v117_v48 = vld [vmem:[#allocation6 + $0x118] sm:$0xff] }
  0x84   :  { %v121_v49 = vld [vmem:[#allocation6 + $0x138] sm:$0xff]  ;;  %v2370_v52 = vcombine.high %v116_v46, %v120_v47  ;;  %v2369_v58 = vcombine.low %v116_v46, %v120_v47  ;;  %v188_v46 = vld [vmem:[#allocation6 + $0x350] sm:$0xff] }
  0x85   :  { %v2372_v53 = vcombine.high %v117_v48, %v121_v49  ;;  %v2371_v59 = vcombine.low %v117_v48, %v121_v49  ;;  %v192_v47 = vld [vmem:[#allocation6 + $0x370] sm:$0xff]  ;;  %v189_v48 = vld [vmem:[#allocation6 + $0x358] sm:$0xff] }
  0x86   :  { %v193_v49 = vld [vmem:[#allocation6 + $0x378] sm:$0xff] }
  0x8a   :  { %1683 = vmatpush2.bf16.xpose.msra.mxu0 %v2421_v54  ;;  %1726 = vmatpush2.bf16.xpose.msra.mxu1 %v2423_v55  ;;  %v108_v54 = vld [vmem:[#allocation6 + $0xd0] sm:$0xff] }
  0x8b   :  { %1684 = vmatprep.subr.bf16.mxu0 %v2414_v56  ;;  %1727 = vmatprep.subr.bf16.mxu1 %v2416_v57  ;;  %v112_v55 = vld [vmem:[#allocation6 + $0xf0] sm:$0xff]  ;;  %v109_v56 = vld [vmem:[#allocation6 + $0xd8] sm:$0xff] }
  0x8c   :  { %v113_v57 = vld [vmem:[#allocation6 + $0xf8] sm:$0xff]  ;;  %v2362_v60 = vcombine.high %v108_v54, %v112_v55  ;;  %v2361_v2 = vcombine.low %v108_v54, %v112_v55  ;;  %v180_v54 = vld [vmem:[#allocation6 + $0x310] sm:$0xff] }
  0x8d   :  { %v2364_v61 = vcombine.high %v109_v56, %v113_v57  ;;  %v2363_v3 = vcombine.low %v109_v56, %v113_v57  ;;  %v184_v55 = vld [vmem:[#allocation6 + $0x330] sm:$0xff]  ;;  %v181_v56 = vld [vmem:[#allocation6 + $0x318] sm:$0xff] }
  0x8e   :  { %v185_v57 = vld [vmem:[#allocation6 + $0x338] sm:$0xff] }
  0x92   :  { %1685 = vmatpush2.bf16.xpose.msra.mxu0 %v2413_v62  ;;  %1728 = vmatpush2.bf16.xpose.msra.mxu1 %v2415_v63  ;;  %v100_v62 = vld [vmem:[#allocation6 + $0x90] sm:$0xff] }
  0x93   :  { %1686 = vmatprep.subr.bf16.mxu0 %v2406_v0  ;;  %1729 = vmatprep.subr.bf16.mxu1 %v2408_v1  ;;  %v104_v63 = vld [vmem:[#allocation6 + $0xb0] sm:$0xff]  ;;  %v101_v0 = vld [vmem:[#allocation6 + $0x98] sm:$0xff] }
  0x94   :  { %v105_v1 = vld [vmem:[#allocation6 + $0xb8] sm:$0xff]  ;;  %v2354_v4 = vcombine.high %v100_v62, %v104_v63  ;;  %v2353_v10 = vcombine.low %v100_v62, %v104_v63  ;;  %v172_v62 = vld [vmem:[#allocation6 + $0x2d0] sm:$0xff] }
  0x95   :  { %v2356_v5 = vcombine.high %v101_v0, %v105_v1  ;;  %v2355_v11 = vcombine.low %v101_v0, %v105_v1  ;;  %v176_v63 = vld [vmem:[#allocation6 + $0x2f0] sm:$0xff]  ;;  %v173_v0 = vld [vmem:[#allocation6 + $0x2d8] sm:$0xff] }
  0x96   :  { %v177_v1 = vld [vmem:[#allocation6 + $0x2f8] sm:$0xff] }
  0x9a   :  { %1687 = vmatpush2.bf16.xpose.msra.mxu0 %v2405_v6  ;;  %1730 = vmatpush2.bf16.xpose.msra.mxu1 %v2407_v7  ;;  %v92_v6 = vld [vmem:[#allocation6 + $0x50] sm:$0xff] }
  0x9b   :  { %1688 = vmatprep.subr.bf16.mxu0 %v2398_v8  ;;  %1731 = vmatprep.subr.bf16.mxu1 %v2400_v9  ;;  %v96_v7 = vld [vmem:[#allocation6 + $0x70] sm:$0xff]  ;;  %v93_v8 = vld [vmem:[#allocation6 + $0x58] sm:$0xff] }
  0x9c   :  { %v97_v9 = vld [vmem:[#allocation6 + $0x78] sm:$0xff]  ;;  %v2346_v12 = vcombine.high %v92_v6, %v96_v7  ;;  %v2345_v18 = vcombine.low %v92_v6, %v96_v7  ;;  %v164_v6 = vld [vmem:[#allocation6 + $0x290] sm:$0xff] }
  0x9d   :  { %v2348_v13 = vcombine.high %v93_v8, %v97_v9  ;;  %v2347_v19 = vcombine.low %v93_v8, %v97_v9  ;;  %v168_v7 = vld [vmem:[#allocation6 + $0x2b0] sm:$0xff]  ;;  %v165_v8 = vld [vmem:[#allocation6 + $0x298] sm:$0xff] }
  0x9e   :  { %v169_v9 = vld [vmem:[#allocation6 + $0x2b8] sm:$0xff] }
  0xa2   :  { %1689 = vmatpush2.bf16.xpose.msra.mxu0 %v2397_v14  ;;  %1732 = vmatpush2.bf16.xpose.msra.mxu1 %v2399_v15  ;;  %v84_v14 = vld [vmem:[#allocation6 + $0x10] sm:$0xff] }
  0xa3   :  { %1744 = vmatprep.subr.bf16.mxu0 %v2394_v16  ;;  %1787 = vmatprep.subr.bf16.mxu1 %v2396_v17  ;;  %v88_v15 = vld [vmem:[#allocation6 + $0x30] sm:$0xff]  ;;  %v85_v16 = vld [vmem:[#allocation6 + $0x18] sm:$0xff] }
  0xa4   :  { %v89_v17 = vld [vmem:[#allocation6 + $0x38] sm:$0xff]  ;;  %v2338_v20 = vcombine.high %v84_v14, %v88_v15 }
  0xa5   :  { %v2340_v21 = vcombine.high %v85_v16, %v89_v17 }
  0xa9   :  { %1691 = vmatmul.mubr.bf16.vlgmr.msra.gmra.mxu0 %v2772_v34  ;;  %1734 = vmatmul.mubr.bf16.vlgmr.msra.gmra.mxu1 %v2776_v40 }
  0xaa   :  { %1745 = vmatpush1.bf16.xpose.msra.mxu0 %v2393_v28  ;;  %1788 = vmatpush1.bf16.xpose.msra.mxu1 %v2395_v29  ;;  %v2337_v28 = vcombine.low %v84_v14, %v88_v15  ;;  %v2339_v29 = vcombine.low %v85_v16, %v89_v17  ;;  %v156_v14 = vld [vmem:[#allocation6 + $0x250] sm:$0xff]  ;;  %v157_v16 = vld [vmem:[#allocation6 + $0x258] sm:$0xff] }
  0xab   :  { %1746 = vmatprep.subr.bf16.mxu0 %v2386_v30  ;;  %1789 = vmatprep.subr.bf16.mxu1 %v2388_v31  ;;  %v2458_v30 = vcombine.high %v204_v22, %v208_v24  ;;  %v2460_v31 = vcombine.high %v205_v25, %v209_v26  ;;  %v160_v15 = vld [vmem:[#allocation6 + $0x270] sm:$0xff]  ;;  %v161_v17 = vld [vmem:[#allocation6 + $0x278] sm:$0xff] }
  0xac   :  { %1776 = vmatprep.mubr.bf16.mxu0 %v2786_v32  ;;  %1819 = vmatprep.mubr.bf16.mxu1 %v2789_v33 }
  0xb2   :  { %1747 = vmatpush1.bf16.xpose.msra.mxu0 %v2385_v42  ;;  %1790 = vmatpush1.bf16.xpose.msra.mxu1 %v2387_v43  ;;  %v2457_v42 = vcombine.low %v204_v22, %v208_v24  ;;  %v2459_v43 = vcombine.low %v205_v25, %v209_v26  ;;  %v148_v22 = vld [vmem:[#allocation6 + $0x210] sm:$0xff]  ;;  %v149_v25 = vld [vmem:[#allocation6 + $0x218] sm:$0xff] }
  0xb3   :  { %1748 = vmatprep.subr.bf16.mxu0 %v2378_v44  ;;  %1791 = vmatprep.subr.bf16.mxu1 %v2380_v45  ;;  %v2450_v44 = vcombine.high %v196_v36, %v200_v37  ;;  %v2452_v45 = vcombine.high %v197_v38, %v201_v39  ;;  %v152_v24 = vld [vmem:[#allocation6 + $0x230] sm:$0xff]  ;;  %v153_v26 = vld [vmem:[#allocation6 + $0x238] sm:$0xff] }
  0xba   :  { %1749 = vmatpush1.bf16.xpose.msra.mxu0 %v2377_v50  ;;  %1792 = vmatpush1.bf16.xpose.msra.mxu1 %v2379_v51  ;;  %v2449_v50 = vcombine.low %v196_v36, %v200_v37  ;;  %v2451_v51 = vcombine.low %v197_v38, %v201_v39  ;;  %v266_v36 = vld [vmem:[#allocation6 + $0x5c0] sm:$0xff]  ;;  %v267_v38 = vld [vmem:[#allocation6 + $0x5c8] sm:$0xff] }
  0xbb   :  { %1750 = vmatprep.subr.bf16.mxu0 %v2370_v52  ;;  %1793 = vmatprep.subr.bf16.mxu1 %v2372_v53  ;;  %v2442_v52 = vcombine.high %v188_v46, %v192_v47  ;;  %v2444_v53 = vcombine.high %v189_v48, %v193_v49  ;;  %v270_v37 = vld [vmem:[#allocation6 + $0x5e0] sm:$0xff]  ;;  %v271_v39 = vld [vmem:[#allocation6 + $0x5e8] sm:$0xff] }
  0xc2   :  { %1751 = vmatpush1.bf16.xpose.msra.mxu0 %v2369_v58  ;;  %1794 = vmatpush1.bf16.xpose.msra.mxu1 %v2371_v59  ;;  %v2441_v58 = vcombine.low %v188_v46, %v192_v47  ;;  %v2443_v59 = vcombine.low %v189_v48, %v193_v49  ;;  %v258_v46 = vld [vmem:[#allocation6 + $0x580] sm:$0xff]  ;;  %v259_v48 = vld [vmem:[#allocation6 + $0x588] sm:$0xff] }
  0xc3   :  { %1752 = vmatprep.subr.bf16.mxu0 %v2362_v60  ;;  %1795 = vmatprep.subr.bf16.mxu1 %v2364_v61  ;;  %v2434_v60 = vcombine.high %v180_v54, %v184_v55  ;;  %v2436_v61 = vcombine.high %v181_v56, %v185_v57  ;;  %v262_v47 = vld [vmem:[#allocation6 + $0x5a0] sm:$0xff]  ;;  %v263_v49 = vld [vmem:[#allocation6 + $0x5a8] sm:$0xff] }
  0xca   :  { %1753 = vmatpush1.bf16.xpose.msra.mxu0 %v2361_v2  ;;  %1796 = vmatpush1.bf16.xpose.msra.mxu1 %v2363_v3  ;;  %v2433_v2 = vcombine.low %v180_v54, %v184_v55  ;;  %v2435_v3 = vcombine.low %v181_v56, %v185_v57  ;;  %v250_v54 = vld [vmem:[#allocation6 + $0x540] sm:$0xff]  ;;  %v251_v56 = vld [vmem:[#allocation6 + $0x548] sm:$0xff] }
  0xcb   :  { %1754 = vmatprep.subr.bf16.mxu0 %v2354_v4  ;;  %1797 = vmatprep.subr.bf16.mxu1 %v2356_v5  ;;  %v2426_v4 = vcombine.high %v172_v62, %v176_v63  ;;  %v2428_v5 = vcombine.high %v173_v0, %v177_v1  ;;  %v254_v55 = vld [vmem:[#allocation6 + $0x560] sm:$0xff]  ;;  %v255_v57 = vld [vmem:[#allocation6 + $0x568] sm:$0xff] }
  0xd2   :  { %1755 = vmatpush1.bf16.xpose.msra.mxu0 %v2353_v10  ;;  %1798 = vmatpush1.bf16.xpose.msra.mxu1 %v2355_v11  ;;  %v2425_v10 = vcombine.low %v172_v62, %v176_v63  ;;  %v2427_v11 = vcombine.low %v173_v0, %v177_v1  ;;  %v242_v62 = vld [vmem:[#allocation6 + $0x500] sm:$0xff]  ;;  %v243_v0 = vld [vmem:[#allocation6 + $0x508] sm:$0xff] }
  0xd3   :  { %1756 = vmatprep.subr.bf16.mxu0 %v2346_v12  ;;  %1799 = vmatprep.subr.bf16.mxu1 %v2348_v13  ;;  %v2418_v12 = vcombine.high %v164_v6, %v168_v7  ;;  %v2420_v13 = vcombine.high %v165_v8, %v169_v9  ;;  %v246_v63 = vld [vmem:[#allocation6 + $0x520] sm:$0xff]  ;;  %v247_v1 = vld [vmem:[#allocation6 + $0x528] sm:$0xff] }
  0xda   :  { %1757 = vmatpush1.bf16.xpose.msra.mxu0 %v2345_v18  ;;  %1800 = vmatpush1.bf16.xpose.msra.mxu1 %v2347_v19  ;;  %v2417_v18 = vcombine.low %v164_v6, %v168_v7  ;;  %v2419_v19 = vcombine.low %v165_v8, %v169_v9  ;;  %v235_v6 = vld [vmem:[#allocation6 + $0x4c8] sm:$0xff]  ;;  %v2493_v8 = vcombine.low %v242_v62, %v246_v63 }
  0xdb   :  { %1758 = vmatprep.subr.bf16.mxu0 %v2338_v20  ;;  %1801 = vmatprep.subr.bf16.mxu1 %v2340_v21  ;;  %v2410_v20 = vcombine.high %v156_v14, %v160_v15  ;;  %v2412_v21 = vcombine.high %v157_v16, %v161_v17  ;;  %v239_v7 = vld [vmem:[#allocation6 + $0x4e8] sm:$0xff]  ;;  %v2495_v9 = vcombine.low %v243_v0, %v247_v1 }
  0xe2   :  { %1759 = vmatpush1.bf16.xpose.msra.mxu0 %v2337_v28  ;;  %1802 = vmatpush1.bf16.xpose.msra.mxu1 %v2339_v29  ;;  %v2409_v28 = vcombine.low %v156_v14, %v160_v15  ;;  %v2411_v29 = vcombine.low %v157_v16, %v161_v17  ;;  %v227_v14 = vld [vmem:[#allocation6 + $0x488] sm:$0xff]  ;;  %v2487_v17 = vcombine.low %v235_v6, %v239_v7 }
  0xe3   :  { %1760 = vmatprep.subr.bf16.mxu0 %v2458_v30  ;;  %1803 = vmatprep.subr.bf16.mxu1 %v2460_v31  ;;  %v2402_v30 = vcombine.high %v148_v22, %v152_v24  ;;  %v2404_v31 = vcombine.high %v149_v25, %v153_v26  ;;  %v231_v15 = vld [vmem:[#allocation6 + $0x4a8] sm:$0xff] }
  0xea   :  { %1761 = vmatpush2.bf16.xpose.msra.mxu0 %v2457_v42  ;;  %1804 = vmatpush2.bf16.xpose.msra.mxu1 %v2459_v43  ;;  %v2401_v42 = vcombine.low %v148_v22, %v152_v24  ;;  %v2403_v43 = vcombine.low %v149_v25, %v153_v26  ;;  %v219_v22 = vld [vmem:[#allocation6 + $0x448] sm:$0xff]  ;;  %v2479_v26 = vcombine.low %v227_v14, %v231_v15 }
  0xeb   :  { %1762 = vmatprep.subr.bf16.mxu0 %v2450_v44  ;;  %1805 = vmatprep.subr.bf16.mxu1 %v2452_v45  ;;  %v2518_v44 = vcombine.high %v266_v36, %v270_v37  ;;  %v2520_v45 = vcombine.high %v267_v38, %v271_v39  ;;  %v223_v24 = vld [vmem:[#allocation6 + $0x468] sm:$0xff] }
  0xf2   :  { %1763 = vmatpush2.bf16.xpose.msra.mxu0 %v2449_v50  ;;  %1806 = vmatpush2.bf16.xpose.msra.mxu1 %v2451_v51  ;;  %v2517_v50 = vcombine.low %v266_v36, %v270_v37  ;;  %v2519_v51 = vcombine.low %v267_v38, %v271_v39  ;;  %v211_v36 = vld [vmem:[#allocation6 + $0x408] sm:$0xff]  ;;  %v2471_v39 = vcombine.low %v219_v22, %v223_v24 }
  0xf3   :  { %1764 = vmatprep.subr.bf16.mxu0 %v2442_v52  ;;  %1807 = vmatprep.subr.bf16.mxu1 %v2444_v53  ;;  %v2510_v52 = vcombine.high %v258_v46, %v262_v47  ;;  %v2512_v53 = vcombine.high %v259_v48, %v263_v49  ;;  %v215_v37 = vld [vmem:[#allocation6 + $0x428] sm:$0xff] }
  0xfa   :  { %1765 = vmatpush2.bf16.xpose.msra.mxu0 %v2441_v58  ;;  %1808 = vmatpush2.bf16.xpose.msra.mxu1 %v2443_v59  ;;  %v2509_v58 = vcombine.low %v258_v46, %v262_v47  ;;  %v2511_v59 = vcombine.low %v259_v48, %v263_v49  ;;  %v331_v46 = vld [vmem:[#allocation6 + $0x7c8] sm:$0xff]  ;;  %v2463_v49 = vcombine.low %v211_v36, %v215_v37 }
  0xfb   :  { %1766 = vmatprep.subr.bf16.mxu0 %v2434_v60  ;;  %1809 = vmatprep.subr.bf16.mxu1 %v2436_v61  ;;  %v2502_v60 = vcombine.high %v250_v54, %v254_v55  ;;  %v2504_v61 = vcombine.high %v251_v56, %v255_v57  ;;  %v335_v47 = vld [vmem:[#allocation6 + $0x7e8] sm:$0xff] }
 0x102   :  { %1767 = vmatpush2.bf16.xpose.msra.mxu0 %v2433_v2  ;;  %1810 = vmatpush2.bf16.xpose.msra.mxu1 %v2435_v3  ;;  %v2501_v2 = vcombine.low %v250_v54, %v254_v55  ;;  %v2503_v3 = vcombine.low %v251_v56, %v255_v57  ;;  %v323_v54 = vld [vmem:[#allocation6 + $0x788] sm:$0xff]  ;;  %v2583_v57 = vcombine.low %v331_v46, %v335_v47 }
 0x103   :  { %1768 = vmatprep.subr.bf16.mxu0 %v2426_v4  ;;  %1811 = vmatprep.subr.bf16.mxu1 %v2428_v5  ;;  %v2494_v4 = vcombine.high %v242_v62, %v246_v63  ;;  %v238_v5 = vld [vmem:[#allocation6 + $0x4e0] sm:$0xff]  ;;  %v327_v55 = vld [vmem:[#allocation6 + $0x7a8] sm:$0xff] }
 0x104   :  { %v315_v62 = vld [vmem:[#allocation6 + $0x748] sm:$0xff] }
 0x105   :  { %v319_v63 = vld [vmem:[#allocation6 + $0x768] sm:$0xff] }
 0x10a   :  { %1769 = vmatpush2.bf16.xpose.msra.mxu0 %v2425_v10  ;;  %1812 = vmatpush2.bf16.xpose.msra.mxu1 %v2427_v11  ;;  %v2488_v11 = vcombine.high %v235_v6, %v239_v7  ;;  %v2567_v7 = vcombine.low %v315_v62, %v319_v63 }
 0x10b   :  { %1770 = vmatprep.subr.bf16.mxu0 %v2418_v12  ;;  %1813 = vmatprep.subr.bf16.mxu1 %v2420_v13  ;;  %v226_v12 = vld [vmem:[#allocation6 + $0x480] sm:$0xff] }
 0x10c   :  { %v230_v13 = vld [vmem:[#allocation6 + $0x4a0] sm:$0xff] }
 0x10d   :  { %v2477_v25 = vcombine.low %v226_v12, %v230_v13 }
 0x112   :  { %1771 = vmatpush2.bf16.xpose.msra.mxu0 %v2417_v18  ;;  %1814 = vmatpush2.bf16.xpose.msra.mxu1 %v2419_v19  ;;  %v2478_v18 = vcombine.high %v226_v12, %v230_v13  ;;  %v2480_v19 = vcombine.high %v227_v14, %v231_v15  ;;  %v299_v12 = vld [vmem:[#allocation6 + $0x6c8] sm:$0xff] }
 0x113   :  { %1772 = vmatprep.subr.bf16.mxu0 %v2410_v20  ;;  %1815 = vmatprep.subr.bf16.mxu1 %v2412_v21  ;;  %v218_v20 = vld [vmem:[#allocation6 + $0x440] sm:$0xff]  ;;  %v303_v13 = vld [vmem:[#allocation6 + $0x6e8] sm:$0xff] }
 0x114   :  { %v222_v21 = vld [vmem:[#allocation6 + $0x460] sm:$0xff] }
 0x115   :  { %v2469_v38 = vcombine.low %v218_v20, %v222_v21 }
 0x11a   :  { %1773 = vmatpush2.bf16.xpose.msra.mxu0 %v2409_v28  ;;  %1816 = vmatpush2.bf16.xpose.msra.mxu1 %v2411_v29  ;;  %v2470_v28 = vcombine.high %v218_v20, %v222_v21  ;;  %v2472_v29 = vcombine.high %v219_v22, %v223_v24  ;;  %v291_v20 = vld [vmem:[#allocation6 + $0x688] sm:$0xff]  ;;  %v2551_v24 = vcombine.low %v299_v12, %v303_v13 }
 0x11b   :  { %1774 = vmatprep.subr.bf16.mxu0 %v2402_v30  ;;  %1817 = vmatprep.subr.bf16.mxu1 %v2404_v31  ;;  %v210_v30 = vld [vmem:[#allocation6 + $0x400] sm:$0xff]  ;;  %v295_v21 = vld [vmem:[#allocation6 + $0x6a8] sm:$0xff] }
 0x11c   :  { %v214_v31 = vld [vmem:[#allocation6 + $0x420] sm:$0xff] }
 0x11d   :  { %v2461_v48 = vcombine.low %v210_v30, %v214_v31 }
 0x122   :  { %1775 = vmatpush2.bf16.xpose.msra.mxu0 %v2401_v42  ;;  %1818 = vmatpush2.bf16.xpose.msra.mxu1 %v2403_v43  ;;  %v2462_v42 = vcombine.high %v210_v30, %v214_v31  ;;  %v2464_v43 = vcombine.high %v211_v36, %v215_v37  ;;  %v283_v30 = vld [vmem:[#allocation6 + $0x648] sm:$0xff]  ;;  %v2543_v37 = vcombine.low %v291_v20, %v295_v21 }
 0x123   :  { %1830 = vmatprep.subr.bf16.mxu0 %v2518_v44  ;;  %1873 = vmatprep.subr.bf16.mxu1 %v2520_v45  ;;  %v330_v44 = vld [vmem:[#allocation6 + $0x7c0] sm:$0xff]  ;;  %v287_v31 = vld [vmem:[#allocation6 + $0x668] sm:$0xff] }
 0x124   :  { %v334_v45 = vld [vmem:[#allocation6 + $0x7e0] sm:$0xff] }
 0x125   :  { %v2581_v56 = vcombine.low %v330_v44, %v334_v45 }
 0x129   :  { %1777 = vmatmul.mubr.bf16.vlgmr.msra.gmra.mxu0 %v2782_v23  ;;  %1820 = vmatmul.mubr.bf16.vlgmr.msra.gmra.mxu1 %v2784_v27 }
 0x12a   :  { %1831 = vmatpush1.bf16.xpose.msra.mxu0 %v2517_v50  ;;  %1874 = vmatpush1.bf16.xpose.msra.mxu1 %v2519_v51  ;;  %v2582_v50 = vcombine.high %v330_v44, %v334_v45  ;;  %v2584_v51 = vcombine.high %v331_v46, %v335_v47  ;;  %v275_v44 = vld [vmem:[#allocation6 + $0x608] sm:$0xff]  ;;  %v2535_v47 = vcombine.low %v283_v30, %v287_v31 }
 0x12b   :  { %1832 = vmatprep.subr.bf16.mxu0 %v2510_v52  ;;  %1875 = vmatprep.subr.bf16.mxu1 %v2512_v53  ;;  %v322_v52 = vld [vmem:[#allocation6 + $0x780] sm:$0xff]  ;;  %v279_v45 = vld [vmem:[#allocation6 + $0x628] sm:$0xff] }
 0x12c   :  { %1862 = vmatprep.mubr.bf16.mxu0 %v2774_v35  ;;  %1905 = vmatprep.mubr.bf16.mxu1 %v2778_v41  ;;  %v2496_v35 = vcombine.high %v243_v0, %v247_v1  ;;  %v234_v41 = vld [vmem:[#allocation6 + $0x4c0] sm:$0xff]  ;;  %v2575_v1 = vcombine.low %v323_v54, %v327_v55 }
 0x12d   :  { %v2486_v10 = vcombine.high %v234_v41, %v238_v5  ;;  %v2485_v16 = vcombine.low %v234_v41, %v238_v5  ;;  %v326_v53 = vld [vmem:[#allocation6 + $0x7a0] sm:$0xff]  ;;  %v307_v41 = vld [vmem:[#allocation6 + $0x708] sm:$0xff] }
 0x12e   :  { %v2573_v0 = vcombine.low %v322_v52, %v326_v53  ;;  %v311_v5 = vld [vmem:[#allocation6 + $0x728] sm:$0xff] }
 0x12f   :  { %v2559_v15 = vcombine.low %v307_v41, %v311_v5 }
 0x132   :  { %1833 = vmatpush1.bf16.xpose.msra.mxu0 %v2509_v58  ;;  %1876 = vmatpush1.bf16.xpose.msra.mxu1 %v2511_v59  ;;  %v2574_v58 = vcombine.high %v322_v52, %v326_v53  ;;  %v2576_v59 = vcombine.high %v323_v54, %v327_v55  ;;  %v269_v52 = vld [vmem:[#allocation6 + $0x5d8] sm:$0xff]  ;;  %v2527_v55 = vcombine.low %v275_v44, %v279_v45 }
 0x133   :  { %1834 = vmatprep.subr.bf16.mxu0 %v2502_v60  ;;  %1877 = vmatprep.subr.bf16.mxu1 %v2504_v61  ;;  %v314_v60 = vld [vmem:[#allocation6 + $0x740] sm:$0xff]  ;;  %v273_v53 = vld [vmem:[#allocation6 + $0x5f8] sm:$0xff] }
 0x134   :  { %v318_v61 = vld [vmem:[#allocation6 + $0x760] sm:$0xff] }
 0x135   :  { %v2565_v6 = vcombine.low %v314_v60, %v318_v61 }
 0x13a   :  { %1835 = vmatpush1.bf16.xpose.msra.mxu0 %v2501_v2  ;;  %1878 = vmatpush1.bf16.xpose.msra.mxu1 %v2503_v3  ;;  %v2566_v2 = vcombine.high %v314_v60, %v318_v61  ;;  %v2568_v3 = vcombine.high %v315_v62, %v319_v63  ;;  %v261_v60 = vld [vmem:[#allocation6 + $0x598] sm:$0xff]  ;;  %v2523_v63 = vcombine.low %v269_v52, %v273_v53 }
 0x13b   :  { %1836 = vmatprep.subr.bf16.mxu0 %v2494_v4  ;;  %1879 = vmatprep.subr.bf16.mxu1 %v2496_v35  ;;  %v306_v4 = vld [vmem:[#allocation6 + $0x700] sm:$0xff]  ;;  %v265_v61 = vld [vmem:[#allocation6 + $0x5b8] sm:$0xff] }
 0x13c   :  { %v310_v35 = vld [vmem:[#allocation6 + $0x720] sm:$0xff] }
 0x13d   :  { %v2557_v14 = vcombine.low %v306_v4, %v310_v35 }
 0x142   :  { %1837 = vmatpush1.bf16.xpose.msra.mxu0 %v2493_v8  ;;  %1880 = vmatpush1.bf16.xpose.msra.mxu1 %v2495_v9  ;;  %v2558_v8 = vcombine.high %v306_v4, %v310_v35  ;;  %v2560_v9 = vcombine.high %v307_v41, %v311_v5  ;;  %v253_v4 = vld [vmem:[#allocation6 + $0x558] sm:$0xff]  ;;  %v2515_v5 = vcombine.low %v261_v60, %v265_v61 }
 0x143   :  { %1838 = vmatprep.subr.bf16.mxu0 %v2486_v10  ;;  %1881 = vmatprep.subr.bf16.mxu1 %v2488_v11  ;;  %v298_v10 = vld [vmem:[#allocation6 + $0x6c0] sm:$0xff]  ;;  %v257_v35 = vld [vmem:[#allocation6 + $0x578] sm:$0xff] }
 0x144   :  { %v302_v11 = vld [vmem:[#allocation6 + $0x6e0] sm:$0xff] }
 0x145   :  { %v2549_v22 = vcombine.low %v298_v10, %v302_v11 }
 0x14a   :  { %1839 = vmatpush1.bf16.xpose.msra.mxu0 %v2485_v16  ;;  %1882 = vmatpush1.bf16.xpose.msra.mxu1 %v2487_v17  ;;  %v2550_v16 = vcombine.high %v298_v10, %v302_v11  ;;  %v2552_v17 = vcombine.high %v299_v12, %v303_v13  ;;  %v2507_v11 = vcombine.low %v253_v4, %v257_v35  ;;  %v240_v13 = vld [vmem:[#allocation6 + $0x4f0] sm:$0xff] }
 0x14b   :  { %1840 = vmatprep.subr.bf16.mxu0 %v2478_v18  ;;  %1883 = vmatprep.subr.bf16.mxu1 %v2480_v19  ;;  %v290_v18 = vld [vmem:[#allocation6 + $0x680] sm:$0xff] }
 0x14c   :  { %v294_v19 = vld [vmem:[#allocation6 + $0x6a0] sm:$0xff] }
 0x14d   :  { %v2541_v36 = vcombine.low %v290_v18, %v294_v19 }
 0x152   :  { %1841 = vmatpush1.bf16.xpose.msra.mxu0 %v2477_v25  ;;  %1884 = vmatpush1.bf16.xpose.msra.mxu1 %v2479_v26  ;;  %v2542_v25 = vcombine.high %v290_v18, %v294_v19  ;;  %v2544_v26 = vcombine.high %v291_v20, %v295_v21  ;;  %v228_v20 = vld [vmem:[#allocation6 + $0x490] sm:$0xff] }
 0x153   :  { %1842 = vmatprep.subr.bf16.mxu0 %v2470_v28  ;;  %1885 = vmatprep.subr.bf16.mxu1 %v2472_v29  ;;  %v282_v28 = vld [vmem:[#allocation6 + $0x640] sm:$0xff]  ;;  %v232_v21 = vld [vmem:[#allocation6 + $0x4b0] sm:$0xff] }
 0x154   :  { %v286_v29 = vld [vmem:[#allocation6 + $0x660] sm:$0xff] }
 0x155   :  { %v2533_v46 = vcombine.low %v282_v28, %v286_v29 }
 0x15a   :  { %1843 = vmatpush1.bf16.xpose.msra.mxu0 %v2469_v38  ;;  %1886 = vmatpush1.bf16.xpose.msra.mxu1 %v2471_v39  ;;  %v2534_v38 = vcombine.high %v282_v28, %v286_v29  ;;  %v2536_v39 = vcombine.high %v283_v30, %v287_v31  ;;  %v2482_v28 = vcombine.high %v228_v20, %v232_v21  ;;  %v220_v30 = vld [vmem:[#allocation6 + $0x450] sm:$0xff] }
 0x15b   :  { %1844 = vmatprep.subr.bf16.mxu0 %v2462_v42  ;;  %1887 = vmatprep.subr.bf16.mxu1 %v2464_v43  ;;  %v274_v42 = vld [vmem:[#allocation6 + $0x600] sm:$0xff]  ;;  %v224_v31 = vld [vmem:[#allocation6 + $0x470] sm:$0xff] }
 0x15c   :  { %v278_v43 = vld [vmem:[#allocation6 + $0x620] sm:$0xff] }
 0x15d   :  { %v2525_v54 = vcombine.low %v274_v42, %v278_v43 }
 0x162   :  { %1845 = vmatpush1.bf16.xpose.msra.mxu0 %v2461_v48  ;;  %1888 = vmatpush1.bf16.xpose.msra.mxu1 %v2463_v49  ;;  %v2526_v48 = vcombine.high %v274_v42, %v278_v43  ;;  %v2528_v49 = vcombine.high %v275_v44, %v279_v45  ;;  %v2474_v42 = vcombine.high %v220_v30, %v224_v31  ;;  %v212_v44 = vld [vmem:[#allocation6 + $0x410] sm:$0xff] }
 0x163   :  { %1846 = vmatprep.subr.bf16.mxu0 %v2582_v50  ;;  %1889 = vmatprep.subr.bf16.mxu1 %v2584_v51  ;;  %v268_v50 = vld [vmem:[#allocation6 + $0x5d0] sm:$0xff] }
 0x164   :  { %v272_v51 = vld [vmem:[#allocation6 + $0x5f0] sm:$0xff] }
 0x165   :  { %v2521_v62 = vcombine.low %v268_v50, %v272_v51  ;;  %v216_v45 = vld [vmem:[#allocation6 + $0x430] sm:$0xff] }
 0x16a   :  { %1847 = vmatpush2.bf16.xpose.msra.mxu0 %v2581_v56  ;;  %1890 = vmatpush2.bf16.xpose.msra.mxu1 %v2583_v57  ;;  %v2522_v56 = vcombine.high %v268_v50, %v272_v51  ;;  %v2524_v57 = vcombine.high %v269_v52, %v273_v53  ;;  %v2466_v50 = vcombine.high %v212_v44, %v216_v45  ;;  %v332_v52 = vld [vmem:[#allocation6 + $0x7d0] sm:$0xff] }
 0x16b   :  { %1848 = vmatprep.subr.bf16.mxu0 %v2574_v58  ;;  %1891 = vmatprep.subr.bf16.mxu1 %v2576_v59  ;;  %v260_v58 = vld [vmem:[#allocation6 + $0x590] sm:$0xff] }
 0x16c   :  { %v264_v59 = vld [vmem:[#allocation6 + $0x5b0] sm:$0xff] }
 0x16d   :  { %v2513_v41 = vcombine.low %v260_v58, %v264_v59  ;;  %v336_v53 = vld [vmem:[#allocation6 + $0x7f0] sm:$0xff] }
 0x172   :  { %1849 = vmatpush2.bf16.xpose.msra.mxu0 %v2573_v0  ;;  %1892 = vmatpush2.bf16.xpose.msra.mxu1 %v2575_v1  ;;  %v2514_v0 = vcombine.high %v260_v58, %v264_v59  ;;  %v2516_v1 = vcombine.high %v261_v60, %v265_v61  ;;  %v2586_v58 = vcombine.high %v332_v52, %v336_v53  ;;  %v324_v60 = vld [vmem:[#allocation6 + $0x790] sm:$0xff] }
 0x173   :  { %1850 = vmatprep.subr.bf16.mxu0 %v2566_v2  ;;  %1893 = vmatprep.subr.bf16.mxu1 %v2568_v3  ;;  %v252_v2 = vld [vmem:[#allocation6 + $0x550] sm:$0xff] }
 0x174   :  { %v256_v3 = vld [vmem:[#allocation6 + $0x570] sm:$0xff] }
 0x175   :  { %v2505_v10 = vcombine.low %v252_v2, %v256_v3  ;;  %v328_v61 = vld [vmem:[#allocation6 + $0x7b0] sm:$0xff] }
 0x17a   :  { %1851 = vmatpush2.bf16.xpose.msra.mxu0 %v2565_v6  ;;  %1894 = vmatpush2.bf16.xpose.msra.mxu1 %v2567_v7  ;;  %v2506_v6 = vcombine.high %v252_v2, %v256_v3  ;;  %v2508_v7 = vcombine.high %v253_v4, %v257_v35  ;;  %v2578_v2 = vcombine.high %v324_v60, %v328_v61  ;;  %v316_v4 = vld [vmem:[#allocation6 + $0x750] sm:$0xff] }
 0x17b   :  { %1852 = vmatprep.subr.bf16.mxu0 %v2558_v8  ;;  %1895 = vmatprep.subr.bf16.mxu1 %v2560_v9  ;;  %v245_v8 = vld [vmem:[#allocation6 + $0x518] sm:$0xff]  ;;  %v320_v35 = vld [vmem:[#allocation6 + $0x770] sm:$0xff] }
 0x17c   :  { %v249_v9 = vld [vmem:[#allocation6 + $0x538] sm:$0xff] }
 0x182   :  { %1853 = vmatpush2.bf16.xpose.msra.mxu0 %v2557_v14  ;;  %1896 = vmatpush2.bf16.xpose.msra.mxu1 %v2559_v15  ;;  %v237_v14 = vld [vmem:[#allocation6 + $0x4d8] sm:$0xff] }
 0x183   :  { %1854 = vmatprep.subr.bf16.mxu0 %v2550_v16  ;;  %1897 = vmatprep.subr.bf16.mxu1 %v2552_v17  ;;  %v241_v15 = vld [vmem:[#allocation6 + $0x4f8] sm:$0xff]  ;;  %v2499_v17 = vcombine.low %v245_v8, %v249_v9 }
 0x184   :  { %v2492_v19 = vcombine.high %v237_v14, %v241_v15 }
 0x18a   :  { %1855 = vmatpush2.bf16.xpose.msra.mxu0 %v2549_v22  ;;  %1898 = vmatpush2.bf16.xpose.msra.mxu1 %v2551_v24  ;;  %v229_v22 = vld [vmem:[#allocation6 + $0x498] sm:$0xff] }
 0x18b   :  { %1856 = vmatprep.subr.bf16.mxu0 %v2542_v25  ;;  %1899 = vmatprep.subr.bf16.mxu1 %v2544_v26  ;;  %v233_v24 = vld [vmem:[#allocation6 + $0x4b8] sm:$0xff]  ;;  %v2491_v26 = vcombine.low %v237_v14, %v241_v15  ;;  %v300_v14 = vld [vmem:[#allocation6 + $0x6d0] sm:$0xff] }
 0x18c   :  { %v2484_v29 = vcombine.high %v229_v22, %v233_v24  ;;  %v304_v15 = vld [vmem:[#allocation6 + $0x6f0] sm:$0xff] }
 0x192   :  { %1857 = vmatpush2.bf16.xpose.msra.mxu0 %v2541_v36  ;;  %1900 = vmatpush2.bf16.xpose.msra.mxu1 %v2543_v37  ;;  %v221_v36 = vld [vmem:[#allocation6 + $0x458] sm:$0xff] }
 0x193   :  { %1858 = vmatprep.subr.bf16.mxu0 %v2534_v38  ;;  %1901 = vmatprep.subr.bf16.mxu1 %v2536_v39  ;;  %v225_v37 = vld [vmem:[#allocation6 + $0x478] sm:$0xff]  ;;  %v2481_v38 = vcombine.low %v228_v20, %v232_v21  ;;  %v2483_v39 = vcombine.low %v229_v22, %v233_v24  ;;  %v2554_v20 = vcombine.high %v300_v14, %v304_v15  ;;  %v292_v22 = vld [vmem:[#allocation6 + $0x690] sm:$0xff] }
 0x194   :  { %v2476_v43 = vcombine.high %v221_v36, %v225_v37  ;;  %v296_v24 = vld [vmem:[#allocation6 + $0x6b0] sm:$0xff] }
 0x19a   :  { %1859 = vmatpush2.bf16.xpose.msra.mxu0 %v2533_v46  ;;  %1902 = vmatpush2.bf16.xpose.msra.mxu1 %v2535_v47  ;;  %v213_v46 = vld [vmem:[#allocation6 + $0x418] sm:$0xff] }
 0x19b   :  { %1860 = vmatprep.subr.bf16.mxu0 %v2526_v48  ;;  %1903 = vmatprep.subr.bf16.mxu1 %v2528_v49  ;;  %v217_v47 = vld [vmem:[#allocation6 + $0x438] sm:$0xff]  ;;  %v2473_v48 = vcombine.low %v220_v30, %v224_v31  ;;  %v2475_v49 = vcombine.low %v221_v36, %v225_v37  ;;  %v2546_v30 = vcombine.high %v292_v22, %v296_v24  ;;  %v284_v36 = vld [vmem:[#allocation6 + $0x650] sm:$0xff] }
 0x19c   :  { %v2468_v51 = vcombine.high %v213_v46, %v217_v47  ;;  %v288_v37 = vld [vmem:[#allocation6 + $0x670] sm:$0xff] }
 0x1a2   :  { %1861 = vmatpush2.bf16.xpose.msra.mxu0 %v2525_v54  ;;  %1904 = vmatpush2.bf16.xpose.msra.mxu1 %v2527_v55  ;;  %v333_v54 = vld [vmem:[#allocation6 + $0x7d8] sm:$0xff] }
 0x1a3   :  { %1916 = vmatprep.subr.bf16.mxu0 %v2522_v56  ;;  %1959 = vmatprep.subr.bf16.mxu1 %v2524_v57  ;;  %v337_v55 = vld [vmem:[#allocation6 + $0x7f8] sm:$0xff]  ;;  %v2465_v56 = vcombine.low %v212_v44, %v216_v45  ;;  %v2467_v57 = vcombine.low %v213_v46, %v217_v47  ;;  %v2538_v44 = vcombine.high %v284_v36, %v288_v37  ;;  %v276_v46 = vld [vmem:[#allocation6 + $0x610] sm:$0xff] }
 0x1a4   :  { %v2588_v59 = vcombine.high %v333_v54, %v337_v55  ;;  %v280_v47 = vld [vmem:[#allocation6 + $0x630] sm:$0xff] }
 0x1a9   :  { %1863 = vmatmul.mubr.bf16.vlgmr.msra.gmra.mxu0 %v2772_v34  ;;  %1906 = vmatmul.mubr.bf16.vlgmr.msra.gmra.mxu1 %v2776_v40  ;;  %v244_v34 = vld [vmem:[#allocation6 + $0x510] sm:$0xff] }
 0x1aa   :  { %1917 = vmatpush1.bf16.xpose.msra.mxu0 %v2521_v62  ;;  %1960 = vmatpush1.bf16.xpose.msra.mxu1 %v2523_v63  ;;  %v248_v40 = vld [vmem:[#allocation6 + $0x530] sm:$0xff]  ;;  %v325_v62 = vld [vmem:[#allocation6 + $0x798] sm:$0xff] }
 0x1ab   :  { %1918 = vmatprep.subr.bf16.mxu0 %v2514_v0  ;;  %1961 = vmatprep.subr.bf16.mxu1 %v2516_v1  ;;  %v2498_v12 = vcombine.high %v244_v34, %v248_v40  ;;  %v2497_v16 = vcombine.low %v244_v34, %v248_v40  ;;  %v329_v63 = vld [vmem:[#allocation6 + $0x7b8] sm:$0xff]  ;;  %v2585_v0 = vcombine.low %v332_v52, %v336_v53 }
 0x1ac   :  { %1948 = vmatprep.mubr.bf16.mxu0 %v2786_v32  ;;  %1991 = vmatprep.mubr.bf16.mxu1 %v2789_v33  ;;  %v2500_v32 = vcombine.high %v245_v8, %v249_v9  ;;  %v236_v33 = vld [vmem:[#allocation6 + $0x4d0] sm:$0xff]  ;;  %v2587_v1 = vcombine.low %v333_v54, %v337_v55  ;;  %v2580_v3 = vcombine.high %v325_v62, %v329_v63 }
 0x1ad   :  { %v2490_v18 = vcombine.high %v236_v33, %v240_v13  ;;  %v2489_v25 = vcombine.low %v236_v33, %v240_v13  ;;  %v2570_v34 = vcombine.high %v316_v4, %v320_v35  ;;  %v308_v8 = vld [vmem:[#allocation6 + $0x710] sm:$0xff]  ;;  %v2530_v52 = vcombine.high %v276_v46, %v280_v47 }
 0x1ae   :  { %v312_v9 = vld [vmem:[#allocation6 + $0x730] sm:$0xff]  ;;  %v2529_v54 = vcombine.low %v276_v46, %v280_v47 }
 0x1af   :  { %v2562_v33 = vcombine.high %v308_v8, %v312_v9 }
 0x1b2   :  { %1919 = vmatpush1.bf16.xpose.msra.mxu0 %v2513_v41  ;;  %1962 = vmatpush1.bf16.xpose.msra.mxu1 %v2515_v5  ;;  %v317_v41 = vld [vmem:[#allocation6 + $0x758] sm:$0xff] }
 0x1b3   :  { %1920 = vmatprep.subr.bf16.mxu0 %v2506_v6  ;;  %1963 = vmatprep.subr.bf16.mxu1 %v2508_v7  ;;  %v321_v5 = vld [vmem:[#allocation6 + $0x778] sm:$0xff]  ;;  %v2577_v6 = vcombine.low %v324_v60, %v328_v61  ;;  %v2579_v7 = vcombine.low %v325_v62, %v329_v63 }
 0x1b4   :  { %v2572_v40 = vcombine.high %v317_v41, %v321_v5 }
 0x1ba   :  { %1921 = vmatpush1.bf16.xpose.msra.mxu0 %v2505_v10  ;;  %1964 = vmatpush1.bf16.xpose.msra.mxu1 %v2507_v11  ;;  %v309_v10 = vld [vmem:[#allocation6 + $0x718] sm:$0xff] }
 0x1bb   :  { %1922 = vmatprep.subr.bf16.mxu0 %v2498_v12  ;;  %1965 = vmatprep.subr.bf16.mxu1 %v2500_v32  ;;  %v313_v11 = vld [vmem:[#allocation6 + $0x738] sm:$0xff]  ;;  %v2569_v12 = vcombine.low %v316_v4, %v320_v35  ;;  %v2571_v32 = vcombine.low %v317_v41, %v321_v5 }
 0x1bc   :  { %v2564_v13 = vcombine.high %v309_v10, %v313_v11 }
 0x1c2   :  { %1923 = vmatpush1.bf16.xpose.msra.mxu0 %v2497_v16  ;;  %1966 = vmatpush1.bf16.xpose.msra.mxu1 %v2499_v17  ;;  %v301_v16 = vld [vmem:[#allocation6 + $0x6d8] sm:$0xff] }
 0x1c3   :  { %1924 = vmatprep.subr.bf16.mxu0 %v2490_v18  ;;  %1967 = vmatprep.subr.bf16.mxu1 %v2492_v19  ;;  %v305_v17 = vld [vmem:[#allocation6 + $0x6f8] sm:$0xff]  ;;  %v2561_v18 = vcombine.low %v308_v8, %v312_v9  ;;  %v2563_v19 = vcombine.low %v309_v10, %v313_v11 }
 0x1c4   :  { %v2556_v21 = vcombine.high %v301_v16, %v305_v17 }
 0x1ca   :  { %1925 = vmatpush1.bf16.xpose.msra.mxu0 %v2489_v25  ;;  %1968 = vmatpush1.bf16.xpose.msra.mxu1 %v2491_v26  ;;  %v293_v25 = vld [vmem:[#allocation6 + $0x698] sm:$0xff] }
 0x1cb   :  { %1926 = vmatprep.subr.bf16.mxu0 %v2482_v28  ;;  %1969 = vmatprep.subr.bf16.mxu1 %v2484_v29  ;;  %v297_v26 = vld [vmem:[#allocation6 + $0x6b8] sm:$0xff]  ;;  %v2553_v28 = vcombine.low %v300_v14, %v304_v15  ;;  %v2555_v29 = vcombine.low %v301_v16, %v305_v17 }
 0x1cc   :  { %v2548_v31 = vcombine.high %v293_v25, %v297_v26 }
 0x1d2   :  { %1927 = vmatpush1.bf16.xpose.msra.mxu0 %v2481_v38  ;;  %1970 = vmatpush1.bf16.xpose.msra.mxu1 %v2483_v39  ;;  %v285_v38 = vld [vmem:[#allocation6 + $0x658] sm:$0xff] }
 0x1d3   :  { %1928 = vmatprep.subr.bf16.mxu0 %v2474_v42  ;;  %1971 = vmatprep.subr.bf16.mxu1 %v2476_v43  ;;  %v289_v39 = vld [vmem:[#allocation6 + $0x678] sm:$0xff]  ;;  %v2545_v42 = vcombine.low %v292_v22, %v296_v24  ;;  %v2547_v43 = vcombine.low %v293_v25, %v297_v26 }
 0x1d4   :  { %v2540_v45 = vcombine.high %v285_v38, %v289_v39 }
 0x1da   :  { %1929 = vmatpush1.bf16.xpose.msra.mxu0 %v2473_v48  ;;  %1972 = vmatpush1.bf16.xpose.msra.mxu1 %v2475_v49  ;;  %v277_v48 = vld [vmem:[#allocation6 + $0x618] sm:$0xff] }
 0x1db   :  { %1930 = vmatprep.subr.bf16.mxu0 %v2466_v50  ;;  %1973 = vmatprep.subr.bf16.mxu1 %v2468_v51  ;;  %v281_v49 = vld [vmem:[#allocation6 + $0x638] sm:$0xff]  ;;  %v2537_v50 = vcombine.low %v284_v36, %v288_v37  ;;  %v2539_v51 = vcombine.low %v285_v38, %v289_v39 }
 0x1dc   :  { %v2532_v53 = vcombine.high %v277_v48, %v281_v49  ;;  %v2531_v55 = vcombine.low %v277_v48, %v281_v49 }
 0x1e2   :  { %1931 = vmatpush1.bf16.xpose.msra.mxu0 %v2465_v56  ;;  %1974 = vmatpush1.bf16.xpose.msra.mxu1 %v2467_v57  ;;  %v1692_v56 = vpop.f32.mrf.mxu0 }
 0x1e3   :  { %1932 = vmatprep.subr.bf16.mxu0 %v2586_v58  ;;  %1975 = vmatprep.subr.bf16.mxu1 %v2588_v59  ;;  %v1735_v58 = vpop.f32.mrf.mxu1 }
 0x1e4   :  { %v1694_v57 = vpop.f32.mrf.mxu0 }
 0x1e5   :  { %v1737_v60 = vpop.f32.mrf.mxu1 }
 0x1e6   :  { %v1696_v59 = vpop.f32.mrf.mxu0 }
 0x1e7   :  { %v1739_v62 = vpop.f32.mrf.mxu1 }
 0x1e8   :  { %v1698_v61 = vpop.f32.mrf.mxu0 }
 0x1ea   :  { %1933 = vmatpush2.bf16.xpose.msra.mxu0 %v2585_v0  ;;  %1976 = vmatpush2.bf16.xpose.msra.mxu1 %v2587_v1  ;;  %v1778_v63 = vpop.f32.mrf.mxu0  ;;  %v1741_v0 = vpop.f32.mrf.mxu1 }
 0x1eb   :  { %1934 = vmatprep.subr.bf16.mxu0 %v2578_v2  ;;  %1977 = vmatprep.subr.bf16.mxu1 %v2580_v3  ;;  %v1742_v41 = vadd.f32 %v1741_v0, %v1698_v61 }
 0x1ec   :  { %v1780_v1 = vpop.f32.mrf.mxu0  ;;  %v1821_v2 = vpop.f32.mrf.mxu1 }
 0x1ee   :  { %v1782_v3 = vpop.f32.mrf.mxu0  ;;  %v1823_v4 = vpop.f32.mrf.mxu1 }
 0x1f0   :  { %v1784_v35 = vpop.f32.mrf.mxu0  ;;  %v1825_v5 = vpop.f32.mrf.mxu1 }
 0x1f2   :  { %1935 = vmatpush2.bf16.xpose.msra.mxu0 %v2577_v6  ;;  %1978 = vmatpush2.bf16.xpose.msra.mxu1 %v2579_v7  ;;  %v1738_v6 = vadd.f32 %v1737_v60, %v1694_v57  ;;  %v1785_v7 = vadd.f32 %v1784_v35, %v1742_v41  ;;  %v1827_v8 = vpop.f32.mrf.mxu1 }
 0x1f3   :  { %1936 = vmatprep.subr.bf16.mxu0 %v2570_v34  ;;  %1979 = vmatprep.subr.bf16.mxu1 %v2572_v40 }
 0x1f4   :  { %v1781_v34 = vadd.f32 %v1780_v1, %v1738_v6  ;;  %v2804_v10 = vadd.f32 %v1827_v8, %v1785_v7 }
 0x1f6   :  { %v2806_v11 = vadd.f32 %v1823_v4, %v1781_v34 }
 0x1fa   :  { %1937 = vmatpush2.bf16.xpose.msra.mxu0 %v2569_v12  ;;  %1980 = vmatpush2.bf16.xpose.msra.mxu1 %v2571_v32 }
 0x1fb   :  { %1938 = vmatprep.subr.bf16.mxu0 %v2562_v33  ;;  %1981 = vmatprep.subr.bf16.mxu1 %v2564_v13  ;;  %v2036_v33 = vadd.f32 %v2804_v10, %v2806_v11 }
 0x1fd   :  { %v2037_v14 = vrot.slane %v2036_v33, 4 }
 0x1ff   :  { %v2038_v16 = vadd.f32 %v2037_v14, %v2036_v33 }
 0x202   :  { %1939 = vmatpush2.bf16.xpose.msra.mxu0 %v2561_v18  ;;  %1982 = vmatpush2.bf16.xpose.msra.mxu1 %v2563_v19  ;;  %v2039_v18 = vrot.slane %v2038_v16, 2 }
 0x203   :  { %1940 = vmatprep.subr.bf16.mxu0 %v2554_v20  ;;  %1983 = vmatprep.subr.bf16.mxu1 %v2556_v21 }
 0x204   :  { %v2040_v20 = vadd.f32 %v2039_v18, %v2038_v16 }
 0x206   :  { %v2041_v25 = vrot.slane %v2040_v20, 1 }
 0x20a   :  { %1941 = vmatpush2.bf16.xpose.msra.mxu0 %v2553_v28  ;;  %1984 = vmatpush2.bf16.xpose.msra.mxu1 %v2555_v29 }
 0x20b   :  { %1942 = vmatprep.subr.bf16.mxu0 %v2546_v30  ;;  %1985 = vmatprep.subr.bf16.mxu1 %v2548_v31  ;;  %v2042_v30 = vadd.f32 %v2041_v25, %v2040_v20 }
 0x20d   :  { %v2816_v38 = vmul.f32 0.0625, %v2042_v30 }
 0x20f   :  { %v2067_v46 = vsub.f32 %v2804_v10, %v2816_v38 }
 0x212   :  { %1943 = vmatpush2.bf16.xpose.msra.mxu0 %v2545_v42  ;;  %1986 = vmatpush2.bf16.xpose.msra.mxu1 %v2547_v43 }
 0x213   :  { %1944 = vmatprep.subr.bf16.mxu0 %v2538_v44  ;;  %1987 = vmatprep.subr.bf16.mxu1 %v2540_v45  ;;  %v2063_v44 = vsub.f32 %v2806_v11, %v2816_v38 }
 0x21a   :  { %1945 = vmatpush2.bf16.xpose.msra.mxu0 %v2537_v50  ;;  %1988 = vmatpush2.bf16.xpose.msra.mxu1 %v2539_v51 }
 0x21b   :  { %1946 = vmatprep.subr.bf16.mxu0 %v2530_v52  ;;  %1989 = vmatprep.subr.bf16.mxu1 %v2532_v53 }
 0x222   :  { %1947 = vmatpush2.bf16.xpose.msra.mxu0 %v2529_v54  ;;  %1990 = vmatpush2.bf16.xpose.msra.mxu1 %v2531_v55 }
 0x229   :  { %1949 = vmatmul.mubr.bf16.vlgmr.msra.gmra.mxu0 %v2782_v23  ;;  %1992 = vmatmul.mubr.bf16.vlgmr.msra.gmra.mxu1 %v2784_v27  ;;  %v1740_v23 = vadd.f32 %v1739_v62, %v1696_v59  ;;  %v1736_v27 = vadd.f32 %v1735_v58, %v1692_v56  ;;  %v2071_v56 = vmul.f32 %v2063_v44, %v2063_v44 }
 0x22a   :  { %v2075_v58 = vmul.f32 %v2067_v46, %v2067_v46 }
 0x22b   :  { %v1783_v40 = vadd.f32 %v1782_v3, %v1740_v23  ;;  %v1779_v9 = vadd.f32 %v1778_v63, %v1736_v27 }
 0x22c   :  { %v2085_v41 = vadd.f32 %v2075_v58, %v2071_v56 }
 0x22d   :  { %v2808_v12 = vadd.f32 %v1825_v5, %v1783_v40  ;;  %v2810_v32 = vadd.f32 %v1821_v2, %v1779_v9 }
 0x22e   :  { %v2086_v40 = vrot.slane %v2085_v41, 4 }
 0x22f   :  { %v2029_v13 = vadd.f32 %v2808_v12, %v2810_v32 }
 0x231   :  { %v2030_v15 = vrot.slane %v2029_v13, 4 }
 0x233   :  { %v2031_v17 = vadd.f32 %v2030_v15, %v2029_v13  ;;  %v2087_v15 = vadd.f32 %v2086_v40, %v2085_v41 }
 0x235   :  { %v2032_v19 = vrot.slane %v2031_v17, 2 }
 0x237   :  { %v2033_v21 = vadd.f32 %v2032_v19, %v2031_v17 }
 0x239   :  { %v2034_v26 = vrot.slane %v2033_v21, 1 }
 0x23b   :  { %v2035_v31 = vadd.f32 %v2034_v26, %v2033_v21  ;;  %v2088_v21 = vrot.slane %v2087_v15, 2 }
 0x23d   :  { %v2818_v39 = vmul.f32 0.0625, %v2035_v31 }
 0x23f   :  { %v2062_v49 = vsub.f32 %v2810_v32, %v2818_v39  ;;  %v2066_v50 = vsub.f32 %v2808_v12, %v2818_v39 }
 0x241   :  { %v2070_v63 = vmul.f32 %v2062_v49, %v2062_v49  ;;  %v2074_v0 = vmul.f32 %v2066_v50, %v2066_v50 }
 0x243   :  { %v2078_v7 = vadd.f32 %v2074_v0, %v2070_v63 }
 0x245   :  { %v2079_v33 = vrot.slane %v2078_v7, 4 }
 0x247   :  { %v2080_v18 = vadd.f32 %v2079_v33, %v2078_v7  ;;  %v2128_v33 = vlaneseq }
 0x249   :  { %v2081_v25 = vrot.slane %v2080_v18, 2 }
 0x269   :  { %v1864_v22 = vpop.f32.mrf.mxu0  ;;  %v1907_v24 = vpop.f32.mrf.mxu1 }
 0x26a   :  { %v1908_v47 = vadd.f32 %v1907_v24, %v1864_v22 }
 0x26b   :  { %v1866_v28 = vpop.f32.mrf.mxu0  ;;  %v1909_v29 = vpop.f32.mrf.mxu1 }
 0x26c   :  { %v1910_v52 = vadd.f32 %v1909_v29, %v1866_v28  ;;  %v2089_v29 = vadd.f32 %v2088_v21, %v2087_v15 }
 0x26d   :  { %v1868_v36 = vpop.f32.mrf.mxu0  ;;  %v1911_v37 = vpop.f32.mrf.mxu1 }
 0x26e   :  { %v1912_v53 = vadd.f32 %v1911_v37, %v1868_v36  ;;  %v2082_v37 = vadd.f32 %v2081_v25, %v2080_v18  ;;  %v2090_v46 = vrot.slane %v2089_v29, 1 }
 0x26f   :  { %v1870_v42 = vpop.f32.mrf.mxu0  ;;  %v1913_v43 = vpop.f32.mrf.mxu1 }
 0x270   :  { %v1914_v59 = vadd.f32 %v1913_v43, %v1870_v42  ;;  %v2083_v50 = vrot.slane %v2082_v37, 1 }
 0x272   :  { %v2084_v56 = vadd.f32 %v2083_v50, %v2082_v37 }
 0x2e9   :  { %v1950_v45 = vpop.f32.mrf.mxu0  ;;  %v1993_v48 = vpop.f32.mrf.mxu1 }
 0x2ea   :  { %v1951_v54 = vadd.f32 %v1950_v45, %v1908_v47 }
 0x2eb   :  { %v1952_v51 = vpop.f32.mrf.mxu0  ;;  %v1995_v55 = vpop.f32.mrf.mxu1 }
 0x2ec   :  { %v1953_v60 = vadd.f32 %v1952_v51, %v1910_v52  ;;  %v2828_v2 = vadd.f32 %v1993_v48, %v1951_v54 }
 0x2ed   :  { %v1954_v57 = vpop.f32.mrf.mxu0  ;;  %v1997_v62 = vpop.f32.mrf.mxu1 }
 0x2ee   :  { %v1955_v61 = vadd.f32 %v1954_v57, %v1912_v53  ;;  %v2832_v5 = vadd.f32 %v1995_v55, %v1953_v60  ;;  %v2091_v53 = vadd.f32 %v2090_v46, %v2089_v29 }
 0x2ef   :  { %v1956_v1 = vpop.f32.mrf.mxu0  ;;  %v1999_v35 = vpop.f32.mrf.mxu1 }
 0x2f0   :  { %v2830_v3 = vadd.f32 %v1997_v62, %v1955_v61  ;;  %v1957_v4 = vadd.f32 %v1956_v1, %v1914_v59  ;;  %v2107_v59 = vmul.f32 0.0625, %v2091_v53  ;;  %v2106_v62 = vmul.f32 0.0625, %v2084_v56 }
 0x2f2   :  { %v2043_v6 = vadd.f32 %v2830_v3, %v2828_v2  ;;  %v2836_v23 = vadd.f32 %v1999_v35, %v1957_v4  ;;  %v2112_v1 = vadd.f32 1e-05, %v2107_v59  ;;  %v2111_v41 = vadd.f32 1e-05, %v2106_v62 }
 0x2f4   :  { %v2044_v27 = vrot.slane %v2043_v6, 4  ;;  %v2050_v34 = vadd.f32 %v2836_v23, %v2832_v5  ;;  %2604 = vrsqrt.f32 %v2112_v1 }
 0x2f5   :  { %2606 = vrsqrt.f32 %v2111_v41 }
 0x2f6   :  { %v2045_v8 = vadd.f32 %v2044_v27, %v2043_v6  ;;  %v2051_v9 = vrot.slane %v2050_v34, 4 }
 0x2f8   :  { %v2046_v13 = vrot.slane %v2045_v8, 2  ;;  %v2052_v14 = vadd.f32 %v2051_v9, %v2050_v34 }
 0x2fa   :  { %v2047_v16 = vadd.f32 %v2046_v13, %v2045_v8  ;;  %v2053_v17 = vrot.slane %v2052_v14, 2  ;;  %v2735_v8 = vmov 1966171168  }
 0x2fb   :  { %v2126_v9 = vunpack.c.l.s4 %v2735_v8 }
 0x2fc   :  { %v2048_v19 = vrot.slane %v2047_v16, 1  ;;  %v2054_v20 = vadd.f32 %v2053_v17, %v2052_v14  ;;  %v2129_v14 = vshrl.u32 %v2128_v33, 7 }
 0x2fd   :  { %v2127_v13 = vunpack.c.0.s8 %v2126_v9 }
 0x2fe   :  { %v2049_v22 = vadd.f32 %v2048_v19, %v2047_v16  ;;  %v2055_v24 = vrot.slane %v2054_v20, 1  ;;  %v2154_v29 = vsub.s32 0, %v2129_v14  ;;  %v2162_v37 = vsub.s32 2, %v2129_v14 }
 0x2ff   :  { %v2130_v19 = vsub.s32 %v2127_v13, %v2129_v14 }
 0x300   :  { %v2840_v26 = vmul.f32 0.0625, %v2049_v22  ;;  %v2056_v28 = vadd.f32 %v2055_v24, %v2054_v20 }
 0x301   :  { %v2605_v15 = vpop.eup %2604 }
 0x302   :  { %v2064_v30 = vsub.f32 %v2828_v2, %v2840_v26  ;;  %v2068_v31 = vsub.f32 %v2830_v3, %v2840_v26  ;;  %v2846_v36 = vmul.f32 0.0625, %v2056_v28  ;;  %v2607_v16 = vpop.eup %2606  ;;  %v2110_v28 = vld [vmem:[#allocation8] ss:$2 sm:$0xf] }
 0x303   :  { %v2123_v18 = vcombine.low %v2607_v16, %v2605_v15 }
 0x304   :  { %v2072_v42 = vmul.f32 %v2064_v30, %v2064_v30  ;;  %v2076_v43 = vmul.f32 %v2068_v31, %v2068_v31  ;;  %v2065_v44 = vsub.f32 %v2832_v5, %v2846_v36  ;;  %v2069_v45 = vsub.f32 %v2836_v23, %v2846_v36 }
 0x305   :  { %v2131_v22 = vrot.slane %v2123_v18, %v2130_v19  ;;  %v2158_v31 = vsub.s32 1, %v2129_v14 }
 0x306   :  { %v2092_v47 = vadd.f32 %v2076_v43, %v2072_v42  ;;  %v2073_v48 = vmul.f32 %v2065_v44, %v2065_v44  ;;  %v2077_v49 = vmul.f32 %v2069_v45, %v2069_v45  ;;  %v2166_v42 = vsub.s32 3, %v2129_v14 }
 0x308   :  { %v2093_v51 = vrot.slane %v2092_v47, 4  ;;  %v2099_v52 = vadd.f32 %v2077_v49, %v2073_v48 }
 0x30a   :  { %v2094_v54 = vadd.f32 %v2093_v51, %v2092_v47  ;;  %v2100_v55 = vrot.slane %v2099_v52, 4 }
 0x30c   :  { %v2095_v57 = vrot.slane %v2094_v54, 2  ;;  %v2101_v58 = vadd.f32 %v2100_v55, %v2099_v52 }
 0x30e   :  { %v2096_v60 = vadd.f32 %v2095_v57, %v2094_v54  ;;  %v2102_v61 = vrot.slane %v2101_v58, 2  ;;  %v2150_v57 = vld [vmem:[#allocation8 + $0x1] ss:$2 sm:$0xf] }
 0x310   :  { %v2097_v63 = vrot.slane %v2096_v60, 1  ;;  %v2103_v0 = vadd.f32 %v2102_v61, %v2101_v58 }
 0x312   :  { %v2098_v4 = vadd.f32 %v2097_v63, %v2096_v60  ;;  %v2104_v35 = vrot.slane %v2103_v0, 1 }
 0x314   :  { %v2108_v6 = vmul.f32 0.0625, %v2098_v4  ;;  %v2105_v7 = vadd.f32 %v2104_v35, %v2103_v0 }
 0x316   :  { %v2113_v27 = vadd.f32 1e-05, %v2108_v6  ;;  %v2109_v34 = vmul.f32 0.0625, %v2105_v7 }
 0x318   :  { %v2114_v40 = vadd.f32 1e-05, %v2109_v34  ;;  %2608 = vrsqrt.f32 %v2113_v27 }
 0x31a   :  { %2610 = vrsqrt.f32 %v2114_v40 }
 0x325   :  { %v2609_v17 = vpop.eup %2608 }
 0x327   :  { %v2611_v20 = vpop.eup %2610 }
 0x328   :  { %v2124_v21 = vcombine.low %v2609_v17, %v2611_v20 }
 0x32a   :  { %v2138_v24 = vrot.slane %v2124_v21, %v2130_v19 }
 0x32c   :  { %v2139_v25 = vcombine.low %v2131_v22, %v2138_v24 }
 0x32e   :  { %v2146_v30 = vrot.slane %v2139_v25, %v2130_v19 }
 0x330   :  { %v2148_v43 = vmul.f32 %v2146_v30, %v2110_v28 }
 0x332   :  { %v2155_v44 = vrot.slane %v2148_v43, %v2154_v29  ;;  %v2159_v45 = vrot.slane %v2148_v43, %v2158_v31  ;;  %v2163_v46 = vrot.slane %v2148_v43, %v2162_v37  ;;  %v2167_v47 = vrot.slane %v2148_v43, %v2166_v42 }
 0x334   :  { %v2172_v48 = vmul.f32 %v2155_v44, %v2818_v39  ;;  %v2173_v49 = vmul.f32 %v2159_v45, %v2816_v38  ;;  %v2174_v50 = vmul.f32 %v2163_v46, %v2840_v26  ;;  %v2175_v51 = vmul.f32 %v2167_v47, %v2846_v36 }
 0x335   :  { %v2206_v60 = vmul.f32 %v2155_v44, %v2810_v32  ;;  %v2207_v61 = vmul.f32 %v2159_v45, %v2806_v11  ;;  %v2208_v39 = vmul.f32 %v2163_v46, %v2828_v2  ;;  %v2209_v38 = vmul.f32 %v2167_v47, %v2832_v5 }
 0x336   :  { %v2180_v52 = vcombine.low %v2172_v48, %v2173_v49  ;;  %v2181_v53 = vcombine.low %v2174_v50, %v2175_v51  ;;  %v2210_v0 = vmul.f32 %v2155_v44, %v2808_v12  ;;  %v2211_v1 = vmul.f32 %v2159_v45, %v2804_v10 }
 0x337   :  { %v2212_v4 = vmul.f32 %v2163_v46, %v2830_v3  ;;  %v2213_v11 = vmul.f32 %v2167_v47, %v2836_v23 }
 0x338   :  { %v2188_v54 = vrot.slane %v2180_v52, %v2130_v19  ;;  %v2195_v55 = vrot.slane %v2181_v53, %v2130_v19 }
 0x33a   :  { %v2196_v56 = vcombine.low %v2188_v54, %v2195_v55 }
 0x33c   :  { %v2203_v58 = vrot.slane %v2196_v56, %v2130_v19 }
 0x33e   :  { %v2205_v59 = vsub.f32 %v2150_v57, %v2203_v58 }
 0x340   :  { %v2218_v62 = vrot.slane %v2205_v59, %v2154_v29  ;;  %v2222_v26 = vrot.slane %v2205_v59, %v2158_v31  ;;  %v2226_v63 = vrot.slane %v2205_v59, %v2162_v37  ;;  %v2230_v36 = vrot.slane %v2205_v59, %v2166_v42 }
 0x342   :  { %v2235_v35 = vadd.f32 %v2218_v62, %v2206_v60  ;;  %v2236_v41 = vadd.f32 %v2222_v26, %v2207_v61  ;;  %v2237_v6 = vadd.f32 %v2226_v63, %v2208_v39  ;;  %v2238_v32 = vadd.f32 %v2230_v36, %v2209_v38 }
 0x343   :  { %v2239_v7 = vadd.f32 %v2218_v62, %v2210_v0  ;;  %v2240_v2 = vadd.f32 %v2222_v26, %v2211_v1  ;;  %v2241_v27 = vadd.f32 %v2226_v63, %v2212_v4  ;;  %v2242_v8 = vadd.f32 %v2230_v36, %v2213_v11 }
 0x344   :  { %v2589_v5 = vmul.f32 -1.442695, %v2235_v35  ;;  %v2590_v34 = vmul.f32 -1.442695, %v2236_v41  ;;  %v2591_v40 = vmul.f32 -1.442695, %v2237_v6 }
 0x345   :  { %v2592_v9 = vmul.f32 -1.442695, %v2238_v32  ;;  %v2593_v12 = vmul.f32 -1.442695, %v2239_v7  ;;  %v2594_v10 = vmul.f32 -1.442695, %v2240_v2 }
 0x346   :  { %2612 = vpow2.f32 %v2589_v5  ;;  %v2595_v3 = vmul.f32 -1.442695, %v2241_v27  ;;  %v2596_v33 = vmul.f32 -1.442695, %v2242_v8 }
 0x347   :  { %2614 = vpow2.f32 %v2590_v34 }
 0x348   :  { %2616 = vpow2.f32 %v2591_v40 }
 0x349   :  { %2618 = vpow2.f32 %v2592_v9 }
 0x34a   :  { %2620 = vpow2.f32 %v2593_v12 }
 0x34b   :  { %2622 = vpow2.f32 %v2594_v10 }
 0x34c   :  { %2624 = vpow2.f32 %v2595_v3 }
 0x34d   :  { %2626 = vpow2.f32 %v2596_v33 }
 0x353   :  { %v2613_v23 = vpop.eup %2612 }
 0x354   :  { %v2615_v13 = vpop.eup %2614  ;;  %v2267_v14 = vadd.f32 1.0, %v2613_v23 }
 0x355   :  { %v2617_v15 = vpop.eup %2616  ;;  %v2268_v16 = vadd.f32 1.0, %v2615_v13 }
 0x356   :  { %v2619_v17 = vpop.eup %2618  ;;  %v2269_v18 = vadd.f32 1.0, %v2617_v15  ;;  %2628 = vrcp.f32 %v2267_v14 }
 0x357   :  { %v2621_v19 = vpop.eup %2620  ;;  %v2270_v20 = vadd.f32 1.0, %v2619_v17  ;;  %2630 = vrcp.f32 %v2268_v16 }
 0x358   :  { %v2623_v21 = vpop.eup %2622  ;;  %v2271_v22 = vadd.f32 1.0, %v2621_v19  ;;  %2632 = vrcp.f32 %v2269_v18 }
 0x359   :  { %v2625_v24 = vpop.eup %2624  ;;  %v2272_v25 = vadd.f32 1.0, %v2623_v21  ;;  %2634 = vrcp.f32 %v2270_v20 }
 0x35a   :  { %v2627_v28 = vpop.eup %2626  ;;  %v2273_v29 = vadd.f32 1.0, %v2625_v24  ;;  %2636 = vrcp.f32 %v2271_v22 }
 0x35b   :  { %v2274_v30 = vadd.f32 1.0, %v2627_v28  ;;  %2638 = vrcp.f32 %v2272_v25 }
 0x35c   :  { %2640 = vrcp.f32 %v2273_v29 }
 0x35d   :  { %2642 = vrcp.f32 %v2274_v30 }
 0x363   :  { %v2629_v31 = vpop.eup %2628 }
 0x364   :  { %v2631_v37 = vpop.eup %2630  ;;  %v2291_v42 = vmul.f32 %v2629_v31, %v2235_v35 }
 0x365   :  { %v2633_v43 = vpop.eup %2632  ;;  %v2292_v44 = vmul.f32 %v2631_v37, %v2236_v41 }
 0x366   :  { %v2635_v45 = vpop.eup %2634  ;;  %v2293_v46 = vmul.f32 %v2633_v43, %v2237_v6  ;;  %2299 = vst [vmem:[#allocation9] sm:$0xff] %v2291_v42 }
 0x367   :  { %v2637_v47 = vpop.eup %2636  ;;  %v2294_v48 = vmul.f32 %v2635_v45, %v2238_v32  ;;  %2300 = vst [vmem:[#allocation9 + $0x8] sm:$0xff] %v2292_v44 }
 0x368   :  { %v2639_v49 = vpop.eup %2638  ;;  %v2295_v50 = vmul.f32 %v2637_v47, %v2239_v7  ;;  %2301 = vst [vmem:[#allocation9 + $0x10] sm:$0xff] %v2293_v46 }
 0x369   :  { %v2641_v51 = vpop.eup %2640  ;;  %2302 = vst [vmem:[#allocation9 + $0x18] sm:$0xff] %v2294_v48  ;;  %v2296_v52 = vmul.f32 %v2639_v49, %v2240_v2 }
 0x36a   :  { %v2643_v53 = vpop.eup %2642  ;;  %v2297_v54 = vmul.f32 %v2641_v51, %v2241_v27  ;;  %2303 = vst [vmem:[#allocation9 + $0x20] sm:$0xff] %v2295_v50 }
 0x36b   :  { %v2298_v55 = vmul.f32 %v2643_v53, %v2242_v8  ;;  %2304 = vst [vmem:[#allocation9 + $0x28] sm:$0xff] %v2296_v52 }
 0x36c   :  { %2305 = vst [vmem:[#allocation9 + $0x30] sm:$0xff] %v2297_v54 }
 0x36d   :  { %2306 = vst [vmem:[#allocation9 + $0x38] sm:$0xff] %v2298_v55 }
 0x36e   :  { %2715 = shalt.err (!%p2712_p5)
}
 0x36f   :  { %2318 = dma.vmem_to_hbm [thread:$0]  %s2313_s2, 1024, %s2873_s3, [#allocation5], %s2732_s17, %s2732_s17, %s2733_s18  }
 0x370   :  { %2728 = dma.done.wait [#allocation5], 1024  }
 0x371   :  { %2729 = vsyncadd [#allocation5], 4294966272 }
 0x372   :  { %2322 = vsyncpa [#allocation4], 1 }
 0x373   :  { %2323 = vsyncpa [#allocation7], 1 }
 0x374   :  { %2324 = vsyncpa [#allocation5], 1 }

</bundles_post_ra>
